<compile_context>
chip_gen: v5e
topology: v5e:2x2
jax: 0.10.0
libtpu: 0.0.40
codegen_flags: <defaults>
</compile_context>

<pallas_src>
import functools

import jax
import jax.numpy as jnp
from jax.experimental import pallas as pl
from jax.experimental.pallas import tpu as pltpu


# ----------------------------------------------------------------------------
# Pallas kernels: fused two-layer point-wise MLPs.
#   chain2 :  y = act2( act1(x @ W1 + b1) @ W2 + b2 )           -> y
#   branch2:  h = act1(x @ W1 + b1) ;  y = act2(h @ W2 + b2)    -> (h, y)
# These cover every Conv2d(k=1)+BN(+ReLU) pair of the PyTorch graph.
# ----------------------------------------------------------------------------
def _chain2_kernel(x_ref, w1_ref, b1_ref, w2_ref, b2_ref, o_ref, *,
                   relu1, relu2):
    h = jnp.dot(x_ref[...], w1_ref[...],
                preferred_element_type=jnp.float32) + b1_ref[...]
    if relu1:
        h = jnp.maximum(h, 0.0)
    y = jnp.dot(h, w2_ref[...],
                preferred_element_type=jnp.float32) + b2_ref[...]
    if relu2:
        y = jnp.maximum(y, 0.0)
    o_ref[...] = y


def _branch2_kernel(x_ref, w1_ref, b1_ref, w2_ref, b2_ref, o1_ref, o2_ref, *,
                    relu1, relu2):
    h = jnp.dot(x_ref[...], w1_ref[...],
                preferred_element_type=jnp.float32) + b1_ref[...]
    if relu1:
        h = jnp.maximum(h, 0.0)
    o1_ref[...] = h
    y = jnp.dot(h, w2_ref[...],
                preferred_element_type=jnp.float32) + b2_ref[...]
    if relu2:
        y = jnp.maximum(y, 0.0)
    o2_ref[...] = y


def _row_tile(P, max_tile=512):
    """Largest multiple-of-128 tile <= max_tile that gives >= 2 grid blocks
    when possible (so both v7x TensorCores run; harmless on v5e/v6e)."""
    if P <= 256:
        return 128
    t = min(max_tile, (P + 1) // 2)
    return max(128, (t // 128) * 128)


def fused_mlp2(x, w1, b1, w2, b2, *, relu1=True, relu2=False, both=False,
               max_tile=512):
    """x: (P, Cin) -> y: (P, C2)   [and h: (P, C1) when both=True]."""
    P0, Cin = x.shape
    C1 = w1.shape[1]
    C2 = w2.shape[1]
    tile = _row_tile(P0, max_tile)

    x = x.astype(jnp.float32)
    pad = (-P0) % tile
    if pad:
        x = jnp.pad(x, ((0, pad), (0, 0)))
    P = P0 + pad

    in_specs = [
        pl.BlockSpec((tile, Cin), lambda i: (i, 0)),
        pl.BlockSpec((Cin, C1), lambda i: (0, 0)),
        pl.BlockSpec((1, C1), lambda i: (0, 0)),
        pl.BlockSpec((C1, C2), lambda i: (0, 0)),
        pl.BlockSpec((1, C2), lambda i: (0, 0)),
    ]
    if both:
        kernel = functools.partial(_branch2_kernel, relu1=relu1, relu2=relu2)
        out_shape = (jax.ShapeDtypeStruct((P, C1), jnp.float32),
                     jax.ShapeDtypeStruct((P, C2), jnp.float32))
        out_specs = (pl.BlockSpec((tile, C1), lambda i: (i, 0)),
                     pl.BlockSpec((tile, C2), lambda i: (i, 0)))
    else:
        kernel = functools.partial(_chain2_kernel, relu1=relu1, relu2=relu2)
        out_shape = jax.ShapeDtypeStruct((P, C2), jnp.float32)
        out_specs = pl.BlockSpec((tile, C2), lambda i: (i, 0))

    out = pl.pallas_call(
        kernel,
        out_shape=out_shape,
        grid_spec=pltpu.PrefetchScalarGridSpec(
            num_scalar_prefetch=0,
            grid=(P // tile,),
            in_specs=in_specs,
            out_specs=out_specs,
        ),
        compiler_params=pltpu.CompilerParams(
            dimension_semantics=("parallel",)),
    )(x,
      w1.astype(jnp.float32), b1.reshape(1, C1).astype(jnp.float32),
      w2.astype(jnp.float32), b2.reshape(1, C2).astype(jnp.float32))

    if both:
        return out[0][:P0], out[1][:P0]
    return out[:P0]


# ----------------------------------------------------------------------------
# VoxelMaxPool: scatter-max of point features onto a 2D grid (NHWC output).
# TODO(synk): deep_point.VoxelMaxPool is a CUDA scatter-max; the data-dependent
#             scatter has no clean Pallas equivalent -> jax.ops.segment_max.
# Empty / invalid voxels end up 0, matching the CUDA zero-init (features fed
# in here are post-ReLU, i.e. >= 0).
# ----------------------------------------------------------------------------
def voxel_max_pool(pcds_feat, pcds_ind, output_size, scale_rate):
    """pcds_feat: (B, N, C), pcds_ind: (B, N, 2) -> (B, H, W, C)."""
    B, N, C = pcds_feat.shape
    H, W = output_size
    ix = jnp.floor(pcds_ind[..., 0] * scale_rate[0]).astype(jnp.int32)
    iy = jnp.floor(pcds_ind[..., 1] * scale_rate[1]).astype(jnp.int32)
    valid = (ix >= 0) & (ix < H) & (iy >= 0) & (iy < W)
    cell = jnp.where(valid, ix * W + iy, H * W)           # invalid -> dump bin
    seg = jnp.arange(B, dtype=jnp.int32)[:, None] * (H * W + 1) + cell
    out = jax.ops.segment_max(pcds_feat.reshape(B * N, C),
                              seg.reshape(B * N),
                              num_segments=B * (H * W + 1))
    out = jnp.maximum(out, 0.0)                           # empty voxels -> 0
    return out.reshape(B, H * W + 1, C)[:, :H * W].reshape(B, H, W, C)


def gather_grid(grid_feat, coord):
    """grid_feat: (B, H, W, C), coord: (B, N, 3, 1) -> (B, N, C).
    TODO(synk): clamps out-of-range coords to the border; deep_point's
                Grid2Point may mask invalid points to zero instead."""
    B, H, W, C = grid_feat.shape
    ix = jnp.clip(coord[:, :, 0, 0].astype(jnp.int32), 0, H - 1)
    iy = jnp.clip(coord[:, :, 1, 0].astype(jnp.int32), 0, W - 1)
    bidx = jnp.arange(B)[:, None]
    return grid_feat[bidx, ix, iy, :]                     # (B, N, C)


# ----------------------------------------------------------------------------
# Parameter construction (deterministic, synthetic; BN folded into W/b).
# ----------------------------------------------------------------------------
def init_params(key, T=3, C_in=7, C_pt=64, n_cls=3):
    ks = jax.random.split(key, 16)

    def lin(k, cin, cout):
        kw, kb = jax.random.split(k)
        w = 0.1 * jax.random.normal(kw, (cin, cout), jnp.float32)
        b = 0.01 * jax.random.normal(kb, (cout,), jnp.float32)
        return w, b

    p = {}
    # PointNetStacker(7, 64, pre_bn=True, stack_num=2)
    p["pre1"] = lin(ks[0], C_in, C_pt)
    p["pre2"] = lin(ks[1], C_pt, C_pt)
    # MultiViewNetwork surrogate
    p["bev_fuse"] = lin(ks[2], T * C_pt + C_pt, C_pt)     # (T*64 + temporal64) -> 64
    p["sph_fuse"] = lin(ks[3], C_pt, 32)                  # 64 -> 32 range-view branch
    p["aux12"] = lin(ks[4], C_pt, 2 * n_cls)              # aux1|aux2 heads merged
    p["aux3"] = lin(ks[6], 32, n_cls)
    # CatFusion([64, 64, 32], 64)
    p["cat_fusion"] = lin(ks[7], C_pt + C_pt + 32, C_pt)
    # PredBranch(64, 3)
    p["pred"] = lin(ks[8], C_pt, n_cls)
    return p


# ----------------------------------------------------------------------------
# MOSNet.stage_forward (== infer compute path)
# ----------------------------------------------------------------------------
@functools.partial(jax.jit, static_argnames=("descartes_hw", "sphere_hw"))
def stage_forward(params, xyzi, descartes_coord, sphere_coord, temporal_res,
                  *, descartes_hw, sphere_hw):
    """
    xyzi:            (BS, T=3, 7, N, 1)
    descartes_coord: (BS, T=3, N, 3, 1)
    sphere_coord:    (BS, T=3, N, 3, 1)
    temporal_res:    (BS, 64, Hd, Wd) or None
    """
    BS, T, C, N, _ = xyzi.shape
    Hd, Wd = descartes_hw
    Hs, Ws = sphere_hw

    # ---- point_pre: PointNetStacker (7 -> 64 -> 64), one fused Pallas call ----
    x = jnp.transpose(xyzi[..., 0], (0, 1, 3, 2)).reshape(BS * T * N, C)
    point_rows = fused_mlp2(x, *params["pre1"], *params["pre2"],
                            relu1=True, relu2=True)             # (BS*T*N, 64)
    point_feats = point_rows.reshape(BS, T, N, 64)
    point_feats_t0 = point_feats[:, 0]                          # (BS, N, 64)

    # ---- descartes_feat_in = VoxelMaxPool over BEV grid (NHWC) ----
    des_ind = descartes_coord[..., 0].reshape(BS * T, N, 3)[:, :, :2]
    des_grid = voxel_max_pool(point_rows.reshape(BS * T, N, 64), des_ind,
                              (Hd, Wd), (1.0, 1.0))             # (BS*T,Hd,Wd,64)
    des_grid = jnp.transpose(des_grid.reshape(BS, T, Hd, Wd, 64),
                             (0, 2, 3, 1, 4)).reshape(BS, Hd, Wd, T * 64)

    descartes_coord_t0 = descartes_coord[:, 0]                  # (BS, N, 3, 1)
    sphere_coord_t0 = sphere_coord[:, 0]                        # (BS, N, 3, 1)

    # ---- MultiViewNetwork surrogate (one fused Pallas call per view) ----
    # TODO(synk): MultiViewNetwork internals not provided; structural surrogate
    #             (BEV fuse + sphere branch + 3 aux heads + temporal residual).
    if temporal_res is None:
        temporal_res = jnp.zeros((BS, 64, Hd, Wd), jnp.float32)
    bev_in = jnp.concatenate(
        [des_grid, jnp.transpose(temporal_res, (0, 2, 3, 1))], axis=-1)
    bev_px = bev_in.reshape(BS * Hd * Wd, T * 64 + 64)
    bev_feat_px, aux12_px = fused_mlp2(bev_px, *params["bev_fuse"],
                                       *params["aux12"],
                                       relu1=True, relu2=False, both=True)
    bev_feat = bev_feat_px.reshape(BS, Hd, Wd, 64)              # NHWC
    temporal_res_out = jnp.transpose(bev_feat, (0, 3, 1, 2))    # (BS,64,Hd,Wd)
    des_out_as_point = gather_grid(bev_feat, descartes_coord_t0)  # (BS,N,64)

    aux12 = jnp.transpose(aux12_px.reshape(BS, Hd, Wd, 6), (0, 3, 1, 2))
    aux1, aux2 = aux12[:, :3], aux12[:, 3:]                     # (BS,3,Hd,Wd)

    sph_ind = sphere_coord_t0[..., 0][:, :, :2]
    sph_grid = voxel_max_pool(point_feats_t0, sph_ind, (Hs, Ws),
                              (1.0, 1.0))                       # (BS,Hs,Ws,64)
    sph_px = sph_grid.reshape(BS * Hs * Ws, 64)
    sph_feat_px, aux3_px = fused_mlp2(sph_px, *params["sph_fuse"],
                                      *params["aux3"],
                                      relu1=True, relu2=False, both=True)
    sph_feat = sph_feat_px.reshape(BS, Hs, Ws, 32)              # NHWC
    sph_out_as_point = gather_grid(sph_feat, sphere_coord_t0)   # (BS,N,32)
    aux3 = jnp.transpose(aux3_px.reshape(BS, Hs, Ws, 3), (0, 3, 1, 2))

    # ---- point_post + pred_layer: CatFusion -> PredBranch, one fused call ----
    cat_rows = jnp.concatenate(
        [point_feats_t0, des_out_as_point, sph_out_as_point],
        axis=-1).reshape(BS * N, 64 + 64 + 32)
    logits = fused_mlp2(cat_rows, *params["cat_fusion"], *params["pred"],
                        relu1=True, relu2=False)                # (BS*N, 3)
    pred_cls = jnp.transpose(logits.reshape(BS, N, 3),
                             (0, 2, 1))[..., None].astype(jnp.float32)

    return pred_cls, aux1, aux2, aux3, temporal_res_out


def infer(params, xyzi_single, descartes_coord_single, sphere_coord_single,
          temporal_res, *, descartes_hw, sphere_hw):
    pred_cls, aux1, aux2, aux3, temporal_res = stage_forward(
        params, xyzi_single, descartes_coord_single, sphere_coord_single,
        temporal_res, descartes_hw=descartes_hw, sphere_hw=sphere_hw)
    return pred_cls, temporal_res


# ----------------------------------------------------------------------------
if __name__ == "__main__":
    BS, T, C, N = 1, 3, 7, 512
    DESCARTES_HW = (32, 32)
    SPHERE_HW = (16, 32)

    key = jax.random.PRNGKey(0)
    k_par, k1, k2, k3 = jax.random.split(key, 4)
    params = init_params(k_par, T=T, C_in=C)

    xyzi = jax.random.normal(k1, (BS, T, C, N, 1), jnp.float32)
    descartes_coord = jax.random.uniform(
        k2, (BS, T, N, 3, 1), jnp.float32, 0.0, float(DESCARTES_HW[0]))
    sphere_coord = jnp.stack(
        [jax.random.uniform(k3, (BS, T, N, 1), jnp.float32, 0.0,
                            float(SPHERE_HW[0])),
         jax.random.uniform(jax.random.fold_in(k3, 1), (BS, T, N, 1),
                            jnp.float32, 0.0, float(SPHERE_HW[1])),
         jax.random.uniform(jax.random.fold_in(k3, 2), (BS, T, N, 1),
                            jnp.float32, 0.0, 50.0)], axis=3)   # (BS,T,N,3,1)

    pred_cls, temporal_res = infer(
        params, xyzi, descartes_coord, sphere_coord, None,
        descartes_hw=DESCARTES_HW, sphere_hw=SPHERE_HW)
    jax.block_until_ready((pred_cls, temporal_res))
    assert pred_cls.shape == (BS, 3, N, 1)
    assert temporal_res.shape == (BS, 64, DESCARTES_HW[0], DESCARTES_HW[1])
    assert bool(jnp.all(jnp.isfinite(pred_cls)))
    print("KERNEL_OK")
</pallas_src>

<mosaic_0001>
module attributes {stable_mosaic.version = 11 : i64} {
  func.func @_chain2_kernel(%arg0: i32, %arg1: memref<512x7xf32, #tpu.memory_space<vmem>>, %arg2: memref<7x64xf32, #tpu.memory_space<vmem>>, %arg3: memref<1x64xf32, #tpu.memory_space<vmem>>, %arg4: memref<64x64xf32, #tpu.memory_space<vmem>>, %arg5: memref<1x64xf32, #tpu.memory_space<vmem>>, %arg6: memref<512x64xf32, #tpu.memory_space<vmem>>) attributes {dimension_semantics = [#tpu.dimension_semantics<parallel>], iteration_bounds = array<i64: 3>, scalar_prefetch = 0 : i64, scratch_operands = 0 : i64, tpu.core_type = #tpu.core_type<tc>, window_params = [{transform_indices = @transform_0, window_bounds = array<i64: 512, 7>}, {pipeline_mode = #tpu.pipeline_mode<synchronous>, transform_indices = @transform_1, window_bounds = array<i64: 7, 64>}, {pipeline_mode = #tpu.pipeline_mode<synchronous>, transform_indices = @transform_2, window_bounds = array<i64: 1, 64>}, {pipeline_mode = #tpu.pipeline_mode<synchronous>, transform_indices = @transform_3, window_bounds = array<i64: 64, 64>}, {pipeline_mode = #tpu.pipeline_mode<synchronous>, transform_indices = @transform_4, window_bounds = array<i64: 1, 64>}, {transform_indices = @transform_5, window_bounds = array<i64: 512, 64>}]} {
    %c0 = arith.constant 0 : index
    %c0_0 = arith.constant 0 : index
    %0 = vector.load %arg1[%c0, %c0_0] : memref<512x7xf32, #tpu.memory_space<vmem>>, vector<512x7xf32>
    %c0_1 = arith.constant 0 : index
    %c0_2 = arith.constant 0 : index
    %1 = vector.load %arg2[%c0_1, %c0_2] : memref<7x64xf32, #tpu.memory_space<vmem>>, vector<7x64xf32>
    %cst = arith.constant dense<0.000000e+00> : vector<512x64xf32>
    %2 = tpu.matmul %0, %1, %cst {dimension_numbers = #tpu.dot_dimension_numbers<[1], [0], [0], [1], [0, 0, 1, 1], [], []>} : vector<512x7xf32>, vector<7x64xf32>, vector<512x64xf32> -> vector<512x64xf32>
    %c0_3 = arith.constant 0 : index
    %c0_4 = arith.constant 0 : index
    %3 = vector.load %arg3[%c0_3, %c0_4] : memref<1x64xf32, #tpu.memory_space<vmem>>, vector<1x64xf32>
    %4 = vector.broadcast %3 : vector<1x64xf32> to vector<512x64xf32>
    %5 = arith.addf %2, %4 : vector<512x64xf32>
    %cst_5 = arith.constant 0.000000e+00 : f32
    %6 = vector.broadcast %cst_5 : f32 to vector<512x64xf32>
    %7 = arith.maximumf %5, %6 : vector<512x64xf32>
    %c0_6 = arith.constant 0 : index
    %c0_7 = arith.constant 0 : index
    %8 = vector.load %arg4[%c0_6, %c0_7] : memref<64x64xf32, #tpu.memory_space<vmem>>, vector<64x64xf32>
    %cst_8 = arith.constant dense<0.000000e+00> : vector<512x64xf32>
    %9 = tpu.matmul %7, %8, %cst_8 {dimension_numbers = #tpu.dot_dimension_numbers<[1], [0], [0], [1], [0, 0, 1, 1], [], []>} : vector<512x64xf32>, vector<64x64xf32>, vector<512x64xf32> -> vector<512x64xf32>
    %c0_9 = arith.constant 0 : index
    %c0_10 = arith.constant 0 : index
    %10 = vector.load %arg5[%c0_9, %c0_10] : memref<1x64xf32, #tpu.memory_space<vmem>>, vector<1x64xf32>
    %11 = vector.broadcast %10 : vector<1x64xf32> to vector<512x64xf32>
    %12 = arith.addf %9, %11 : vector<512x64xf32>
    %cst_11 = arith.constant 0.000000e+00 : f32
    %13 = vector.broadcast %cst_11 : f32 to vector<512x64xf32>
    %14 = arith.maximumf %12, %13 : vector<512x64xf32>
    %c0_12 = arith.constant 0 : index
    %c0_13 = arith.constant 0 : index
    %15 = vector.load %arg6[%c0_12, %c0_13] : memref<512x64xf32, #tpu.memory_space<vmem>>, vector<512x64xf32>
    tpu.vector_store %arg6[%c0_12, %c0_13], %14 {strides = array<i32>} : memref<512x64xf32, #tpu.memory_space<vmem>>, vector<512x64xf32>,
    return
  }
  func.func @transform_0(%arg0: i32) -> (i32, i32) {
    %c0_i32 = arith.constant 0 : i32
    %c0_i32_0 = arith.constant 0 : i32
    return %arg0, %c0_i32 : i32, i32
  }
  func.func @transform_1(%arg0: i32) -> (i32, i32) {
    %c0_i32 = arith.constant 0 : i32
    %c0_i32_0 = arith.constant 0 : i32
    %c0_i32_1 = arith.constant 0 : i32
    return %c0_i32, %c0_i32_0 : i32, i32
  }
  func.func @transform_2(%arg0: i32) -> (i32, i32) {
    %c0_i32 = arith.constant 0 : i32
    %c0_i32_0 = arith.constant 0 : i32
    %c0_i32_1 = arith.constant 0 : i32
    return %c0_i32, %c0_i32_0 : i32, i32
  }
  func.func @transform_3(%arg0: i32) -> (i32, i32) {
    %c0_i32 = arith.constant 0 : i32
    %c0_i32_0 = arith.constant 0 : i32
    %c0_i32_1 = arith.constant 0 : i32
    return %c0_i32, %c0_i32_0 : i32, i32
  }
  func.func @transform_4(%arg0: i32) -> (i32, i32) {
    %c0_i32 = arith.constant 0 : i32
    %c0_i32_0 = arith.constant 0 : i32
    %c0_i32_1 = arith.constant 0 : i32
    return %c0_i32, %c0_i32_0 : i32, i32
  }
  func.func @transform_5(%arg0: i32) -> (i32, i32) {
    %c0_i32 = arith.constant 0 : i32
    %c0_i32_0 = arith.constant 0 : i32
    return %arg0, %c0_i32 : i32, i32
  }
}

module attributes {stable_mosaic.version = 11 : i64} {
  func.func @_branch2_kernel(%arg0: i32, %arg1: memref<256x64xf32, #tpu.memory_space<vmem>>, %arg2: memref<64x32xf32, #tpu.memory_space<vmem>>, %arg3: memref<1x32xf32, #tpu.memory_space<vmem>>, %arg4: memref<32x3xf32, #tpu.memory_space<vmem>>, %arg5: memref<1x3xf32, #tpu.memory_space<vmem>>, %arg6: memref<256x32xf32, #tpu.memory_space<vmem>>, %arg7: memref<256x3xf32, #tpu.memory_space<vmem>>) attributes {dimension_semantics = [#tpu.dimension_semantics<parallel>], iteration_bounds = array<i64: 2>, scalar_prefetch = 0 : i64, scratch_operands = 0 : i64, tpu.core_type = #tpu.core_type<tc>, window_params = [{transform_indices = @transform_0, window_bounds = array<i64: 256, 64>}, {pipeline_mode = #tpu.pipeline_mode<synchronous>, transform_indices = @transform_1, window_bounds = array<i64: 64, 32>}, {pipeline_mode = #tpu.pipeline_mode<synchronous>, transform_indices = @transform_2, window_bounds = array<i64: 1, 32>}, {pipeline_mode = #tpu.pipeline_mode<synchronous>, transform_indices = @transform_3, window_bounds = array<i64: 32, 3>}, {pipeline_mode = #tpu.pipeline_mode<synchronous>, transform_indices = @transform_4, window_bounds = array<i64: 1, 3>}, {transform_indices = @transform_5, window_bounds = array<i64: 256, 32>}, {transform_indices = @transform_6, window_bounds = array<i64: 256, 3>}]} {
    %c0 = arith.constant 0 : index
    %c0_0 = arith.constant 0 : index
    %0 = vector.load %arg1[%c0, %c0_0] : memref<256x64xf32, #tpu.memory_space<vmem>>, vector<256x64xf32>
    %c0_1 = arith.constant 0 : index
    %c0_2 = arith.constant 0 : index
    %1 = vector.load %arg2[%c0_1, %c0_2] : memref<64x32xf32, #tpu.memory_space<vmem>>, vector<64x32xf32>
    %cst = arith.constant dense<0.000000e+00> : vector<256x32xf32>
    %2 = tpu.matmul %0, %1, %cst {dimension_numbers = #tpu.dot_dimension_numbers<[1], [0], [0], [1], [0, 0, 1, 1], [], []>} : vector<256x64xf32>, vector<64x32xf32>, vector<256x32xf32> -> vector<256x32xf32>
    %c0_3 = arith.constant 0 : index
    %c0_4 = arith.constant 0 : index
    %3 = vector.load %arg3[%c0_3, %c0_4] : memref<1x32xf32, #tpu.memory_space<vmem>>, vector<1x32xf32>
    %4 = vector.broadcast %3 : vector<1x32xf32> to vector<256x32xf32>
    %5 = arith.addf %2, %4 : vector<256x32xf32>
    %cst_5 = arith.constant 0.000000e+00 : f32
    %6 = vector.broadcast %cst_5 : f32 to vector<256x32xf32>
    %7 = arith.maximumf %5, %6 : vector<256x32xf32>
    %c0_6 = arith.constant 0 : index
    %c0_7 = arith.constant 0 : index
    %8 = vector.load %arg6[%c0_6, %c0_7] : memref<256x32xf32, #tpu.memory_space<vmem>>, vector<256x32xf32>
    tpu.vector_store %arg6[%c0_6, %c0_7], %7 {strides = array<i32>} : memref<256x32xf32, #tpu.memory_space<vmem>>, vector<256x32xf32>,
    %c0_8 = arith.constant 0 : index
    %c0_9 = arith.constant 0 : index
    %9 = vector.load %arg4[%c0_8, %c0_9] : memref<32x3xf32, #tpu.memory_space<vmem>>, vector<32x3xf32>
    %cst_10 = arith.constant dense<0.000000e+00> : vector<256x3xf32>
    %10 = tpu.matmul %7, %9, %cst_10 {dimension_numbers = #tpu.dot_dimension_numbers<[1], [0], [0], [1], [0, 0, 1, 1], [], []>} : vector<256x32xf32>, vector<32x3xf32>, vector<256x3xf32> -> vector<256x3xf32>
    %c0_11 = arith.constant 0 : index
    %c0_12 = arith.constant 0 : index
    %11 = vector.load %arg5[%c0_11, %c0_12] : memref<1x3xf32, #tpu.memory_space<vmem>>, vector<1x3xf32>
    %12 = vector.broadcast %11 : vector<1x3xf32> to vector<256x3xf32>
    %13 = arith.addf %10, %12 : vector<256x3xf32>
    %c0_13 = arith.constant 0 : index
    %c0_14 = arith.constant 0 : index
    %14 = vector.load %arg7[%c0_13, %c0_14] : memref<256x3xf32, #tpu.memory_space<vmem>>, vector<256x3xf32>
    tpu.vector_store %arg7[%c0_13, %c0_14], %13 {strides = array<i32>} : memref<256x3xf32, #tpu.memory_space<vmem>>, vector<256x3xf32>,
    return
  }
  func.func @transform_0(%arg0: i32) -> (i32, i32) {
    %c0_i32 = arith.constant 0 : i32
    %c0_i32_0 = arith.constant 0 : i32
    return %arg0, %c0_i32 : i32, i32
  }
  func.func @transform_1(%arg0: i32) -> (i32, i32) {
    %c0_i32 = arith.constant 0 : i32
    %c0_i32_0 = arith.constant 0 : i32
    %c0_i32_1 = arith.constant 0 : i32
    return %c0_i32, %c0_i32_0 : i32, i32
  }
  func.func @transform_2(%arg0: i32) -> (i32, i32) {
    %c0_i32 = arith.constant 0 : i32
    %c0_i32_0 = arith.constant 0 : i32
    %c0_i32_1 = arith.constant 0 : i32
    return %c0_i32, %c0_i32_0 : i32, i32
  }
  func.func @transform_3(%arg0: i32) -> (i32, i32) {
    %c0_i32 = arith.constant 0 : i32
    %c0_i32_0 = arith.constant 0 : i32
    %c0_i32_1 = arith.constant 0 : i32
    return %c0_i32, %c0_i32_0 : i32, i32
  }
  func.func @transform_4(%arg0: i32) -> (i32, i32) {
    %c0_i32 = arith.constant 0 : i32
    %c0_i32_0 = arith.constant 0 : i32
    %c0_i32_1 = arith.constant 0 : i32
    return %c0_i32, %c0_i32_0 : i32, i32
  }
  func.func @transform_5(%arg0: i32) -> (i32, i32) {
    %c0_i32 = arith.constant 0 : i32
    %c0_i32_0 = arith.constant 0 : i32
    return %arg0, %c0_i32 : i32, i32
  }
  func.func @transform_6(%arg0: i32) -> (i32, i32) {
    %c0_i32 = arith.constant 0 : i32
    %c0_i32_0 = arith.constant 0 : i32
    return %arg0, %c0_i32 : i32, i32
  }
}

module attributes {stable_mosaic.version = 11 : i64} {
  func.func @_branch2_kernel(%arg0: i32, %arg1: memref<512x256xf32, #tpu.memory_space<vmem>>, %arg2: memref<256x64xf32, #tpu.memory_space<vmem>>, %arg3: memref<1x64xf32, #tpu.memory_space<vmem>>, %arg4: memref<64x6xf32, #tpu.memory_space<vmem>>, %arg5: memref<1x6xf32, #tpu.memory_space<vmem>>, %arg6: memref<512x64xf32, #tpu.memory_space<vmem>>, %arg7: memref<512x6xf32, #tpu.memory_space<vmem>>) attributes {dimension_semantics = [#tpu.dimension_semantics<parallel>], iteration_bounds = array<i64: 2>, scalar_prefetch = 0 : i64, scratch_operands = 0 : i64, tpu.core_type = #tpu.core_type<tc>, window_params = [{transform_indices = @transform_0, window_bounds = array<i64: 512, 256>}, {pipeline_mode = #tpu.pipeline_mode<synchronous>, transform_indices = @transform_1, window_bounds = array<i64: 256, 64>}, {pipeline_mode = #tpu.pipeline_mode<synchronous>, transform_indices = @transform_2, window_bounds = array<i64: 1, 64>}, {pipeline_mode = #tpu.pipeline_mode<synchronous>, transform_indices = @transform_3, window_bounds = array<i64: 64, 6>}, {pipeline_mode = #tpu.pipeline_mode<synchronous>, transform_indices = @transform_4, window_bounds = array<i64: 1, 6>}, {transform_indices = @transform_5, window_bounds = array<i64: 512, 64>}, {transform_indices = @transform_6, window_bounds = array<i64: 512, 6>}]} {
    %c0 = arith.constant 0 : index
    %c0_0 = arith.constant 0 : index
    %0 = vector.load %arg1[%c0, %c0_0] : memref<512x256xf32, #tpu.memory_space<vmem>>, vector<512x256xf32>
    %c0_1 = arith.constant 0 : index
    %c0_2 = arith.constant 0 : index
    %1 = vector.load %arg2[%c0_1, %c0_2] : memref<256x64xf32, #tpu.memory_space<vmem>>, vector<256x64xf32>
    %cst = arith.constant dense<0.000000e+00> : vector<512x64xf32>
    %2 = tpu.matmul %0, %1, %cst {dimension_numbers = #tpu.dot_dimension_numbers<[1], [0], [0], [1], [0, 0, 1, 1], [], []>} : vector<512x256xf32>, vector<256x64xf32>, vector<512x64xf32> -> vector<512x64xf32>
    %c0_3 = arith.constant 0 : index
    %c0_4 = arith.constant 0 : index
    %3 = vector.load %arg3[%c0_3, %c0_4] : memref<1x64xf32, #tpu.memory_space<vmem>>, vector<1x64xf32>
    %4 = vector.broadcast %3 : vector<1x64xf32> to vector<512x64xf32>
    %5 = arith.addf %2, %4 : vector<512x64xf32>
    %cst_5 = arith.constant 0.000000e+00 : f32
    %6 = vector.broadcast %cst_5 : f32 to vector<512x64xf32>
    %7 = arith.maximumf %5, %6 : vector<512x64xf32>
    %c0_6 = arith.constant 0 : index
    %c0_7 = arith.constant 0 : index
    %8 = vector.load %arg6[%c0_6, %c0_7] : memref<512x64xf32, #tpu.memory_space<vmem>>, vector<512x64xf32>
    tpu.vector_store %arg6[%c0_6, %c0_7], %7 {strides = array<i32>} : memref<512x64xf32, #tpu.memory_space<vmem>>, vector<512x64xf32>,
    %c0_8 = arith.constant 0 : index
    %c0_9 = arith.constant 0 : index
    %9 = vector.load %arg4[%c0_8, %c0_9] : memref<64x6xf32, #tpu.memory_space<vmem>>, vector<64x6xf32>
    %cst_10 = arith.constant dense<0.000000e+00> : vector<512x6xf32>
    %10 = tpu.matmul %7, %9, %cst_10 {dimension_numbers = #tpu.dot_dimension_numbers<[1], [0], [0], [1], [0, 0, 1, 1], [], []>} : vector<512x64xf32>, vector<64x6xf32>, vector<512x6xf32> -> vector<512x6xf32>
    %c0_11 = arith.constant 0 : index
    %c0_12 = arith.constant 0 : index
    %11 = vector.load %arg5[%c0_11, %c0_12] : memref<1x6xf32, #tpu.memory_space<vmem>>, vector<1x6xf32>
    %12 = vector.broadcast %11 : vector<1x6xf32> to vector<512x6xf32>
    %13 = arith.addf %10, %12 : vector<512x6xf32>
    %c0_13 = arith.constant 0 : index
    %c0_14 = arith.constant 0 : index
    %14 = vector.load %arg7[%c0_13, %c0_14] : memref<512x6xf32, #tpu.memory_space<vmem>>, vector<512x6xf32>
    tpu.vector_store %arg7[%c0_13, %c0_14], %13 {strides = array<i32>} : memref<512x6xf32, #tpu.memory_space<vmem>>, vector<512x6xf32>,
    return
  }
  func.func @transform_0(%arg0: i32) -> (i32, i32) {
    %c0_i32 = arith.constant 0 : i32
    %c0_i32_0 = arith.constant 0 : i32
    return %arg0, %c0_i32 : i32, i32
  }
  func.func @transform_1(%arg0: i32) -> (i32, i32) {
    %c0_i32 = arith.constant 0 : i32
    %c0_i32_0 = arith.constant 0 : i32
    %c0_i32_1 = arith.constant 0 : i32
    return %c0_i32, %c0_i32_0 : i32, i32
  }
  func.func @transform_2(%arg0: i32) -> (i32, i32) {
    %c0_i32 = arith.constant 0 : i32
    %c0_i32_0 = arith.constant 0 : i32
    %c0_i32_1 = arith.constant 0 : i32
    return %c0_i32, %c0_i32_0 : i32, i32
  }
  func.func @transform_3(%arg0: i32) -> (i32, i32) {
    %c0_i32 = arith.constant 0 : i32
    %c0_i32_0 = arith.constant 0 : i32
    %c0_i32_1 = arith.constant 0 : i32
    return %c0_i32, %c0_i32_0 : i32, i32
  }
  func.func @transform_4(%arg0: i32) -> (i32, i32) {
    %c0_i32 = arith.constant 0 : i32
    %c0_i32_0 = arith.constant 0 : i32
    %c0_i32_1 = arith.constant 0 : i32
    return %c0_i32, %c0_i32_0 : i32, i32
  }
  func.func @transform_5(%arg0: i32) -> (i32, i32) {
    %c0_i32 = arith.constant 0 : i32
    %c0_i32_0 = arith.constant 0 : i32
    return %arg0, %c0_i32 : i32, i32
  }
  func.func @transform_6(%arg0: i32) -> (i32, i32) {
    %c0_i32 = arith.constant 0 : i32
    %c0_i32_0 = arith.constant 0 : i32
    return %arg0, %c0_i32 : i32, i32
  }
}

module attributes {stable_mosaic.version = 11 : i64} {
  func.func @_chain2_kernel(%arg0: i32, %arg1: memref<256x160xf32, #tpu.memory_space<vmem>>, %arg2: memref<160x64xf32, #tpu.memory_space<vmem>>, %arg3: memref<1x64xf32, #tpu.memory_space<vmem>>, %arg4: memref<64x3xf32, #tpu.memory_space<vmem>>, %arg5: memref<1x3xf32, #tpu.memory_space<vmem>>, %arg6: memref<256x3xf32, #tpu.memory_space<vmem>>) attributes {dimension_semantics = [#tpu.dimension_semantics<parallel>], iteration_bounds = array<i64: 2>, scalar_prefetch = 0 : i64, scratch_operands = 0 : i64, tpu.core_type = #tpu.core_type<tc>, window_params = [{transform_indices = @transform_0, window_bounds = array<i64: 256, 160>}, {pipeline_mode = #tpu.pipeline_mode<synchronous>, transform_indices = @transform_1, window_bounds = array<i64: 160, 64>}, {pipeline_mode = #tpu.pipeline_mode<synchronous>, transform_indices = @transform_2, window_bounds = array<i64: 1, 64>}, {pipeline_mode = #tpu.pipeline_mode<synchronous>, transform_indices = @transform_3, window_bounds = array<i64: 64, 3>}, {pipeline_mode = #tpu.pipeline_mode<synchronous>, transform_indices = @transform_4, window_bounds = array<i64: 1, 3>}, {transform_indices = @transform_5, window_bounds = array<i64: 256, 3>}]} {
    %c0 = arith.constant 0 : index
    %c0_0 = arith.constant 0 : index
    %0 = vector.load %arg1[%c0, %c0_0] : memref<256x160xf32, #tpu.memory_space<vmem>>, vector<256x160xf32>
    %c0_1 = arith.constant 0 : index
    %c0_2 = arith.constant 0 : index
    %1 = vector.load %arg2[%c0_1, %c0_2] : memref<160x64xf32, #tpu.memory_space<vmem>>, vector<160x64xf32>
    %cst = arith.constant dense<0.000000e+00> : vector<256x64xf32>
    %2 = tpu.matmul %0, %1, %cst {dimension_numbers = #tpu.dot_dimension_numbers<[1], [0], [0], [1], [0, 0, 1, 1], [], []>} : vector<256x160xf32>, vector<160x64xf32>, vector<256x64xf32> -> vector<256x64xf32>
    %c0_3 = arith.constant 0 : index
    %c0_4 = arith.constant 0 : index
    %3 = vector.load %arg3[%c0_3, %c0_4] : memref<1x64xf32, #tpu.memory_space<vmem>>, vector<1x64xf32>
    %4 = vector.broadcast %3 : vector<1x64xf32> to vector<256x64xf32>
    %5 = arith.addf %2, %4 : vector<256x64xf32>
    %cst_5 = arith.constant 0.000000e+00 : f32
    %6 = vector.broadcast %cst_5 : f32 to vector<256x64xf32>
    %7 = arith.maximumf %5, %6 : vector<256x64xf32>
    %c0_6 = arith.constant 0 : index
    %c0_7 = arith.constant 0 : index
    %8 = vector.load %arg4[%c0_6, %c0_7] : memref<64x3xf32, #tpu.memory_space<vmem>>, vector<64x3xf32>
    %cst_8 = arith.constant dense<0.000000e+00> : vector<256x3xf32>
    %9 = tpu.matmul %7, %8, %cst_8 {dimension_numbers = #tpu.dot_dimension_numbers<[1], [0], [0], [1], [0, 0, 1, 1], [], []>} : vector<256x64xf32>, vector<64x3xf32>, vector<256x3xf32> -> vector<256x3xf32>
    %c0_9 = arith.constant 0 : index
    %c0_10 = arith.constant 0 : index
    %10 = vector.load %arg5[%c0_9, %c0_10] : memref<1x3xf32, #tpu.memory_space<vmem>>, vector<1x3xf32>
    %11 = vector.broadcast %10 : vector<1x3xf32> to vector<256x3xf32>
    %12 = arith.addf %9, %11 : vector<256x3xf32>
    %c0_11 = arith.constant 0 : index
    %c0_12 = arith.constant 0 : index
    %13 = vector.load %arg6[%c0_11, %c0_12] : memref<256x3xf32, #tpu.memory_space<vmem>>, vector<256x3xf32>
    tpu.vector_store %arg6[%c0_11, %c0_12], %12 {strides = array<i32>} : memref<256x3xf32, #tpu.memory_space<vmem>>, vector<256x3xf32>,
    return
  }
  func.func @transform_0(%arg0: i32) -> (i32, i32) {
    %c0_i32 = arith.constant 0 : i32
    %c0_i32_0 = arith.constant 0 : i32
    return %arg0, %c0_i32 : i32, i32
  }
  func.func @transform_1(%arg0: i32) -> (i32, i32) {
    %c0_i32 = arith.constant 0 : i32
    %c0_i32_0 = arith.constant 0 : i32
    %c0_i32_1 = arith.constant 0 : i32
    return %c0_i32, %c0_i32_0 : i32, i32
  }
  func.func @transform_2(%arg0: i32) -> (i32, i32) {
    %c0_i32 = arith.constant 0 : i32
    %c0_i32_0 = arith.constant 0 : i32
    %c0_i32_1 = arith.constant 0 : i32
    return %c0_i32, %c0_i32_0 : i32, i32
  }
  func.func @transform_3(%arg0: i32) -> (i32, i32) {
    %c0_i32 = arith.constant 0 : i32
    %c0_i32_0 = arith.constant 0 : i32
    %c0_i32_1 = arith.constant 0 : i32
    return %c0_i32, %c0_i32_0 : i32, i32
  }
  func.func @transform_4(%arg0: i32) -> (i32, i32) {
    %c0_i32 = arith.constant 0 : i32
    %c0_i32_0 = arith.constant 0 : i32
    %c0_i32_1 = arith.constant 0 : i32
    return %c0_i32, %c0_i32_0 : i32, i32
  }
  func.func @transform_5(%arg0: i32) -> (i32, i32) {
    %c0_i32 = arith.constant 0 : i32
    %c0_i32_0 = arith.constant 0 : i32
    return %arg0, %c0_i32 : i32, i32
  }
}

</mosaic_0001>

<bundles_post_ra>
// kernel: stage_forward.6
= control target key start
LH: loop header
LB: loop body
LE: loop exit
PB: predicated region body
PF: predicated region fallthrough
CT: control target
= control target key end

     0   :  { %s1070_s21 = smov 0   ;;  %s1442_s0 = inlined_call_operand.vmem [shape: f32[512,64], index: 0, kind: input, shape index: {}]   ;;  %s1443_s1 = inlined_call_operand.vmem [shape: f32[64,32], index: 1, kind: input, shape index: {}]   ;;  %s1444_s2 = inlined_call_operand.vmem [shape: f32[1,32], index: 2, kind: input, shape index: {}]   ;;  %s1445_s3 = inlined_call_operand.vmem [shape: f32[32,3], index: 3, kind: input, shape index: {}]   ;;  %s1446_s4 = inlined_call_operand.vmem [shape: f32[1,3], index: 4, kind: input, shape index: {}]   ;;  %s1447_s5 = inlined_call_operand.vmem [shape: f32[512,32], index: 5, kind: output, shape index: {0}]   ;;  %s1448_s6 = inlined_call_operand.vmem [shape: f32[512,3], index: 6, kind: output, shape index: {1}]  }
   0x1 LB: > { %s928_s22 = sadd.s32 4294967295, %s1033_s21   ;;  %p932_p0 = scmp.ge.s32.totalorder %s1033_s21, 1  ;;  %s1033_s21 = sphi %s1070_s21, %s17_s21  }
   0x2   : > { %p216_p1 = scmp.lt.s32.totalorder %s1033_s21, 3 }
   0x4   : > { %p217_p2 = pnand %p932_p0, %p216_p1 }
   0x5   : > { %s933_s27 = sshll.u32 (!%p217_p2), %s928_s22, 5 }
   0x6   : > { %220 = sbr.rel (%p217_p2) target bundleno = 418 (0x1a2), region = 40  ;;  %p252_p3 = scmp.lt.s32.totalorder (!%p217_p2), %s933_s27, 63 }
   0xb   : > { %v308_v0 = vld [vmem:[%s1443_s1 + $0x38] sm:$0xff]  ;;  %v307_v1 = vld [vmem:[%s1443_s1 + $0x30] sm:$0xff]  ;;  %v306_v2 = vld [vmem:[%s1443_s1 + $0x28] sm:$0xff]  ;;  %s1450_s27 = smov (!%p252_p3, %s933_s27), 63  ;;  %vm313_vm0 = vcmask 523264   ;;  %vm555_vm1 = vcmask 261120  }
   0xc   : > { %418 = vmatpush.msra.mxu0 %v308_v0  ;;  %1005 = vmatpush.msra.mxu2 %v308_v0  ;;  %v305_v3 = vld [vmem:[%s1443_s1 + $0x20] sm:$0xff]  ;;  %v304_v4 = vld [vmem:[%s1443_s1 + $0x18] sm:$0xff]  ;;  %s1093_s10 = sshll.u32 %s1450_s27, 3  ;;  %v303_v5 = vld [vmem:[%s1443_s1 + $0x10] sm:$0xff]  ;;  %vm805_vm2 = vcmask 23552  }
   0xd   : > { %v302_v6 = vld [vmem:[%s1443_s1 + $0x8] sm:$0xff]  ;;  %s1105_s17 = scalar_lea.vmem %s1442_s0, %s1093_s10  ;;  %v301_v7 = vld [vmem:[%s1443_s1] sm:$0xff]  ;;  %v591_v32 = vld [vmem:[%s1445_s3 + $0x18] sm:$0xff]  ;;  %s1196_s9 = scalar_lea.vmem %s1447_s5, %s1093_s10 }
   0xe   : > { %419 = vmatpush.msra.mxu0 %v307_v1  ;;  %1006 = vmatpush.msra.mxu2 %v307_v1  ;;  %v269_v8 = vld [vmem:[%s1105_s17] sm:$0xff]  ;;  %v270_v10 = vld [vmem:[%s1105_s17 + $0x8] sm:$0xff]  ;;  %v271_v12 = vld [vmem:[%s1105_s17 + $0x10] sm:$0xff]  ;;  %s1335_s15 = scalar_lea.vmem %s1448_s6, %s1093_s10 }
   0xf   : > { %v285_v9 = vld [vmem:[%s1105_s17 + $0x80] sm:$0xff]  ;;  %v286_v11 = vld [vmem:[%s1105_s17 + $0x88] sm:$0xff]  ;;  %v287_v13 = vld [vmem:[%s1105_s17 + $0x90] sm:$0xff]  ;;  %704 = vmatpush.msra.mxu1 %v591_v32  ;;  %1013 = vmatpush.msra.mxu3 %v591_v32 }
  0x10   : > { %420 = vmatpush.msra.mxu0 %v306_v2  ;;  %1007 = vmatpush.msra.mxu2 %v306_v2  ;;  %v272_v14 = vld [vmem:[%s1105_s17 + $0x18] sm:$0xff]  ;;  %v273_v16 = vld [vmem:[%s1105_s17 + $0x20] sm:$0xff]  ;;  %v274_v18 = vld [vmem:[%s1105_s17 + $0x28] sm:$0xff] }
  0x11   : > { %v288_v15 = vld [vmem:[%s1105_s17 + $0x98] sm:$0xff]  ;;  %v289_v17 = vld [vmem:[%s1105_s17 + $0xa0] sm:$0xff]  ;;  %v290_v19 = vld [vmem:[%s1105_s17 + $0xa8] sm:$0xff] }
  0x12   : > { %421 = vmatpush.msra.mxu0 %v305_v3  ;;  %1008 = vmatpush.msra.mxu2 %v305_v3  ;;  %v275_v20 = vld [vmem:[%s1105_s17 + $0x30] sm:$0xff]  ;;  %v276_v22 = vld [vmem:[%s1105_s17 + $0x38] sm:$0xff]  ;;  %v277_v24 = vld [vmem:[%s1105_s17 + $0x40] sm:$0xff] }
  0x13   : > { %v291_v21 = vld [vmem:[%s1105_s17 + $0xb0] sm:$0xff]  ;;  %v292_v23 = vld [vmem:[%s1105_s17 + $0xb8] sm:$0xff]  ;;  %v293_v25 = vld [vmem:[%s1105_s17 + $0xc0] sm:$0xff] }
  0x14   : > { %422 = vmatpush.msra.mxu0 %v304_v4  ;;  %1009 = vmatpush.msra.mxu2 %v304_v4  ;;  %v278_v26 = vld [vmem:[%s1105_s17 + $0x48] sm:$0xff]  ;;  %v279_v28 = vld [vmem:[%s1105_s17 + $0x50] sm:$0xff]  ;;  %v280_v30 = vld [vmem:[%s1105_s17 + $0x58] sm:$0xff] }
  0x15   : > { %v294_v27 = vld [vmem:[%s1105_s17 + $0xc8] sm:$0xff]  ;;  %v295_v29 = vld [vmem:[%s1105_s17 + $0xd0] sm:$0xff]  ;;  %v296_v31 = vld [vmem:[%s1105_s17 + $0xd8] sm:$0xff] }
  0x16   : > { %423 = vmatpush.msra.mxu0 %v303_v5  ;;  %1010 = vmatpush.msra.mxu2 %v303_v5  ;;  %v590_v33 = vld [vmem:[%s1445_s3 + $0x10] sm:$0xff]  ;;  %v281_v34 = vld [vmem:[%s1105_s17 + $0x60] sm:$0xff]  ;;  %v589_v36 = vld [vmem:[%s1445_s3 + $0x8] sm:$0xff] }
  0x17   : > { %v297_v35 = vld [vmem:[%s1105_s17 + $0xe0] sm:$0xff]  ;;  %705 = vmatpush.msra.mxu1 %v590_v33  ;;  %1014 = vmatpush.msra.mxu3 %v590_v33  ;;  %v282_v38 = vld [vmem:[%s1105_s17 + $0x68] sm:$0xff]  ;;  %v283_v40 = vld [vmem:[%s1105_s17 + $0x70] sm:$0xff] }
  0x18   : > { %424 = vmatpush.msra.mxu0 %v302_v6  ;;  %1011 = vmatpush.msra.mxu2 %v302_v6  ;;  %v588_v37 = vld [vmem:[%s1445_s3] sm:$0xff]  ;;  %v298_v39 = vld [vmem:[%s1105_s17 + $0xe8] sm:$0xff]  ;;  %v299_v41 = vld [vmem:[%s1105_s17 + $0xf0] sm:$0xff] }
  0x19   : > { %706 = vmatpush.msra.mxu1 %v589_v36  ;;  %1015 = vmatpush.msra.mxu3 %v589_v36  ;;  %v284_v42 = vld [vmem:[%s1105_s17 + $0x78] sm:$0xff]  ;;  %v1189_v44 = vld [vmem:[%s1444_s2] ss:$0 sm:$0xff] }
  0x1a   : > { %425 = vmatpush.msra.mxu0 %v301_v7  ;;  %1012 = vmatpush.msra.mxu2 %v301_v7  ;;  %v300_v43 = vld [vmem:[%s1105_s17 + $0xf8] sm:$0xff] }
  0x1b   : > { %939 = vmatmul.msk.f32.vlgmr.msra.gmra.mxu0 %vm313_vm0, %v269_v8  ;;  %955 = vmatmul.msk.f32.vlgmr.msra.gmra.mxu2 %vm313_vm0, %v285_v9 }
  0x1c   : > { %707 = vmatpush.msra.mxu1 %v588_v37  ;;  %1016 = vmatpush.msra.mxu3 %v588_v37 }
  0x23   : > { %940 = vmatmul.msk.f32.gmra.mxu0 %vm313_vm0, %v270_v10  ;;  %956 = vmatmul.msk.f32.gmra.mxu2 %vm313_vm0, %v286_v11 }
  0x2b   : > { %941 = vmatmul.msk.f32.gmra.mxu0 %vm313_vm0, %v271_v12  ;;  %957 = vmatmul.msk.f32.gmra.mxu2 %vm313_vm0, %v287_v13 }
  0x33   : > { %942 = vmatmul.msk.f32.gmra.mxu0 %vm313_vm0, %v272_v14  ;;  %958 = vmatmul.msk.f32.gmra.mxu2 %vm313_vm0, %v288_v15 }
  0x3b   : > { %943 = vmatmul.msk.f32.gmra.mxu0 %vm313_vm0, %v273_v16  ;;  %959 = vmatmul.msk.f32.gmra.mxu2 %vm313_vm0, %v289_v17 }
  0x43   : > { %944 = vmatmul.msk.f32.gmra.mxu0 %vm313_vm0, %v274_v18  ;;  %960 = vmatmul.msk.f32.gmra.mxu2 %vm313_vm0, %v290_v19 }
  0x4b   : > { %945 = vmatmul.msk.f32.gmra.mxu0 %vm313_vm0, %v275_v20  ;;  %961 = vmatmul.msk.f32.gmra.mxu2 %vm313_vm0, %v291_v21 }
  0x53   : > { %946 = vmatmul.msk.f32.gmra.mxu0 %vm313_vm0, %v276_v22  ;;  %962 = vmatmul.msk.f32.gmra.mxu2 %vm313_vm0, %v292_v23 }
  0x5b   : > { %947 = vmatmul.msk.f32.gmra.mxu0 %vm313_vm0, %v277_v24  ;;  %963 = vmatmul.msk.f32.gmra.mxu2 %vm313_vm0, %v293_v25 }
  0x63   : > { %948 = vmatmul.msk.f32.gmra.mxu0 %vm313_vm0, %v278_v26  ;;  %964 = vmatmul.msk.f32.gmra.mxu2 %vm313_vm0, %v294_v27 }
  0x6b   : > { %949 = vmatmul.msk.f32.gmra.mxu0 %vm313_vm0, %v279_v28  ;;  %965 = vmatmul.msk.f32.gmra.mxu2 %vm313_vm0, %v295_v29 }
  0x73   : > { %950 = vmatmul.msk.f32.gmra.mxu0 %vm313_vm0, %v280_v30  ;;  %966 = vmatmul.msk.f32.gmra.mxu2 %vm313_vm0, %v296_v31 }
  0x7b   : > { %951 = vmatmul.msk.f32.gmra.mxu0 %vm313_vm0, %v281_v34  ;;  %967 = vmatmul.msk.f32.gmra.mxu2 %vm313_vm0, %v297_v35 }
  0x83   : > { %952 = vmatmul.msk.f32.gmra.mxu0 %vm313_vm0, %v282_v38  ;;  %968 = vmatmul.msk.f32.gmra.mxu2 %vm313_vm0, %v298_v39 }
  0x8b   : > { %953 = vmatmul.msk.f32.gmra.mxu0 %vm313_vm0, %v283_v40  ;;  %969 = vmatmul.msk.f32.gmra.mxu2 %vm313_vm0, %v299_v41 }
  0x93   : > { %954 = vmatmul.msk.f32.gmra.mxu0 %vm313_vm0, %v284_v42  ;;  %970 = vmatmul.msk.f32.gmra.mxu2 %vm313_vm0, %v300_v43 }
  0x98   : > { %v427_v45 = vpop.f32.mrf.mxu0 }
  0x99   : > { %v428_v46 = vadd.f32 %v1189_v44, %v427_v45 }
  0x9b   : > { %v523_v47 = vmax.f32 %v428_v46, 0.0 }
  0x9d   : > { %556 = vst.msk [vmem:[%s1196_s9] sm:$0xff] %vm555_vm1, %v523_v47  ;;  %971 = vmatmul.msk.f32.vlgmr.msra.gmra.mxu1 %vm555_vm1, %v523_v47 }
  0x9e   : > { %v475_v48 = vpop.f32.mrf.mxu2 }
  0x9f   : > { %v1202_v49 = vadd.f32 %v1189_v44, %v475_v48 }
  0xa0   : > { %v430_v50 = vpop.f32.mrf.mxu0 }
  0xa1   : > { %v539_v51 = vmax.f32 %v1202_v49, 0.0  ;;  %v431_v52 = vadd.f32 %v1189_v44, %v430_v50 }
  0xa3   : > { %572 = vst.msk [vmem:[%s1196_s9 + $0x80] sm:$0xff] %vm555_vm1, %v539_v51  ;;  %v524_v53 = vmax.f32 %v431_v52, 0.0 }
  0xa5   : > { %557 = vst.msk [vmem:[%s1196_s9 + $0x8] sm:$0xff] %vm555_vm1, %v524_v53  ;;  %972 = vmatmul.msk.f32.gmra.mxu1 %vm555_vm1, %v524_v53 }
  0xa6   : > { %v478_v54 = vpop.f32.mrf.mxu2 }
  0xa7   : > { %v479_v55 = vadd.f32 %v1189_v44, %v478_v54 }
  0xa8   : > { %v433_v56 = vpop.f32.mrf.mxu0 }
  0xa9   : > { %v540_v57 = vmax.f32 %v479_v55, 0.0  ;;  %v434_v58 = vadd.f32 %v1189_v44, %v433_v56 }
  0xab   : > { %573 = vst.msk [vmem:[%s1196_s9 + $0x88] sm:$0xff] %vm555_vm1, %v540_v57  ;;  %v525_v59 = vmax.f32 %v434_v58, 0.0  ;;  %988 = vmatmul.msk.f32.vlgmr.msra.gmra.mxu3 %vm555_vm1, %v540_v57 }
  0xad   : > { %558 = vst.msk [vmem:[%s1196_s9 + $0x10] sm:$0xff] %vm555_vm1, %v525_v59  ;;  %973 = vmatmul.msk.f32.gmra.mxu1 %vm555_vm1, %v525_v59 }
  0xae   : > { %v481_v60 = vpop.f32.mrf.mxu2 }
  0xaf   : > { %v482_v61 = vadd.f32 %v1189_v44, %v481_v60 }
  0xb0   : > { %v436_v62 = vpop.f32.mrf.mxu0 }
  0xb1   : > { %v541_v63 = vmax.f32 %v482_v61, 0.0  ;;  %v437_v0 = vadd.f32 %v1189_v44, %v436_v62 }
  0xb3   : > { %574 = vst.msk [vmem:[%s1196_s9 + $0x90] sm:$0xff] %vm555_vm1, %v541_v63  ;;  %v526_v1 = vmax.f32 %v437_v0, 0.0  ;;  %989 = vmatmul.msk.f32.gmra.mxu3 %vm555_vm1, %v541_v63 }
  0xb5   : > { %559 = vst.msk [vmem:[%s1196_s9 + $0x18] sm:$0xff] %vm555_vm1, %v526_v1  ;;  %974 = vmatmul.msk.f32.gmra.mxu1 %vm555_vm1, %v526_v1 }
  0xb6   : > { %v484_v2 = vpop.f32.mrf.mxu2 }
  0xb7   : > { %v485_v3 = vadd.f32 %v1189_v44, %v484_v2 }
  0xb8   : > { %v439_v4 = vpop.f32.mrf.mxu0 }
  0xb9   : > { %v542_v5 = vmax.f32 %v485_v3, 0.0  ;;  %v440_v6 = vadd.f32 %v1189_v44, %v439_v4 }
  0xbb   : > { %575 = vst.msk [vmem:[%s1196_s9 + $0x98] sm:$0xff] %vm555_vm1, %v542_v5  ;;  %v527_v7 = vmax.f32 %v440_v6, 0.0  ;;  %990 = vmatmul.msk.f32.gmra.mxu3 %vm555_vm1, %v542_v5 }
  0xbd   : > { %560 = vst.msk [vmem:[%s1196_s9 + $0x20] sm:$0xff] %vm555_vm1, %v527_v7  ;;  %975 = vmatmul.msk.f32.gmra.mxu1 %vm555_vm1, %v527_v7 }
  0xbe   : > { %v487_v8 = vpop.f32.mrf.mxu2 }
  0xbf   : > { %v488_v9 = vadd.f32 %v1189_v44, %v487_v8 }
  0xc0   : > { %v442_v10 = vpop.f32.mrf.mxu0 }
  0xc1   : > { %v543_v11 = vmax.f32 %v488_v9, 0.0  ;;  %v443_v12 = vadd.f32 %v1189_v44, %v442_v10 }
  0xc3   : > { %576 = vst.msk [vmem:[%s1196_s9 + $0xa0] sm:$0xff] %vm555_vm1, %v543_v11  ;;  %v528_v13 = vmax.f32 %v443_v12, 0.0  ;;  %991 = vmatmul.msk.f32.gmra.mxu3 %vm555_vm1, %v543_v11 }
  0xc5   : > { %561 = vst.msk [vmem:[%s1196_s9 + $0x28] sm:$0xff] %vm555_vm1, %v528_v13  ;;  %976 = vmatmul.msk.f32.gmra.mxu1 %vm555_vm1, %v528_v13 }
  0xc6   : > { %v490_v14 = vpop.f32.mrf.mxu2 }
  0xc7   : > { %v491_v15 = vadd.f32 %v1189_v44, %v490_v14 }
  0xc8   : > { %v445_v16 = vpop.f32.mrf.mxu0 }
  0xc9   : > { %v544_v17 = vmax.f32 %v491_v15, 0.0  ;;  %v446_v18 = vadd.f32 %v1189_v44, %v445_v16  ;;  %v1329_v15 = vld [vmem:[%s1446_s4] ss:$0 sm:$0xff] }
  0xcb   : > { %577 = vst.msk [vmem:[%s1196_s9 + $0xa8] sm:$0xff] %vm555_vm1, %v544_v17  ;;  %v529_v19 = vmax.f32 %v446_v18, 0.0  ;;  %992 = vmatmul.msk.f32.gmra.mxu3 %vm555_vm1, %v544_v17 }
  0xcd   : > { %562 = vst.msk [vmem:[%s1196_s9 + $0x30] sm:$0xff] %vm555_vm1, %v529_v19  ;;  %977 = vmatmul.msk.f32.gmra.mxu1 %vm555_vm1, %v529_v19 }
  0xce   : > { %v493_v20 = vpop.f32.mrf.mxu2 }
  0xcf   : > { %v494_v21 = vadd.f32 %v1189_v44, %v493_v20 }
  0xd0   : > { %v448_v22 = vpop.f32.mrf.mxu0 }
  0xd1   : > { %v545_v23 = vmax.f32 %v494_v21, 0.0  ;;  %v449_v24 = vadd.f32 %v1189_v44, %v448_v22 }
  0xd3   : > { %578 = vst.msk [vmem:[%s1196_s9 + $0xb0] sm:$0xff] %vm555_vm1, %v545_v23  ;;  %v530_v25 = vmax.f32 %v449_v24, 0.0  ;;  %993 = vmatmul.msk.f32.gmra.mxu3 %vm555_vm1, %v545_v23 }
  0xd5   : > { %563 = vst.msk [vmem:[%s1196_s9 + $0x38] sm:$0xff] %vm555_vm1, %v530_v25  ;;  %978 = vmatmul.msk.f32.gmra.mxu1 %vm555_vm1, %v530_v25 }
  0xd6   : > { %v496_v26 = vpop.f32.mrf.mxu2 }
  0xd7   : > { %v497_v27 = vadd.f32 %v1189_v44, %v496_v26 }
  0xd8   : > { %v451_v28 = vpop.f32.mrf.mxu0 }
  0xd9   : > { %v546_v29 = vmax.f32 %v497_v27, 0.0  ;;  %v452_v30 = vadd.f32 %v1189_v44, %v451_v28 }
  0xdb   : > { %579 = vst.msk [vmem:[%s1196_s9 + $0xb8] sm:$0xff] %vm555_vm1, %v546_v29  ;;  %v531_v31 = vmax.f32 %v452_v30, 0.0  ;;  %994 = vmatmul.msk.f32.gmra.mxu3 %vm555_vm1, %v546_v29 }
  0xdd   : > { %564 = vst.msk [vmem:[%s1196_s9 + $0x40] sm:$0xff] %vm555_vm1, %v531_v31  ;;  %979 = vmatmul.msk.f32.gmra.mxu1 %vm555_vm1, %v531_v31 }
  0xde   : > { %v499_v32 = vpop.f32.mrf.mxu2 }
  0xdf   : > { %v500_v33 = vadd.f32 %v1189_v44, %v499_v32 }
  0xe0   : > { %v454_v34 = vpop.f32.mrf.mxu0 }
  0xe1   : > { %v547_v35 = vmax.f32 %v500_v33, 0.0  ;;  %v455_v36 = vadd.f32 %v1189_v44, %v454_v34 }
  0xe3   : > { %580 = vst.msk [vmem:[%s1196_s9 + $0xc0] sm:$0xff] %vm555_vm1, %v547_v35  ;;  %v532_v37 = vmax.f32 %v455_v36, 0.0  ;;  %995 = vmatmul.msk.f32.gmra.mxu3 %vm555_vm1, %v547_v35 }
  0xe5   : > { %565 = vst.msk [vmem:[%s1196_s9 + $0x48] sm:$0xff] %vm555_vm1, %v532_v37  ;;  %980 = vmatmul.msk.f32.gmra.mxu1 %vm555_vm1, %v532_v37 }
  0xe6   : > { %v502_v38 = vpop.f32.mrf.mxu2 }
  0xe7   : > { %v503_v39 = vadd.f32 %v1189_v44, %v502_v38 }
  0xe8   : > { %v457_v40 = vpop.f32.mrf.mxu0 }
  0xe9   : > { %v548_v41 = vmax.f32 %v503_v39, 0.0  ;;  %v458_v42 = vadd.f32 %v1189_v44, %v457_v40 }
  0xeb   : > { %581 = vst.msk [vmem:[%s1196_s9 + $0xc8] sm:$0xff] %vm555_vm1, %v548_v41  ;;  %v533_v43 = vmax.f32 %v458_v42, 0.0  ;;  %996 = vmatmul.msk.f32.gmra.mxu3 %vm555_vm1, %v548_v41 }
  0xed   : > { %566 = vst.msk [vmem:[%s1196_s9 + $0x50] sm:$0xff] %vm555_vm1, %v533_v43  ;;  %981 = vmatmul.msk.f32.gmra.mxu1 %vm555_vm1, %v533_v43 }
  0xee   : > { %v505_v45 = vpop.f32.mrf.mxu2 }
  0xef   : > { %v506_v46 = vadd.f32 %v1189_v44, %v505_v45 }
  0xf0   : > { %v460_v47 = vpop.f32.mrf.mxu0 }
  0xf1   : > { %v549_v48 = vmax.f32 %v506_v46, 0.0  ;;  %v461_v50 = vadd.f32 %v1189_v44, %v460_v47 }
  0xf3   : > { %582 = vst.msk [vmem:[%s1196_s9 + $0xd0] sm:$0xff] %vm555_vm1, %v549_v48  ;;  %v534_v52 = vmax.f32 %v461_v50, 0.0  ;;  %997 = vmatmul.msk.f32.gmra.mxu3 %vm555_vm1, %v549_v48 }
  0xf5   : > { %567 = vst.msk [vmem:[%s1196_s9 + $0x58] sm:$0xff] %vm555_vm1, %v534_v52  ;;  %982 = vmatmul.msk.f32.gmra.mxu1 %vm555_vm1, %v534_v52 }
  0xf6   : > { %v508_v53 = vpop.f32.mrf.mxu2 }
  0xf7   : > { %v509_v54 = vadd.f32 %v1189_v44, %v508_v53 }
  0xf8   : > { %v463_v55 = vpop.f32.mrf.mxu0 }
  0xf9   : > { %v550_v56 = vmax.f32 %v509_v54, 0.0  ;;  %v464_v57 = vadd.f32 %v1189_v44, %v463_v55 }
  0xfb   : > { %583 = vst.msk [vmem:[%s1196_s9 + $0xd8] sm:$0xff] %vm555_vm1, %v550_v56  ;;  %v535_v58 = vmax.f32 %v464_v57, 0.0  ;;  %998 = vmatmul.msk.f32.gmra.mxu3 %vm555_vm1, %v550_v56 }
  0xfd   : > { %568 = vst.msk [vmem:[%s1196_s9 + $0x60] sm:$0xff] %vm555_vm1, %v535_v58  ;;  %983 = vmatmul.msk.f32.gmra.mxu1 %vm555_vm1, %v535_v58 }
  0xfe   : > { %v511_v59 = vpop.f32.mrf.mxu2 }
  0xff   : > { %v512_v60 = vadd.f32 %v1189_v44, %v511_v59 }
 0x100   : > { %v466_v61 = vpop.f32.mrf.mxu0 }
 0x101   : > { %v551_v62 = vmax.f32 %v512_v60, 0.0  ;;  %v467_v63 = vadd.f32 %v1189_v44, %v466_v61 }
 0x103   : > { %584 = vst.msk [vmem:[%s1196_s9 + $0xe0] sm:$0xff] %vm555_vm1, %v551_v62  ;;  %v536_v0 = vmax.f32 %v467_v63, 0.0  ;;  %999 = vmatmul.msk.f32.gmra.mxu3 %vm555_vm1, %v551_v62 }
 0x105   : > { %569 = vst.msk [vmem:[%s1196_s9 + $0x68] sm:$0xff] %vm555_vm1, %v536_v0  ;;  %984 = vmatmul.msk.f32.gmra.mxu1 %vm555_vm1, %v536_v0 }
 0x106   : > { %v514_v1 = vpop.f32.mrf.mxu2 }
 0x107   : > { %v515_v2 = vadd.f32 %v1189_v44, %v514_v1 }
 0x108   : > { %v469_v3 = vpop.f32.mrf.mxu0 }
 0x109   : > { %v552_v4 = vmax.f32 %v515_v2, 0.0  ;;  %v470_v5 = vadd.f32 %v1189_v44, %v469_v3 }
 0x10b   : > { %585 = vst.msk [vmem:[%s1196_s9 + $0xe8] sm:$0xff] %vm555_vm1, %v552_v4  ;;  %v537_v6 = vmax.f32 %v470_v5, 0.0  ;;  %1000 = vmatmul.msk.f32.gmra.mxu3 %vm555_vm1, %v552_v4 }
 0x10d   : > { %570 = vst.msk [vmem:[%s1196_s9 + $0x70] sm:$0xff] %vm555_vm1, %v537_v6  ;;  %985 = vmatmul.msk.f32.gmra.mxu1 %vm555_vm1, %v537_v6 }
 0x10e   : > { %v517_v7 = vpop.f32.mrf.mxu2 }
 0x10f   : > { %v518_v8 = vadd.f32 %v1189_v44, %v517_v7 }
 0x110   : > { %v472_v9 = vpop.f32.mrf.mxu0 }
 0x111   : > { %v553_v10 = vmax.f32 %v518_v8, 0.0  ;;  %v473_v11 = vadd.f32 %v1189_v44, %v472_v9 }
 0x113   : > { %586 = vst.msk [vmem:[%s1196_s9 + $0xf0] sm:$0xff] %vm555_vm1, %v553_v10  ;;  %v538_v12 = vmax.f32 %v473_v11, 0.0  ;;  %1001 = vmatmul.msk.f32.gmra.mxu3 %vm555_vm1, %v553_v10 }
 0x115   : > { %571 = vst.msk [vmem:[%s1196_s9 + $0x78] sm:$0xff] %vm555_vm1, %v538_v12  ;;  %986 = vmatmul.msk.f32.gmra.mxu1 %vm555_vm1, %v538_v12 }
 0x116   : > { %v520_v13 = vpop.f32.mrf.mxu2 }
 0x117   : > { %v521_v14 = vadd.f32 %v1189_v44, %v520_v13 }
 0x119   : > { %v554_v16 = vmax.f32 %v521_v14, 0.0 }
 0x11a   : > { %v709_v17 = vpop.f32.mrf.mxu1 }
 0x11b   : > { %587 = vst.msk [vmem:[%s1196_s9 + $0xf8] sm:$0xff] %vm555_vm1, %v554_v16  ;;  %v710_v44 = vadd.f32 %v1329_v15, %v709_v17  ;;  %1002 = vmatmul.msk.f32.gmra.mxu3 %vm555_vm1, %v554_v16 }
 0x11d   : > { %806 = vst.msk [vmem:[%s1335_s15] sm:$0xff] %vm805_vm2, %v710_v44  ;;  %987 = vmatmul.msk.f32.gmra.mxu1 %vm555_vm1, %v539_v51 }
 0x122   : > { %v712_v18 = vpop.f32.mrf.mxu1 }
 0x123   : > { %v713_v19 = vadd.f32 %v1329_v15, %v712_v18 }
 0x125   : > { %807 = vst.msk [vmem:[%s1335_s15 + $0x8] sm:$0xff] %vm805_vm2, %v713_v19 }
 0x12a   : > { %v715_v20 = vpop.f32.mrf.mxu1 }
 0x12b   : > { %v716_v21 = vadd.f32 %v1329_v15, %v715_v20 }
 0x12d   : > { %808 = vst.msk [vmem:[%s1335_s15 + $0x10] sm:$0xff] %vm805_vm2, %v716_v21 }
 0x12e   : > { %v760_v22 = vpop.f32.mrf.mxu3 }
 0x12f   : > { %v761_v23 = vadd.f32 %v1329_v15, %v760_v22 }
 0x131   : > { %823 = vst.msk [vmem:[%s1335_s15 + $0x88] sm:$0xff] %vm805_vm2, %v761_v23 }
 0x132   : > { %v718_v49 = vpop.f32.mrf.mxu1 }
 0x133   : > { %v719_v51 = vadd.f32 %v1329_v15, %v718_v49 }
 0x135   : > { %809 = vst.msk [vmem:[%s1335_s15 + $0x18] sm:$0xff] %vm805_vm2, %v719_v51 }
 0x136   : > { %v763_v24 = vpop.f32.mrf.mxu3 }
 0x137   : > { %v764_v25 = vadd.f32 %v1329_v15, %v763_v24 }
 0x139   : > { %824 = vst.msk [vmem:[%s1335_s15 + $0x90] sm:$0xff] %vm805_vm2, %v764_v25 }
 0x13a   : > { %v721_v26 = vpop.f32.mrf.mxu1 }
 0x13b   : > { %v722_v27 = vadd.f32 %v1329_v15, %v721_v26 }
 0x13d   : > { %810 = vst.msk [vmem:[%s1335_s15 + $0x20] sm:$0xff] %vm805_vm2, %v722_v27 }
 0x13e   : > { %v766_v28 = vpop.f32.mrf.mxu3 }
 0x13f   : > { %v767_v29 = vadd.f32 %v1329_v15, %v766_v28 }
 0x141   : > { %825 = vst.msk [vmem:[%s1335_s15 + $0x98] sm:$0xff] %vm805_vm2, %v767_v29 }
 0x142   : > { %v724_v30 = vpop.f32.mrf.mxu1 }
 0x143   : > { %v725_v31 = vadd.f32 %v1329_v15, %v724_v30 }
 0x145   : > { %811 = vst.msk [vmem:[%s1335_s15 + $0x28] sm:$0xff] %vm805_vm2, %v725_v31 }
 0x146   : > { %v769_v32 = vpop.f32.mrf.mxu3 }
 0x147   : > { %v770_v33 = vadd.f32 %v1329_v15, %v769_v32 }
 0x149   : > { %826 = vst.msk [vmem:[%s1335_s15 + $0xa0] sm:$0xff] %vm805_vm2, %v770_v33 }
 0x14a   : > { %v727_v34 = vpop.f32.mrf.mxu1 }
 0x14b   : > { %v728_v35 = vadd.f32 %v1329_v15, %v727_v34 }
 0x14d   : > { %812 = vst.msk [vmem:[%s1335_s15 + $0x30] sm:$0xff] %vm805_vm2, %v728_v35 }
 0x14e   : > { %v772_v36 = vpop.f32.mrf.mxu3 }
 0x14f   : > { %v773_v37 = vadd.f32 %v1329_v15, %v772_v36 }
 0x151   : > { %827 = vst.msk [vmem:[%s1335_s15 + $0xa8] sm:$0xff] %vm805_vm2, %v773_v37 }
 0x152   : > { %v730_v38 = vpop.f32.mrf.mxu1 }
 0x153   : > { %v731_v39 = vadd.f32 %v1329_v15, %v730_v38 }
 0x155   : > { %813 = vst.msk [vmem:[%s1335_s15 + $0x38] sm:$0xff] %vm805_vm2, %v731_v39 }
 0x156   : > { %v775_v40 = vpop.f32.mrf.mxu3 }
 0x157   : > { %v776_v41 = vadd.f32 %v1329_v15, %v775_v40 }
 0x159   : > { %828 = vst.msk [vmem:[%s1335_s15 + $0xb0] sm:$0xff] %vm805_vm2, %v776_v41 }
 0x15a   : > { %v733_v42 = vpop.f32.mrf.mxu1 }
 0x15b   : > { %v734_v43 = vadd.f32 %v1329_v15, %v733_v42 }
 0x15d   : > { %814 = vst.msk [vmem:[%s1335_s15 + $0x40] sm:$0xff] %vm805_vm2, %v734_v43 }
 0x15e   : > { %v778_v45 = vpop.f32.mrf.mxu3 }
 0x15f   : > { %v779_v46 = vadd.f32 %v1329_v15, %v778_v45 }
 0x161   : > { %829 = vst.msk [vmem:[%s1335_s15 + $0xb8] sm:$0xff] %vm805_vm2, %v779_v46 }
 0x162   : > { %v736_v47 = vpop.f32.mrf.mxu1 }
 0x163   : > { %v737_v48 = vadd.f32 %v1329_v15, %v736_v47 }
 0x165   : > { %815 = vst.msk [vmem:[%s1335_s15 + $0x48] sm:$0xff] %vm805_vm2, %v737_v48 }
 0x166   : > { %v781_v50 = vpop.f32.mrf.mxu3 }
 0x167   : > { %v782_v52 = vadd.f32 %v1329_v15, %v781_v50 }
 0x169   : > { %830 = vst.msk [vmem:[%s1335_s15 + $0xc0] sm:$0xff] %vm805_vm2, %v782_v52 }
 0x16a   : > { %v739_v53 = vpop.f32.mrf.mxu1 }
 0x16b   : > { %v740_v54 = vadd.f32 %v1329_v15, %v739_v53 }
 0x16d   : > { %816 = vst.msk [vmem:[%s1335_s15 + $0x50] sm:$0xff] %vm805_vm2, %v740_v54 }
 0x16e   : > { %v784_v55 = vpop.f32.mrf.mxu3 }
 0x16f   : > { %v785_v56 = vadd.f32 %v1329_v15, %v784_v55 }
 0x171   : > { %831 = vst.msk [vmem:[%s1335_s15 + $0xc8] sm:$0xff] %vm805_vm2, %v785_v56 }
 0x172   : > { %v742_v57 = vpop.f32.mrf.mxu1 }
 0x173   : > { %v743_v58 = vadd.f32 %v1329_v15, %v742_v57 }
 0x175   : > { %817 = vst.msk [vmem:[%s1335_s15 + $0x58] sm:$0xff] %vm805_vm2, %v743_v58 }
 0x176   : > { %v787_v59 = vpop.f32.mrf.mxu3 }
 0x177   : > { %v788_v60 = vadd.f32 %v1329_v15, %v787_v59 }
 0x179   : > { %832 = vst.msk [vmem:[%s1335_s15 + $0xd0] sm:$0xff] %vm805_vm2, %v788_v60 }
 0x17a   : > { %v745_v61 = vpop.f32.mrf.mxu1 }
 0x17b   : > { %v746_v62 = vadd.f32 %v1329_v15, %v745_v61 }
 0x17d   : > { %818 = vst.msk [vmem:[%s1335_s15 + $0x60] sm:$0xff] %vm805_vm2, %v746_v62 }
 0x17e   : > { %v790_v63 = vpop.f32.mrf.mxu3 }
 0x17f   : > { %v791_v0 = vadd.f32 %v1329_v15, %v790_v63 }
 0x181   : > { %833 = vst.msk [vmem:[%s1335_s15 + $0xd8] sm:$0xff] %vm805_vm2, %v791_v0 }
 0x182   : > { %v748_v1 = vpop.f32.mrf.mxu1 }
 0x183   : > { %v749_v2 = vadd.f32 %v1329_v15, %v748_v1 }
 0x185   : > { %819 = vst.msk [vmem:[%s1335_s15 + $0x68] sm:$0xff] %vm805_vm2, %v749_v2 }
 0x186   : > { %v793_v3 = vpop.f32.mrf.mxu3 }
 0x187   : > { %v794_v4 = vadd.f32 %v1329_v15, %v793_v3 }
 0x189   : > { %834 = vst.msk [vmem:[%s1335_s15 + $0xe0] sm:$0xff] %vm805_vm2, %v794_v4 }
 0x18a   : > { %v751_v5 = vpop.f32.mrf.mxu1 }
 0x18b   : > { %v752_v6 = vadd.f32 %v1329_v15, %v751_v5 }
 0x18d   : > { %820 = vst.msk [vmem:[%s1335_s15 + $0x70] sm:$0xff] %vm805_vm2, %v752_v6 }
 0x18e   : > { %v796_v7 = vpop.f32.mrf.mxu3 }
 0x18f   : > { %v797_v8 = vadd.f32 %v1329_v15, %v796_v7 }
 0x191   : > { %835 = vst.msk [vmem:[%s1335_s15 + $0xe8] sm:$0xff] %vm805_vm2, %v797_v8 }
 0x192   : > { %v754_v9 = vpop.f32.mrf.mxu1 }
 0x193   : > { %v755_v10 = vadd.f32 %v1329_v15, %v754_v9 }
 0x195   : > { %821 = vst.msk [vmem:[%s1335_s15 + $0x78] sm:$0xff] %vm805_vm2, %v755_v10 }
 0x196   : > { %v799_v11 = vpop.f32.mrf.mxu3 }
 0x197   : > { %v800_v12 = vadd.f32 %v1329_v15, %v799_v11 }
 0x199   : > { %836 = vst.msk [vmem:[%s1335_s15 + $0xf0] sm:$0xff] %vm805_vm2, %v800_v12 }
 0x19a   : > { %v757_v13 = vpop.f32.mrf.mxu1 }
 0x19b   : > { %v758_v14 = vadd.f32 %v1329_v15, %v757_v13 }
 0x19d   : > { %822 = vst.msk [vmem:[%s1335_s15 + $0x80] sm:$0xff] %vm805_vm2, %v758_v14 }
 0x19e   : > { %v802_v16 = vpop.f32.mrf.mxu3 }
 0x19f   : > { %v803_v17 = vadd.f32 %v1329_v15, %v802_v16 }
 0x1a1   : > { %837 = vst.msk [vmem:[%s1335_s15 + $0xf8] sm:$0xff] %vm805_vm2, %v803_v17 }
 0x1a2 PF: > { %s17_s21 = sadd.s32 1, %s1033_s21  }
 0x1a3   : > { %p14_p4 = scmp.ge.s32.totalorder %s17_s21, 4  }
 0x1a5   :  { %16 = sbr.rel (!%p14_p4) target bundleno = 1 (0x1), region = 82 }

// kernel: stage_forward.4
= control target key start
LH: loop header
LB: loop body
LE: loop exit
PB: predicated region body
PF: predicated region fallthrough
CT: control target
= control target key end

     0   :  { %10 = vsyncpa [#allocation3], 0  ;;  %s2392_s0 = inlined_call_operand.vmem [shape: f32[1536,7], index: 0, kind: input, shape index: {}]   ;;  %s2393_s1 = inlined_call_operand.hbm [shape: f32[7,64], index: 1, kind: input, shape index: {}]   ;;  %s2394_s2 = inlined_call_operand.hbm [shape: f32[1,64], index: 2, kind: input, shape index: {}]   ;;  %s2395_s3 = inlined_call_operand.hbm [shape: f32[64,64], index: 3, kind: input, shape index: {}]   ;;  %s2396_s4 = inlined_call_operand.hbm [shape: f32[1,64], index: 4, kind: input, shape index: {}]   ;;  %s2397_s5 = inlined_call_operand.vmem [shape: f32[1536,64], index: 5, kind: output, shape index: {}]  }
   0x1   :  { %11 = vsyncpa [#allocation5], 0 }
   0x2   :  { %12 = vsyncpa [#allocation8], 0  ;;  %s1862_s18 = smov 0  }
   0x3 LB: > { %s183_s21 = sshll.u32 %s2394_s2, 4  ;;  %s1467_s22 = sadd.s32 4294967295, %s1824_s18   ;;  %s1824_s18 = sphi %s1862_s18, %s18_s18   ;;  %s184_s21 = int_to_ptr.hbm [resolvable:$true] %s183_s21 }
   0x4   : > { %p1469_p0 = scmp.ge.s32.totalorder %s1824_s18, 1  ;;  %p159_p1 = scmp.lt.s32.totalorder %s1824_s18, 4 }
   0x5   : > { %p1875_p2 = scmp.eq.s32.totalorder %s1467_s22, 0  ;;  %s1826_s25 = smov [#allocation4]  }
   0x6   : > { %p1879_p3 = pnand %p1469_p0, %p159_p1  ;;  %s185_s26 = sshll.u32 %s1826_s25, 4  ;;  %s186_s26 = int_to_ptr.vmem [resolvable:$true] %s185_s26 }
   0x7   : > { %s171_s29 = sshll.u32 %s2393_s1, 4  ;;  %s194_s7 = sshll.u32 %s2395_s3, 4  ;;  %s172_s29 = int_to_ptr.hbm [resolvable:$true] %s171_s29  ;;  %s195_s7 = int_to_ptr.hbm [resolvable:$true] %s194_s7 }
   0x8   : > { %p1648_p4 = pneg %p1879_p3  ;;  %s1827_s9 = smov [#allocation2]  }
   0x9   : > { %s173_s10 = sshll.u32 %s1827_s9, 4  ;;  %s1828_s11 = smov [#allocation6]   ;;  %s174_s10 = int_to_ptr.vmem [resolvable:$true] %s173_s10 }
   0xa   : > { %p1893_p5 = pnand %p1875_p2, %p1648_p4  ;;  %s196_s12 = sshll.u32 %s1828_s11, 4  ;;  %s197_s12 = int_to_ptr.vmem [resolvable:$true] %s196_s12 }
   0xb   : > { %s1829_s13 = smov 128   ;;  %s1830_s14 = smov 8  }
   0xc   : > { %1654 = dma.hbm_to_vmem [thread:$0]  (!%p1893_p5), %s184_s21, 16, %s186_s26, [#allocation5]  }
   0xd   : > { %1651 = dma.hbm_to_vmem [thread:$0]  (!%p1893_p5), %s172_s29, 128, %s174_s10, [#allocation3]  }
   0xe   : > { %1657 = dma.hbm_to_vmem [thread:$0]  (!%p1893_p5), %s195_s7, 1024, %s197_s12, [#allocation5], %s1829_s13, %s1829_s13, %s1830_s14  }
   0xf   : > { %s209_s17 = sshll.u32 %s2396_s4, 4  ;;  %s1831_s19 = smov [#allocation7]   ;;  %s210_s17 = int_to_ptr.hbm [resolvable:$true] %s209_s17 }
  0x10   : > { %s211_s20 = sshll.u32 %s1831_s19, 4  ;;  %233 = sbr.rel (%p1879_p3) target bundleno = 796 (0x31c), region = 40  ;;  %s212_s20 = int_to_ptr.vmem [resolvable:$true] %s211_s20 }
  0x11   : > { %1660 = dma.hbm_to_vmem [thread:$0]  (!%p1893_p5), %s210_s17, 16, %s212_s20, [#allocation8]  }
  0x15   : > { %1811 = dma.done.wait (%p1875_p2), [#allocation3], 128  }
  0x16   : > { %1813 = vsyncadd (%p1875_p2), [#allocation3], 4294967168 }
  0x17   : > { %1815 = dma.done.wait (%p1875_p2), [#allocation5], 1040  }
  0x18   : > { %1817 = vsyncadd (%p1875_p2), [#allocation5], 4294966256 }
  0x19   : > { %1819 = dma.done.wait (%p1875_p2), [#allocation8], 16  }
  0x1a   : > { %1821 = vsyncadd (%p1875_p2), [#allocation8], 4294967280  ;;  %s1480_s21 = sshll.u32 %s1467_s22, 6  ;;  %vm551_vm0 = vcmask 1046528   ;;  %vm358_vm1 = vcmask 56320   ;;  %v835_v12 = vld [vmem:[#allocation6 + $0x38] sm:$0xff] }
  0x1b   : > { %p278_p6 = scmp.lt.s32.totalorder %s1480_s21, 191  ;;  %v353_v0 = vld [vmem:[#allocation2] sm:$0x7f]  ;;  %1041 = vmatpush.msra.mxu1 %v835_v12  ;;  %1616 = vmatpush.msra.mxu2 %v835_v12  ;;  %v833_v14 = vld [vmem:[#allocation6 + $0x28] sm:$0xff]  ;;  %v832_v16 = vld [vmem:[#allocation6 + $0x20] sm:$0xff]  ;;  %vm840_vm2 = vcmask 523264  }
  0x1c   : > { %1484 = vmatpush.msk.msra.mxu0 %vm551_vm0, %v353_v0  ;;  %1615 = vmatpush.msk.msra.mxu3 %vm551_vm0, %v353_v0  ;;  %v834_v13 = vld [vmem:[#allocation6 + $0x30] sm:$0xff]  ;;  %v831_v17 = vld [vmem:[#allocation6 + $0x18] sm:$0xff]  ;;  %v829_v20 = vld [vmem:[#allocation6 + $0x8] sm:$0xff] }
  0x1d   : > { %s2402_s21 = smov (!%p278_p6, %s1480_s21), 191  ;;  %1042 = vmatpush.msra.mxu1 %v834_v13  ;;  %1618 = vmatpush.msra.mxu2 %v834_v13  ;;  %v830_v18 = vld [vmem:[#allocation6 + $0x10] sm:$0xff]  ;;  %v828_v21 = vld [vmem:[#allocation6] sm:$0xff]  ;;  %v1966_v25 = vld [vmem:[#allocation4] ss:$0 sm:$0xff] }
  0x1e   : > { %s1481_s24 = sshll.u32 %s2402_s21, 3  ;;  %1617 = vmatpush.msrb.mxu3 %v835_v12 }
  0x1f   : > { %s1932_s27 = scalar_lea.vmem %s2392_s0, %s1481_s24  ;;  %1043 = vmatpush.msra.mxu1 %v833_v14  ;;  %1620 = vmatpush.msra.mxu2 %v833_v14  ;;  %s2053_s28 = scalar_lea.vmem %s2397_s5, %s1481_s24 }
  0x20   : > { %v289_v1 = vld [vmem:[%s1932_s27] sm:$0xff]  ;;  %v290_v2 = vld [vmem:[%s1932_s27 + $0x8] sm:$0xff]  ;;  %v291_v3 = vld [vmem:[%s1932_s27 + $0x10] sm:$0xff]  ;;  %1619 = vmatpush.msrb.mxu3 %v834_v13 }
  0x21   : > { %1485 = vmatmul.msk.f32.vlgmr.msra.gmra.mxu0 %vm358_vm1, %v289_v1  ;;  %v292_v4 = vld [vmem:[%s1932_s27 + $0x18] sm:$0xff]  ;;  %v293_v5 = vld [vmem:[%s1932_s27 + $0x20] sm:$0xff]  ;;  %v294_v6 = vld [vmem:[%s1932_s27 + $0x28] sm:$0xff]  ;;  %1044 = vmatpush.msra.mxu1 %v832_v16 }
  0x22   : > { %v295_v7 = vld [vmem:[%s1932_s27 + $0x30] sm:$0xff]  ;;  %v296_v8 = vld [vmem:[%s1932_s27 + $0x38] sm:$0xff]  ;;  %v297_v9 = vld [vmem:[%s1932_s27 + $0x40] sm:$0xff]  ;;  %1621 = vmatpush.msrb.mxu3 %v833_v14  ;;  %1622 = vmatpush.msra.mxu2 %v832_v16 }
  0x23   : > { %v298_v10 = vld [vmem:[%s1932_s27 + $0x48] sm:$0xff]  ;;  %v299_v11 = vld [vmem:[%s1932_s27 + $0x50] sm:$0xff]  ;;  %v300_v15 = vld [vmem:[%s1932_s27 + $0x58] sm:$0xff]  ;;  %1045 = vmatpush.msra.mxu1 %v831_v17 }
  0x24   : > { %1623 = vmatpush.msrb.mxu3 %v832_v16  ;;  %1624 = vmatpush.msra.mxu2 %v831_v17  ;;  %v301_v19 = vld [vmem:[%s1932_s27 + $0x60] sm:$0xff]  ;;  %v302_v22 = vld [vmem:[%s1932_s27 + $0x68] sm:$0xff]  ;;  %v303_v23 = vld [vmem:[%s1932_s27 + $0x70] sm:$0xff] }
  0x25   : > { %1046 = vmatpush.msra.mxu1 %v830_v18  ;;  %v304_v24 = vld [vmem:[%s1932_s27 + $0x78] sm:$0xff]  ;;  %v305_v27 = vld [vmem:[%s1932_s27 + $0x80] sm:$0xff]  ;;  %v306_v31 = vld [vmem:[%s1932_s27 + $0x88] sm:$0xff] }
  0x26   : > { %1625 = vmatpush.msrb.mxu3 %v831_v17  ;;  %1626 = vmatpush.msra.mxu2 %v830_v18  ;;  %v307_v35 = vld [vmem:[%s1932_s27 + $0x90] sm:$0xff]  ;;  %v308_v39 = vld [vmem:[%s1932_s27 + $0x98] sm:$0xff]  ;;  %v309_v43 = vld [vmem:[%s1932_s27 + $0xa0] sm:$0xff] }
  0x27   : > { %1047 = vmatpush.msra.mxu1 %v829_v20  ;;  %v310_v47 = vld [vmem:[%s1932_s27 + $0xa8] sm:$0xff]  ;;  %v311_v51 = vld [vmem:[%s1932_s27 + $0xb0] sm:$0xff]  ;;  %v312_v55 = vld [vmem:[%s1932_s27 + $0xb8] sm:$0xff] }
  0x28   : > { %1627 = vmatpush.msrb.mxu3 %v830_v18  ;;  %1628 = vmatpush.msra.mxu2 %v829_v20  ;;  %v313_v59 = vld [vmem:[%s1932_s27 + $0xc0] sm:$0xff]  ;;  %v314_v63 = vld [vmem:[%s1932_s27 + $0xc8] sm:$0xff] }
  0x29   : > { %1486 = vmatmul.msk.f32.gmra.mxu0 %vm358_vm1, %v290_v2  ;;  %1048 = vmatpush.msra.mxu1 %v828_v21  ;;  %v317_v12 = vld [vmem:[%s1932_s27 + $0xe0] sm:$0xff]  ;;  %v318_v17 = vld [vmem:[%s1932_s27 + $0xe8] sm:$0xff] }
  0x2a   : > { %1629 = vmatpush.msrb.mxu3 %v829_v20  ;;  %1630 = vmatpush.msra.mxu2 %v828_v21  ;;  %v324_v20 = vld [vmem:[%s1932_s27 + $0x118] sm:$0xff] }
  0x2c   : > { %1631 = vmatpush.msrb.mxu3 %v828_v21 }
  0x31   : > { %1487 = vmatmul.msk.f32.gmra.mxu0 %vm358_vm1, %v291_v3  ;;  %v315_v3 = vld [vmem:[%s1932_s27 + $0xd0] sm:$0xff] }
  0x39   : > { %1488 = vmatmul.msk.f32.gmra.mxu0 %vm358_vm1, %v292_v4 }
  0x41   : > { %1489 = vmatmul.msk.f32.gmra.mxu0 %vm358_vm1, %v293_v5 }
  0x49   : > { %1490 = vmatmul.msk.f32.gmra.mxu0 %vm358_vm1, %v294_v6 }
  0x51   : > { %1491 = vmatmul.msk.f32.gmra.mxu0 %vm358_vm1, %v295_v7  ;;  %v316_v7 = vld [vmem:[%s1932_s27 + $0xd8] sm:$0xff] }
  0x59   : > { %1492 = vmatmul.msk.f32.gmra.mxu0 %vm358_vm1, %v296_v8 }
  0x61   : > { %1493 = vmatmul.msk.f32.gmra.mxu0 %vm358_vm1, %v297_v9 }
  0x69   : > { %1494 = vmatmul.msk.f32.gmra.mxu0 %vm358_vm1, %v298_v10  ;;  %v322_v10 = vld [vmem:[%s1932_s27 + $0x108] sm:$0xff] }
  0x6a   : > { %1518 = vmatmul.msk.f32.vlgmr.msra.gmra.mxu3 %vm358_vm1, %v322_v10  ;;  %v332_v10 = vld [vmem:[%s1932_s27 + $0x158] sm:$0xff] }
  0x71   : > { %1495 = vmatmul.msk.f32.gmra.mxu0 %vm358_vm1, %v299_v11 }
  0x79   : > { %1496 = vmatmul.msk.f32.gmra.mxu0 %vm358_vm1, %v300_v15  ;;  %v323_v15 = vld [vmem:[%s1932_s27 + $0x110] sm:$0xff] }
  0x7a   : > { %1519 = vmatmul.msk.f32.gmra.mxu3 %vm358_vm1, %v323_v15 }
  0x81   : > { %1497 = vmatmul.msk.f32.gmra.mxu0 %vm358_vm1, %v301_v19 }
  0x82   : > { %1520 = vmatmul.msk.f32.gmra.mxu3 %vm358_vm1, %v324_v20 }
  0x89   : > { %1498 = vmatmul.msk.f32.gmra.mxu0 %vm358_vm1, %v302_v22  ;;  %v319_v22 = vld [vmem:[%s1932_s27 + $0xf0] sm:$0xff] }
  0x91   : > { %1499 = vmatmul.msk.f32.gmra.mxu0 %vm358_vm1, %v303_v23 }
  0x99   : > { %1500 = vmatmul.msk.f32.gmra.mxu0 %vm358_vm1, %v304_v24 }
  0x9e   : > { %v572_v26 = vpop.f32.mrf.mxu0 }
  0x9f   : > { %v573_v28 = vadd.f32 %v1966_v25, %v572_v26  ;;  %v325_v26 = vld [vmem:[%s1932_s27 + $0x120] sm:$0xff] }
  0xa0   : > { %1521 = vmatmul.msk.f32.gmra.mxu3 %vm358_vm1, %v325_v26 }
  0xa1   : > { %v764_v29 = vmax.f32 %v573_v28, 0.0  ;;  %1501 = vmatmul.msk.f32.gmra.mxu0 %vm358_vm1, %v305_v27  ;;  %v320_v28 = vld [vmem:[%s1932_s27 + $0xf8] sm:$0xff] }
  0xa3   : > { %1549 = vmatmul.msk.f32.vlgmr.msra.gmra.mxu1 %vm840_vm2, %v764_v29 }
  0xa6   : > { %v575_v30 = vpop.f32.mrf.mxu0 }
  0xa7   : > { %v576_v32 = vadd.f32 %v1966_v25, %v575_v30 }
  0xa9   : > { %v765_v33 = vmax.f32 %v576_v32, 0.0  ;;  %1502 = vmatmul.msk.f32.gmra.mxu0 %vm358_vm1, %v306_v31  ;;  %v326_v31 = vld [vmem:[%s1932_s27 + $0x128] sm:$0xff] }
  0xaa   : > { %1522 = vmatmul.msk.f32.gmra.mxu3 %vm358_vm1, %v326_v31  ;;  %v2042_v32 = vld [vmem:[#allocation7] ss:$0 sm:$0xff] }
  0xab   : > { %1550 = vmatmul.msk.f32.gmra.mxu1 %vm840_vm2, %v765_v33 }
  0xae   : > { %v578_v34 = vpop.f32.mrf.mxu0 }
  0xaf   : > { %v579_v36 = vadd.f32 %v1966_v25, %v578_v34  ;;  %v321_v34 = vld [vmem:[%s1932_s27 + $0x100] sm:$0xff] }
  0xb1   : > { %v766_v37 = vmax.f32 %v579_v36, 0.0  ;;  %1503 = vmatmul.msk.f32.gmra.mxu0 %vm358_vm1, %v307_v35 }
  0xb3   : > { %1551 = vmatmul.msk.f32.gmra.mxu1 %vm840_vm2, %v766_v37 }
  0xb6   : > { %v581_v38 = vpop.f32.mrf.mxu0 }
  0xb7   : > { %v582_v40 = vadd.f32 %v1966_v25, %v581_v38 }
  0xb9   : > { %v767_v41 = vmax.f32 %v582_v40, 0.0  ;;  %1504 = vmatmul.msk.f32.gmra.mxu0 %vm358_vm1, %v308_v39  ;;  %v327_v39 = vld [vmem:[%s1932_s27 + $0x130] sm:$0xff] }
  0xba   : > { %1523 = vmatmul.msk.f32.gmra.mxu3 %vm358_vm1, %v327_v39 }
  0xbb   : > { %1552 = vmatmul.msk.f32.gmra.mxu1 %vm840_vm2, %v767_v41 }
  0xbe   : > { %v584_v42 = vpop.f32.mrf.mxu0 }
  0xbf   : > { %v585_v44 = vadd.f32 %v1966_v25, %v584_v42 }
  0xc1   : > { %v768_v45 = vmax.f32 %v585_v44, 0.0  ;;  %1505 = vmatmul.msk.f32.gmra.mxu0 %vm358_vm1, %v309_v43 }
  0xc3   : > { %1553 = vmatmul.msk.f32.gmra.mxu1 %vm840_vm2, %v768_v45 }
  0xc6   : > { %v587_v46 = vpop.f32.mrf.mxu0 }
  0xc7   : > { %v588_v48 = vadd.f32 %v1966_v25, %v587_v46  ;;  %v328_v46 = vld [vmem:[%s1932_s27 + $0x138] sm:$0xff] }
  0xc8   : > { %1524 = vmatmul.msk.f32.gmra.mxu3 %vm358_vm1, %v328_v46 }
  0xc9   : > { %v769_v49 = vmax.f32 %v588_v48, 0.0  ;;  %1506 = vmatmul.msk.f32.gmra.mxu0 %vm358_vm1, %v310_v47 }
  0xcb   : > { %1554 = vmatmul.msk.f32.gmra.mxu1 %vm840_vm2, %v769_v49 }
  0xce   : > { %v590_v50 = vpop.f32.mrf.mxu0 }
  0xcf   : > { %v591_v52 = vadd.f32 %v1966_v25, %v590_v50 }
  0xd1   : > { %v770_v53 = vmax.f32 %v591_v52, 0.0  ;;  %1507 = vmatmul.msk.f32.gmra.mxu0 %vm358_vm1, %v311_v51 }
  0xd3   : > { %1555 = vmatmul.msk.f32.gmra.mxu1 %vm840_vm2, %v770_v53  ;;  %v329_v53 = vld [vmem:[%s1932_s27 + $0x140] sm:$0xff] }
  0xd4   : > { %1525 = vmatmul.msk.f32.gmra.mxu3 %vm358_vm1, %v329_v53 }
  0xd6   : > { %v593_v54 = vpop.f32.mrf.mxu0 }
  0xd7   : > { %v594_v56 = vadd.f32 %v1966_v25, %v593_v54 }
  0xd9   : > { %v771_v57 = vmax.f32 %v594_v56, 0.0  ;;  %1508 = vmatmul.msk.f32.gmra.mxu0 %vm358_vm1, %v312_v55 }
  0xdb   : > { %1556 = vmatmul.msk.f32.gmra.mxu1 %vm840_vm2, %v771_v57 }
  0xde   : > { %v596_v58 = vpop.f32.mrf.mxu0 }
  0xdf   : > { %v597_v60 = vadd.f32 %v1966_v25, %v596_v58 }
  0xe1   : > { %v772_v61 = vmax.f32 %v597_v60, 0.0  ;;  %1509 = vmatmul.msk.f32.gmra.mxu0 %vm358_vm1, %v313_v59  ;;  %v330_v60 = vld [vmem:[%s1932_s27 + $0x148] sm:$0xff] }
  0xe2   : > { %1526 = vmatmul.msk.f32.gmra.mxu3 %vm358_vm1, %v330_v60 }
  0xe3   : > { %1557 = vmatmul.msk.f32.gmra.mxu1 %vm840_vm2, %v772_v61 }
  0xe6   : > { %v599_v62 = vpop.f32.mrf.mxu0 }
  0xe7   : > { %v600_v0 = vadd.f32 %v1966_v25, %v599_v62 }
  0xe9   : > { %v773_v1 = vmax.f32 %v600_v0, 0.0  ;;  %1510 = vmatmul.msk.f32.gmra.mxu0 %vm358_vm1, %v314_v63 }
  0xeb   : > { %1558 = vmatmul.msk.f32.gmra.mxu1 %vm840_vm2, %v773_v1 }
  0xee   : > { %v602_v2 = vpop.f32.mrf.mxu0 }
  0xef   : > { %v603_v4 = vadd.f32 %v1966_v25, %v602_v2 }
  0xf1   : > { %v774_v5 = vmax.f32 %v603_v4, 0.0  ;;  %1511 = vmatmul.msk.f32.gmra.mxu0 %vm358_vm1, %v315_v3  ;;  %v331_v3 = vld [vmem:[%s1932_s27 + $0x150] sm:$0xff] }
  0xf2   : > { %1527 = vmatmul.msk.f32.gmra.mxu3 %vm358_vm1, %v331_v3 }
  0xf3   : > { %1559 = vmatmul.msk.f32.gmra.mxu1 %vm840_vm2, %v774_v5 }
  0xf6   : > { %v605_v6 = vpop.f32.mrf.mxu0 }
  0xf7   : > { %v606_v8 = vadd.f32 %v1966_v25, %v605_v6 }
  0xf9   : > { %v775_v9 = vmax.f32 %v606_v8, 0.0  ;;  %1512 = vmatmul.msk.f32.gmra.mxu0 %vm358_vm1, %v316_v7 }
  0xfa   : > { %1528 = vmatmul.msk.f32.gmra.mxu3 %vm358_vm1, %v332_v10 }
  0xfb   : > { %1560 = vmatmul.msk.f32.gmra.mxu1 %vm840_vm2, %v775_v9 }
  0xfe   : > { %v608_v11 = vpop.f32.mrf.mxu0 }
  0xff   : > { %v609_v13 = vadd.f32 %v1966_v25, %v608_v11 }
 0x101   : > { %v776_v14 = vmax.f32 %v609_v13, 0.0  ;;  %1513 = vmatmul.msk.f32.gmra.mxu0 %vm358_vm1, %v317_v12 }
 0x103   : > { %1561 = vmatmul.msk.f32.gmra.mxu1 %vm840_vm2, %v776_v14 }
 0x106   : > { %v611_v16 = vpop.f32.mrf.mxu0 }
 0x107   : > { %v612_v18 = vadd.f32 %v1966_v25, %v611_v16 }
 0x109   : > { %v777_v19 = vmax.f32 %v612_v18, 0.0  ;;  %1514 = vmatmul.msk.f32.gmra.mxu0 %vm358_vm1, %v318_v17  ;;  %v333_v17 = vld [vmem:[%s1932_s27 + $0x160] sm:$0xff] }
 0x10a   : > { %1529 = vmatmul.msk.f32.gmra.mxu3 %vm358_vm1, %v333_v17 }
 0x10b   : > { %1562 = vmatmul.msk.f32.gmra.mxu1 %vm840_vm2, %v777_v19 }
 0x10e   : > { %v614_v21 = vpop.f32.mrf.mxu0 }
 0x10f   : > { %v615_v23 = vadd.f32 %v1966_v25, %v614_v21 }
 0x111   : > { %v778_v24 = vmax.f32 %v615_v23, 0.0  ;;  %1515 = vmatmul.msk.f32.gmra.mxu0 %vm358_vm1, %v319_v22 }
 0x113   : > { %1563 = vmatmul.msk.f32.gmra.mxu1 %vm840_vm2, %v778_v24  ;;  %v334_v24 = vld [vmem:[%s1932_s27 + $0x168] sm:$0xff] }
 0x114   : > { %1530 = vmatmul.msk.f32.gmra.mxu3 %vm358_vm1, %v334_v24 }
 0x116   : > { %v617_v27 = vpop.f32.mrf.mxu0 }
 0x117   : > { %v618_v29 = vadd.f32 %v1966_v25, %v617_v27 }
 0x119   : > { %v779_v30 = vmax.f32 %v618_v29, 0.0  ;;  %1516 = vmatmul.msk.f32.gmra.mxu0 %vm358_vm1, %v320_v28 }
 0x11b   : > { %1564 = vmatmul.msk.f32.gmra.mxu1 %vm840_vm2, %v779_v30 }
 0x11e   : > { %v620_v33 = vpop.f32.mrf.mxu0 }
 0x11f   : > { %v621_v35 = vadd.f32 %v1966_v25, %v620_v33  ;;  %v335_v33 = vld [vmem:[%s1932_s27 + $0x170] sm:$0xff] }
 0x120   : > { %v1050_v36 = vpop.f32.mrf.mxu1  ;;  %1531 = vmatmul.msk.f32.gmra.mxu3 %vm358_vm1, %v335_v33 }
 0x121   : > { %v780_v37 = vmax.f32 %v621_v35, 0.0  ;;  %v1051_v38 = vadd.f32 %v2042_v32, %v1050_v36  ;;  %1517 = vmatmul.msk.f32.gmra.mxu0 %vm358_vm1, %v321_v34 }
 0x123   : > { %v1242_v40 = vmax.f32 %v1051_v38, 0.0  ;;  %1565 = vmatmul.msk.f32.gmra.mxu1 %vm840_vm2, %v780_v37 }
 0x125   : > { %1306 = vst.msk [vmem:[%s2053_s28] sm:$0xff] %vm840_vm2, %v1242_v40  ;;  %v336_v40 = vld [vmem:[%s1932_s27 + $0x178] sm:$0xff] }
 0x126   : > { %v623_v41 = vpop.f32.mrf.mxu0 }
 0x127   : > { %v624_v42 = vadd.f32 %v1966_v25, %v623_v41 }
 0x128   : > { %v1053_v43 = vpop.f32.mrf.mxu1  ;;  %1532 = vmatmul.msk.f32.gmra.mxu3 %vm358_vm1, %v336_v40 }
 0x129   : > { %v781_v44 = vmax.f32 %v624_v42, 0.0  ;;  %v1054_v45 = vadd.f32 %v2042_v32, %v1053_v43 }
 0x12b   : > { %v1243_v47 = vmax.f32 %v1054_v45, 0.0  ;;  %1566 = vmatmul.msk.f32.gmra.mxu1 %vm840_vm2, %v781_v44 }
 0x12d   : > { %1307 = vst.msk [vmem:[%s2053_s28 + $0x8] sm:$0xff] %vm840_vm2, %v1243_v47  ;;  %v337_v47 = vld [vmem:[%s1932_s27 + $0x180] sm:$0xff] }
 0x12e   : > { %v626_v48 = vpop.f32.mrf.mxu0 }
 0x12f   : > { %v627_v49 = vadd.f32 %v1966_v25, %v626_v48 }
 0x130   : > { %v1056_v50 = vpop.f32.mrf.mxu1  ;;  %1533 = vmatmul.msk.f32.gmra.mxu3 %vm358_vm1, %v337_v47 }
 0x131   : > { %v782_v51 = vmax.f32 %v627_v49, 0.0  ;;  %v1057_v52 = vadd.f32 %v2042_v32, %v1056_v50 }
 0x133   : > { %v1244_v54 = vmax.f32 %v1057_v52, 0.0  ;;  %1567 = vmatmul.msk.f32.gmra.mxu1 %vm840_vm2, %v782_v51 }
 0x135   : > { %1308 = vst.msk [vmem:[%s2053_s28 + $0x10] sm:$0xff] %vm840_vm2, %v1244_v54  ;;  %v338_v54 = vld [vmem:[%s1932_s27 + $0x188] sm:$0xff] }
 0x136   : > { %v629_v55 = vpop.f32.mrf.mxu0 }
 0x137   : > { %v630_v56 = vadd.f32 %v1966_v25, %v629_v55 }
 0x138   : > { %v1059_v57 = vpop.f32.mrf.mxu1  ;;  %1534 = vmatmul.msk.f32.gmra.mxu3 %vm358_vm1, %v338_v54 }
 0x139   : > { %v783_v58 = vmax.f32 %v630_v56, 0.0  ;;  %v1060_v59 = vadd.f32 %v2042_v32, %v1059_v57  ;;  %v671_v57 = vpop.f32.mrf.mxu3 }
 0x13b   : > { %v1245_v61 = vmax.f32 %v1060_v59, 0.0  ;;  %1568 = vmatmul.msk.f32.gmra.mxu1 %vm840_vm2, %v783_v58 }
 0x13d   : > { %1309 = vst.msk [vmem:[%s2053_s28 + $0x18] sm:$0xff] %vm840_vm2, %v1245_v61 }
 0x13e   : > { %v632_v62 = vpop.f32.mrf.mxu0 }
 0x13f   : > { %v633_v63 = vadd.f32 %v1966_v25, %v632_v62  ;;  %v339_v62 = vld [vmem:[%s1932_s27 + $0x190] sm:$0xff] }
 0x140   : > { %v1062_v0 = vpop.f32.mrf.mxu1  ;;  %1535 = vmatmul.msk.f32.gmra.mxu3 %vm358_vm1, %v339_v62 }
 0x141   : > { %v784_v1 = vmax.f32 %v633_v63, 0.0  ;;  %v1063_v2 = vadd.f32 %v2042_v32, %v1062_v0 }
 0x143   : > { %v1246_v4 = vmax.f32 %v1063_v2, 0.0  ;;  %1569 = vmatmul.msk.f32.gmra.mxu1 %vm840_vm2, %v784_v1  ;;  %v674_v1 = vpop.f32.mrf.mxu3 }
 0x145   : > { %1310 = vst.msk [vmem:[%s2053_s28 + $0x20] sm:$0xff] %vm840_vm2, %v1246_v4 }
 0x146   : > { %v635_v5 = vpop.f32.mrf.mxu0 }
 0x147   : > { %v636_v6 = vadd.f32 %v1966_v25, %v635_v5 }
 0x148   : > { %v1065_v7 = vpop.f32.mrf.mxu1 }
 0x149   : > { %v785_v8 = vmax.f32 %v636_v6, 0.0  ;;  %v1066_v9 = vadd.f32 %v2042_v32, %v1065_v7  ;;  %v340_v6 = vld [vmem:[%s1932_s27 + $0x198] sm:$0xff] }
 0x14a   : > { %1536 = vmatmul.msk.f32.gmra.mxu3 %vm358_vm1, %v340_v6 }
 0x14b   : > { %v1247_v11 = vmax.f32 %v1066_v9, 0.0  ;;  %1570 = vmatmul.msk.f32.gmra.mxu1 %vm840_vm2, %v785_v8  ;;  %v677_v9 = vpop.f32.mrf.mxu3 }
 0x14d   : > { %1311 = vst.msk [vmem:[%s2053_s28 + $0x28] sm:$0xff] %vm840_vm2, %v1247_v11 }
 0x14e   : > { %v638_v12 = vpop.f32.mrf.mxu0 }
 0x14f   : > { %v639_v13 = vadd.f32 %v1966_v25, %v638_v12 }
 0x150   : > { %v1068_v14 = vpop.f32.mrf.mxu1 }
 0x151   : > { %v786_v15 = vmax.f32 %v639_v13, 0.0  ;;  %v1069_v16 = vadd.f32 %v2042_v32, %v1068_v14  ;;  %v341_v14 = vld [vmem:[%s1932_s27 + $0x1a0] sm:$0xff] }
 0x152   : > { %1537 = vmatmul.msk.f32.gmra.mxu3 %vm358_vm1, %v341_v14 }
 0x153   : > { %v1248_v18 = vmax.f32 %v1069_v16, 0.0  ;;  %1571 = vmatmul.msk.f32.gmra.mxu1 %vm840_vm2, %v786_v15  ;;  %v680_v17 = vpop.f32.mrf.mxu3 }
 0x155   : > { %1312 = vst.msk [vmem:[%s2053_s28 + $0x30] sm:$0xff] %vm840_vm2, %v1248_v18 }
 0x156   : > { %v641_v19 = vpop.f32.mrf.mxu0 }
 0x157   : > { %v642_v20 = vadd.f32 %v1966_v25, %v641_v19 }
 0x158   : > { %v1071_v21 = vpop.f32.mrf.mxu1 }
 0x159   : > { %v787_v22 = vmax.f32 %v642_v20, 0.0  ;;  %v1072_v23 = vadd.f32 %v2042_v32, %v1071_v21 }
 0x15b   : > { %v1249_v26 = vmax.f32 %v1072_v23, 0.0  ;;  %1572 = vmatmul.msk.f32.gmra.mxu1 %vm840_vm2, %v787_v22  ;;  %v342_v22 = vld [vmem:[%s1932_s27 + $0x1a8] sm:$0xff] }
 0x15c   : > { %1538 = vmatmul.msk.f32.gmra.mxu3 %vm358_vm1, %v342_v22 }
 0x15d   : > { %1313 = vst.msk [vmem:[%s2053_s28 + $0x38] sm:$0xff] %vm840_vm2, %v1249_v26  ;;  %v683_v26 = vpop.f32.mrf.mxu3 }
 0x15e   : > { %v644_v27 = vpop.f32.mrf.mxu0  ;;  %v684_v62 = vadd.f32 %v1966_v25, %v683_v26 }
 0x15f   : > { %v645_v28 = vadd.f32 %v1966_v25, %v644_v27 }
 0x160   : > { %v1074_v29 = vpop.f32.mrf.mxu1 }
 0x161   : > { %v788_v30 = vmax.f32 %v645_v28, 0.0  ;;  %v1075_v31 = vadd.f32 %v2042_v32, %v1074_v29 }
 0x163   : > { %v1250_v34 = vmax.f32 %v1075_v31, 0.0  ;;  %1573 = vmatmul.msk.f32.gmra.mxu1 %vm840_vm2, %v788_v30  ;;  %v343_v31 = vld [vmem:[%s1932_s27 + $0x1b0] sm:$0xff] }
 0x164   : > { %1539 = vmatmul.msk.f32.gmra.mxu3 %vm358_vm1, %v343_v31 }
 0x165   : > { %1314 = vst.msk [vmem:[%s2053_s28 + $0x40] sm:$0xff] %vm840_vm2, %v1250_v34  ;;  %v672_v34 = vadd.f32 %v1966_v25, %v671_v57 }
 0x166   : > { %v647_v35 = vpop.f32.mrf.mxu0 }
 0x167   : > { %v648_v36 = vadd.f32 %v1966_v25, %v647_v35  ;;  %v686_v35 = vpop.f32.mrf.mxu3 }
 0x168   : > { %v1077_v37 = vpop.f32.mrf.mxu1 }
 0x169   : > { %v789_v38 = vmax.f32 %v648_v36, 0.0  ;;  %v1078_v39 = vadd.f32 %v2042_v32, %v1077_v37  ;;  %v797_v37 = vmax.f32 %v672_v34, 0.0 }
 0x16b   : > { %v1251_v41 = vmax.f32 %v1078_v39, 0.0  ;;  %1574 = vmatmul.msk.f32.gmra.mxu1 %vm840_vm2, %v789_v38  ;;  %v344_v39 = vld [vmem:[%s1932_s27 + $0x1b8] sm:$0xff] }
 0x16c   : > { %1540 = vmatmul.msk.f32.gmra.mxu3 %vm358_vm1, %v344_v39 }
 0x16d   : > { %1315 = vst.msk [vmem:[%s2053_s28 + $0x48] sm:$0xff] %vm840_vm2, %v1251_v41  ;;  %v675_v41 = vadd.f32 %v1966_v25, %v674_v1  ;;  %v801_v1 = vmax.f32 %v684_v62, 0.0 }
 0x16e   : > { %v650_v42 = vpop.f32.mrf.mxu0 }
 0x16f   : > { %v651_v43 = vadd.f32 %v1966_v25, %v650_v42  ;;  %v689_v42 = vpop.f32.mrf.mxu3 }
 0x170   : > { %v1080_v44 = vpop.f32.mrf.mxu1 }
 0x171   : > { %v790_v45 = vmax.f32 %v651_v43, 0.0  ;;  %v1081_v46 = vadd.f32 %v2042_v32, %v1080_v44  ;;  %v798_v44 = vmax.f32 %v675_v41, 0.0 }
 0x173   : > { %v1252_v48 = vmax.f32 %v1081_v46, 0.0  ;;  %1575 = vmatmul.msk.f32.gmra.mxu1 %vm840_vm2, %v790_v45  ;;  %v345_v46 = vld [vmem:[%s1932_s27 + $0x1c0] sm:$0xff] }
 0x174   : > { %1541 = vmatmul.msk.f32.gmra.mxu3 %vm358_vm1, %v345_v46 }
 0x175   : > { %1316 = vst.msk [vmem:[%s2053_s28 + $0x50] sm:$0xff] %vm840_vm2, %v1252_v48  ;;  %v678_v48 = vadd.f32 %v1966_v25, %v677_v9 }
 0x176   : > { %v653_v49 = vpop.f32.mrf.mxu0 }
 0x177   : > { %v654_v50 = vadd.f32 %v1966_v25, %v653_v49  ;;  %v692_v49 = vpop.f32.mrf.mxu3 }
 0x178   : > { %v1083_v51 = vpop.f32.mrf.mxu1 }
 0x179   : > { %v791_v52 = vmax.f32 %v654_v50, 0.0  ;;  %v1084_v53 = vadd.f32 %v2042_v32, %v1083_v51  ;;  %v799_v51 = vmax.f32 %v678_v48, 0.0 }
 0x17b   : > { %v1253_v55 = vmax.f32 %v1084_v53, 0.0  ;;  %1576 = vmatmul.msk.f32.gmra.mxu1 %vm840_vm2, %v791_v52  ;;  %v346_v53 = vld [vmem:[%s1932_s27 + $0x1c8] sm:$0xff] }
 0x17c   : > { %1542 = vmatmul.msk.f32.gmra.mxu3 %vm358_vm1, %v346_v53 }
 0x17d   : > { %1317 = vst.msk [vmem:[%s2053_s28 + $0x58] sm:$0xff] %vm840_vm2, %v1253_v55  ;;  %v681_v55 = vadd.f32 %v1966_v25, %v680_v17  ;;  %v350_v17 = vld [vmem:[%s1932_s27 + $0x1e8] sm:$0xff] }
 0x17e   : > { %v656_v56 = vpop.f32.mrf.mxu0 }
 0x17f   : > { %v657_v58 = vadd.f32 %v1966_v25, %v656_v56  ;;  %v695_v56 = vpop.f32.mrf.mxu3 }
 0x180   : > { %v1086_v59 = vpop.f32.mrf.mxu1 }
 0x181   : > { %v792_v60 = vmax.f32 %v657_v58, 0.0  ;;  %v1087_v61 = vadd.f32 %v2042_v32, %v1086_v59  ;;  %v800_v58 = vmax.f32 %v681_v55, 0.0 }
 0x183   : > { %v1254_v63 = vmax.f32 %v1087_v61, 0.0  ;;  %1577 = vmatmul.msk.f32.gmra.mxu1 %vm840_vm2, %v792_v60  ;;  %v347_v60 = vld [vmem:[%s1932_s27 + $0x1d0] sm:$0xff] }
 0x184   : > { %1543 = vmatmul.msk.f32.gmra.mxu3 %vm358_vm1, %v347_v60 }
 0x185   : > { %1318 = vst.msk [vmem:[%s2053_s28 + $0x60] sm:$0xff] %vm840_vm2, %v1254_v63 }
 0x186   : > { %v659_v0 = vpop.f32.mrf.mxu0 }
 0x187   : > { %v660_v2 = vadd.f32 %v1966_v25, %v659_v0  ;;  %v698_v63 = vpop.f32.mrf.mxu3 }
 0x188   : > { %v1089_v3 = vpop.f32.mrf.mxu1 }
 0x189   : > { %v793_v4 = vmax.f32 %v660_v2, 0.0  ;;  %v1090_v5 = vadd.f32 %v2042_v32, %v1089_v3  ;;  %v348_v3 = vld [vmem:[%s1932_s27 + $0x1d8] sm:$0xff] }
 0x18b   : > { %v1255_v7 = vmax.f32 %v1090_v5, 0.0  ;;  %1578 = vmatmul.msk.f32.gmra.mxu1 %vm840_vm2, %v793_v4  ;;  %v687_v5 = vadd.f32 %v1966_v25, %v686_v35  ;;  %v699_v35 = vadd.f32 %v1966_v25, %v698_v63 }
 0x18c   : > { %1544 = vmatmul.msk.f32.gmra.mxu3 %vm358_vm1, %v348_v3 }
 0x18d   : > { %1319 = vst.msk [vmem:[%s2053_s28 + $0x68] sm:$0xff] %vm840_vm2, %v1255_v7 }
 0x18e   : > { %v662_v8 = vpop.f32.mrf.mxu0 }
 0x18f   : > { %v663_v10 = vadd.f32 %v1966_v25, %v662_v8  ;;  %v701_v6 = vpop.f32.mrf.mxu3  ;;  %v802_v8 = vmax.f32 %v687_v5, 0.0 }
 0x190   : > { %v1092_v11 = vpop.f32.mrf.mxu1  ;;  %v702_v41 = vadd.f32 %v1966_v25, %v701_v6 }
 0x191   : > { %v794_v12 = vmax.f32 %v663_v10, 0.0  ;;  %v1093_v13 = vadd.f32 %v2042_v32, %v1092_v11  ;;  %v349_v10 = vld [vmem:[%s1932_s27 + $0x1e0] sm:$0xff] }
 0x193   : > { %v1256_v15 = vmax.f32 %v1093_v13, 0.0  ;;  %1579 = vmatmul.msk.f32.gmra.mxu1 %vm840_vm2, %v794_v12  ;;  %v690_v12 = vadd.f32 %v1966_v25, %v689_v42 }
 0x194   : > { %1545 = vmatmul.msk.f32.gmra.mxu3 %vm358_vm1, %v349_v10 }
 0x195   : > { %1320 = vst.msk [vmem:[%s2053_s28 + $0x70] sm:$0xff] %vm840_vm2, %v1256_v15  ;;  %v803_v15 = vmax.f32 %v690_v12, 0.0 }
 0x196   : > { %v665_v16 = vpop.f32.mrf.mxu0 }
 0x197   : > { %v666_v18 = vadd.f32 %v1966_v25, %v665_v16  ;;  %v704_v13 = vpop.f32.mrf.mxu3 }
 0x198   : > { %v1095_v19 = vpop.f32.mrf.mxu1 }
 0x199   : > { %v795_v20 = vmax.f32 %v666_v18, 0.0  ;;  %v1096_v21 = vadd.f32 %v2042_v32, %v1095_v19  ;;  %v693_v19 = vadd.f32 %v1966_v25, %v692_v49 }
 0x19b   : > { %v1257_v23 = vmax.f32 %v1096_v21, 0.0  ;;  %1580 = vmatmul.msk.f32.vlgmr.msra.gmra.mxu2 %vm840_vm2, %v795_v20  ;;  %v804_v22 = vmax.f32 %v693_v19, 0.0 }
 0x19c   : > { %1546 = vmatmul.msk.f32.gmra.mxu3 %vm358_vm1, %v350_v17 }
 0x19d   : > { %1321 = vst.msk [vmem:[%s2053_s28 + $0x78] sm:$0xff] %vm840_vm2, %v1257_v23 }
 0x19e   : > { %v668_v24 = vpop.f32.mrf.mxu0 }
 0x19f   : > { %v669_v27 = vadd.f32 %v1966_v25, %v668_v24  ;;  %v707_v20 = vpop.f32.mrf.mxu3  ;;  %v351_v24 = vld [vmem:[%s1932_s27 + $0x1f0] sm:$0xff] }
 0x1a0   : > { %v1098_v28 = vpop.f32.mrf.mxu1  ;;  %v708_v53 = vadd.f32 %v1966_v25, %v707_v20 }
 0x1a1   : > { %v796_v29 = vmax.f32 %v669_v27, 0.0  ;;  %v1099_v30 = vadd.f32 %v2042_v32, %v1098_v28  ;;  %v696_v27 = vadd.f32 %v1966_v25, %v695_v56 }
 0x1a2   : > { %v809_v56 = vmax.f32 %v708_v53, 0.0 }
 0x1a3   : > { %v1258_v33 = vmax.f32 %v1099_v30, 0.0  ;;  %1581 = vmatmul.msk.f32.gmra.mxu2 %vm840_vm2, %v796_v29  ;;  %v805_v30 = vmax.f32 %v696_v27, 0.0 }
 0x1a4   : > { %1547 = vmatmul.msk.f32.gmra.mxu3 %vm358_vm1, %v351_v24 }
 0x1a5   : > { %1322 = vst.msk [vmem:[%s2053_s28 + $0x80] sm:$0xff] %vm840_vm2, %v1258_v33  ;;  %v352_v33 = vld [vmem:[%s1932_s27 + $0x1f8] sm:$0xff] }
 0x1a7   : > { %v710_v28 = vpop.f32.mrf.mxu3 }
 0x1a8   : > { %v1101_v36 = vpop.f32.mrf.mxu1 }
 0x1a9   : > { %v1102_v38 = vadd.f32 %v2042_v32, %v1101_v36 }
 0x1ab   : > { %v1259_v40 = vmax.f32 %v1102_v38, 0.0  ;;  %1582 = vmatmul.msk.f32.gmra.mxu2 %vm840_vm2, %v797_v37  ;;  %v806_v38 = vmax.f32 %v699_v35, 0.0 }
 0x1ac   : > { %1548 = vmatmul.msk.f32.gmra.mxu3 %vm358_vm1, %v352_v33 }
 0x1ad   : > { %1323 = vst.msk [vmem:[%s2053_s28 + $0x88] sm:$0xff] %vm840_vm2, %v1259_v40 }
 0x1af   : > { %v713_v36 = vpop.f32.mrf.mxu3 }
 0x1b0   : > { %v1104_v43 = vpop.f32.mrf.mxu1 }
 0x1b1   : > { %v1105_v45 = vadd.f32 %v2042_v32, %v1104_v43 }
 0x1b3   : > { %v1260_v47 = vmax.f32 %v1105_v45, 0.0  ;;  %1583 = vmatmul.msk.f32.gmra.mxu2 %vm840_vm2, %v798_v44  ;;  %v807_v44 = vmax.f32 %v702_v41, 0.0 }
 0x1b5   : > { %1324 = vst.msk [vmem:[%s2053_s28 + $0x90] sm:$0xff] %vm840_vm2, %v1260_v47  ;;  %v705_v47 = vadd.f32 %v1966_v25, %v704_v13 }
 0x1b7   : > { %v716_v42 = vpop.f32.mrf.mxu3 }
 0x1b8   : > { %v1107_v50 = vpop.f32.mrf.mxu1 }
 0x1b9   : > { %v1108_v52 = vadd.f32 %v2042_v32, %v1107_v50  ;;  %v808_v50 = vmax.f32 %v705_v47, 0.0 }
 0x1bb   : > { %v1261_v54 = vmax.f32 %v1108_v52, 0.0  ;;  %1584 = vmatmul.msk.f32.gmra.mxu2 %vm840_vm2, %v799_v51 }
 0x1bd   : > { %1325 = vst.msk [vmem:[%s2053_s28 + $0x98] sm:$0xff] %vm840_vm2, %v1261_v54 }
 0x1bf   : > { %v719_v48 = vpop.f32.mrf.mxu3 }
 0x1c0   : > { %v1110_v57 = vpop.f32.mrf.mxu1  ;;  %v720_v10 = vadd.f32 %v1966_v25, %v719_v48 }
 0x1c1   : > { %v1111_v59 = vadd.f32 %v2042_v32, %v1110_v57 }
 0x1c3   : > { %v1262_v61 = vmax.f32 %v1111_v59, 0.0  ;;  %1585 = vmatmul.msk.f32.gmra.mxu2 %vm840_vm2, %v800_v58  ;;  %v711_v59 = vadd.f32 %v1966_v25, %v710_v28 }
 0x1c5   : > { %1326 = vst.msk [vmem:[%s2053_s28 + $0xa0] sm:$0xff] %vm840_vm2, %v1262_v61  ;;  %v810_v62 = vmax.f32 %v711_v59, 0.0 }
 0x1c7   : > { %v722_v54 = vpop.f32.mrf.mxu3 }
 0x1c8   : > { %v1113_v0 = vpop.f32.mrf.mxu1 }
 0x1c9   : > { %v1114_v2 = vadd.f32 %v2042_v32, %v1113_v0 }
 0x1cb   : > { %v1263_v4 = vmax.f32 %v1114_v2, 0.0  ;;  %1586 = vmatmul.msk.f32.gmra.mxu2 %vm840_vm2, %v801_v1  ;;  %v714_v1 = vadd.f32 %v1966_v25, %v713_v36 }
 0x1cd   : > { %1327 = vst.msk [vmem:[%s2053_s28 + $0xa8] sm:$0xff] %vm840_vm2, %v1263_v4  ;;  %v811_v3 = vmax.f32 %v714_v1, 0.0  ;;  %v717_v4 = vadd.f32 %v1966_v25, %v716_v42 }
 0x1cf   : > { %v725_v60 = vpop.f32.mrf.mxu3 }
 0x1d0   : > { %v1116_v7 = vpop.f32.mrf.mxu1 }
 0x1d1   : > { %v1117_v9 = vadd.f32 %v2042_v32, %v1116_v7 }
 0x1d3   : > { %v1264_v11 = vmax.f32 %v1117_v9, 0.0  ;;  %1587 = vmatmul.msk.f32.gmra.mxu2 %vm840_vm2, %v802_v8  ;;  %v812_v8 = vmax.f32 %v717_v4, 0.0 }
 0x1d5   : > { %1328 = vst.msk [vmem:[%s2053_s28 + $0xb0] sm:$0xff] %vm840_vm2, %v1264_v11 }
 0x1d7   : > { %v728_v2 = vpop.f32.mrf.mxu3 }
 0x1d8   : > { %v1119_v14 = vpop.f32.mrf.mxu1 }
 0x1d9   : > { %v1120_v16 = vadd.f32 %v2042_v32, %v1119_v14  ;;  %v813_v14 = vmax.f32 %v720_v10, 0.0  ;;  %v1685_v10 = vld [vmem:[#allocation4] ss:$0 sm:$0xff] }
 0x1db   : > { %v1265_v18 = vmax.f32 %v1120_v16, 0.0  ;;  %1588 = vmatmul.msk.f32.gmra.mxu2 %vm840_vm2, %v803_v15  ;;  %v723_v16 = vadd.f32 %v1966_v25, %v722_v54 }
 0x1dd   : > { %1329 = vst.msk [vmem:[%s2053_s28 + $0xb8] sm:$0xff] %vm840_vm2, %v1265_v18  ;;  %v814_v20 = vmax.f32 %v723_v16, 0.0 }
 0x1df   : > { %v731_v6 = vpop.f32.mrf.mxu3 }
 0x1e0   : > { %v1122_v21 = vpop.f32.mrf.mxu1  ;;  %v732_v36 = vadd.f32 %v1966_v25, %v731_v6 }
 0x1e1   : > { %v1123_v23 = vadd.f32 %v2042_v32, %v1122_v21 }
 0x1e3   : > { %v1266_v26 = vmax.f32 %v1123_v23, 0.0  ;;  %1589 = vmatmul.msk.f32.gmra.mxu2 %vm840_vm2, %v804_v22  ;;  %v726_v22 = vadd.f32 %v1966_v25, %v725_v60 }
 0x1e5   : > { %1330 = vst.msk [vmem:[%s2053_s28 + $0xc0] sm:$0xff] %vm840_vm2, %v1266_v26  ;;  %v815_v27 = vmax.f32 %v726_v22, 0.0 }
 0x1e7   : > { %v734_v12 = vpop.f32.mrf.mxu3 }
 0x1e8   : > { %v1125_v29 = vpop.f32.mrf.mxu1  ;;  %v735_v42 = vadd.f32 %v1966_v25, %v734_v12 }
 0x1e9   : > { %v1126_v31 = vadd.f32 %v2042_v32, %v1125_v29  ;;  %v729_v29 = vadd.f32 %v1966_v25, %v728_v2 }
 0x1eb   : > { %v1267_v34 = vmax.f32 %v1126_v31, 0.0  ;;  %1590 = vmatmul.msk.f32.gmra.mxu2 %vm840_vm2, %v805_v30 }
 0x1ed   : > { %1331 = vst.msk [vmem:[%s2053_s28 + $0xc8] sm:$0xff] %vm840_vm2, %v1267_v34  ;;  %v816_v34 = vmax.f32 %v729_v29, 0.0 }
 0x1ef   : > { %v737_v18 = vpop.f32.mrf.mxu3 }
 0x1f0   : > { %v1128_v37 = vpop.f32.mrf.mxu1  ;;  %v738_v48 = vadd.f32 %v1966_v25, %v737_v18 }
 0x1f1   : > { %v1129_v39 = vadd.f32 %v2042_v32, %v1128_v37 }
 0x1f3   : > { %v1268_v40 = vmax.f32 %v1129_v39, 0.0  ;;  %1591 = vmatmul.msk.f32.gmra.mxu2 %vm840_vm2, %v806_v38 }
 0x1f5   : > { %1332 = vst.msk [vmem:[%s2053_s28 + $0xd0] sm:$0xff] %vm840_vm2, %v1268_v40  ;;  %v817_v40 = vmax.f32 %v732_v36, 0.0 }
 0x1f7   : > { %v740_v24 = vpop.f32.mrf.mxu3 }
 0x1f8   : > { %v1131_v43 = vpop.f32.mrf.mxu1  ;;  %v741_v54 = vadd.f32 %v1966_v25, %v740_v24 }
 0x1f9   : > { %v1132_v45 = vadd.f32 %v2042_v32, %v1131_v43 }
 0x1fb   : > { %v1269_v46 = vmax.f32 %v1132_v45, 0.0  ;;  %1592 = vmatmul.msk.f32.gmra.mxu2 %vm840_vm2, %v807_v44 }
 0x1fd   : > { %1333 = vst.msk [vmem:[%s2053_s28 + $0xd8] sm:$0xff] %vm840_vm2, %v1269_v46  ;;  %v818_v46 = vmax.f32 %v735_v42, 0.0 }
 0x1ff   : > { %v743_v31 = vpop.f32.mrf.mxu3 }
 0x200   : > { %v1134_v49 = vpop.f32.mrf.mxu1  ;;  %v744_v60 = vadd.f32 %v1966_v25, %v743_v31 }
 0x201   : > { %v1135_v51 = vadd.f32 %v2042_v32, %v1134_v49 }
 0x203   : > { %v1270_v52 = vmax.f32 %v1135_v51, 0.0  ;;  %1593 = vmatmul.msk.f32.gmra.mxu2 %vm840_vm2, %v808_v50 }
 0x205   : > { %1334 = vst.msk [vmem:[%s2053_s28 + $0xe0] sm:$0xff] %vm840_vm2, %v1270_v52  ;;  %v819_v52 = vmax.f32 %v738_v48, 0.0 }
 0x207   : > { %v746_v38 = vpop.f32.mrf.mxu3 }
 0x208   : > { %v1137_v55 = vpop.f32.mrf.mxu1  ;;  %v747_v2 = vadd.f32 %v1966_v25, %v746_v38 }
 0x209   : > { %v1138_v57 = vadd.f32 %v2042_v32, %v1137_v55 }
 0x20b   : > { %v1271_v58 = vmax.f32 %v1138_v57, 0.0  ;;  %1594 = vmatmul.msk.f32.gmra.mxu2 %vm840_vm2, %v809_v56 }
 0x20d   : > { %1335 = vst.msk [vmem:[%s2053_s28 + $0xe8] sm:$0xff] %vm840_vm2, %v1271_v58  ;;  %v820_v58 = vmax.f32 %v741_v54, 0.0 }
 0x20f   : > { %v749_v44 = vpop.f32.mrf.mxu3 }
 0x210   : > { %v1140_v61 = vpop.f32.mrf.mxu1 }
 0x211   : > { %v1141_v63 = vadd.f32 %v2042_v32, %v1140_v61 }
 0x213   : > { %v1272_v0 = vmax.f32 %v1141_v63, 0.0  ;;  %1595 = vmatmul.msk.f32.gmra.mxu2 %vm840_vm2, %v810_v62 }
 0x215   : > { %1336 = vst.msk [vmem:[%s2053_s28 + $0xf0] sm:$0xff] %vm840_vm2, %v1272_v0  ;;  %v821_v0 = vmax.f32 %v744_v60, 0.0 }
 0x217   : > { %v752_v50 = vpop.f32.mrf.mxu3 }
 0x21b   : > { %1596 = vmatmul.msk.f32.gmra.mxu2 %vm840_vm2, %v811_v3 }
 0x21e   : > { %v1143_v5 = vpop.f32.mrf.mxu2 }
 0x21f   : > { %v1144_v7 = vadd.f32 %v2042_v32, %v1143_v5  ;;  %v755_v56 = vpop.f32.mrf.mxu3 }
 0x221   : > { %v1273_v9 = vmax.f32 %v1144_v7, 0.0  ;;  %v822_v7 = vmax.f32 %v747_v2, 0.0 }
 0x223   : > { %1337 = vst.msk [vmem:[%s2053_s28 + $0xf8] sm:$0xff] %vm840_vm2, %v1273_v9  ;;  %1597 = vmatmul.msk.f32.gmra.mxu2 %vm840_vm2, %v812_v8 }
 0x226   : > { %v1146_v11 = vpop.f32.mrf.mxu2 }
 0x227   : > { %v1147_v13 = vadd.f32 %v2042_v32, %v1146_v11  ;;  %v758_v62 = vpop.f32.mrf.mxu3  ;;  %v750_v11 = vadd.f32 %v1685_v10, %v749_v44 }
 0x229   : > { %v1274_v15 = vmax.f32 %v1147_v13, 0.0 }
 0x22b   : > { %1338 = vst.msk [vmem:[%s2053_s28 + $0x100] sm:$0xff] %vm840_vm2, %v1274_v15  ;;  %1598 = vmatmul.msk.f32.gmra.mxu2 %vm840_vm2, %v813_v14  ;;  %v823_v14 = vmax.f32 %v750_v11, 0.0 }
 0x22e   : > { %v1149_v17 = vpop.f32.mrf.mxu2 }
 0x22f   : > { %v1150_v19 = vadd.f32 %v2042_v32, %v1149_v17  ;;  %v761_v4 = vpop.f32.mrf.mxu3 }
 0x230   : > { %v762_v6 = vadd.f32 %v1966_v25, %v761_v4  ;;  %v753_v25 = vadd.f32 %v1685_v10, %v752_v50 }
 0x231   : > { %v1275_v21 = vmax.f32 %v1150_v19, 0.0 }
 0x232   : > { %v827_v9 = vmax.f32 %v762_v6, 0.0  ;;  %v824_v18 = vmax.f32 %v753_v25, 0.0 }
 0x233   : > { %1339 = vst.msk [vmem:[%s2053_s28 + $0x108] sm:$0xff] %vm840_vm2, %v1275_v21  ;;  %1599 = vmatmul.msk.f32.gmra.mxu2 %vm840_vm2, %v814_v20  ;;  %v756_v20 = vadd.f32 %v1685_v10, %v755_v56 }
 0x234   : > { %1612 = vmatmul.msk.f32.vlgmr.msrb.gmra.mxu3 %vm840_vm2, %v827_v9 }
 0x236   : > { %v1152_v23 = vpop.f32.mrf.mxu2 }
 0x237   : > { %v1153_v26 = vadd.f32 %v2042_v32, %v1152_v23  ;;  %v825_v23 = vmax.f32 %v756_v20, 0.0 }
 0x239   : > { %v1276_v28 = vmax.f32 %v1153_v26, 0.0  ;;  %v759_v26 = vadd.f32 %v1685_v10, %v758_v62 }
 0x23b   : > { %1340 = vst.msk [vmem:[%s2053_s28 + $0x110] sm:$0xff] %vm840_vm2, %v1276_v28  ;;  %1600 = vmatmul.msk.f32.gmra.mxu2 %vm840_vm2, %v815_v27  ;;  %v826_v29 = vmax.f32 %v759_v26, 0.0 }
 0x23e   : > { %v1155_v30 = vpop.f32.mrf.mxu2 }
 0x23f   : > { %v1156_v33 = vadd.f32 %v2042_v32, %v1155_v30 }
 0x241   : > { %v1277_v35 = vmax.f32 %v1156_v33, 0.0 }
 0x243   : > { %1341 = vst.msk [vmem:[%s2053_s28 + $0x118] sm:$0xff] %vm840_vm2, %v1277_v35  ;;  %1601 = vmatmul.msk.f32.gmra.mxu2 %vm840_vm2, %v816_v34 }
 0x246   : > { %v1158_v37 = vpop.f32.mrf.mxu2 }
 0x247   : > { %v1159_v39 = vadd.f32 %v2042_v32, %v1158_v37 }
 0x249   : > { %v1278_v41 = vmax.f32 %v1159_v39, 0.0 }
 0x24b   : > { %1342 = vst.msk [vmem:[%s2053_s28 + $0x120] sm:$0xff] %vm840_vm2, %v1278_v41  ;;  %1602 = vmatmul.msk.f32.gmra.mxu2 %vm840_vm2, %v817_v40 }
 0x24e   : > { %v1161_v43 = vpop.f32.mrf.mxu2 }
 0x24f   : > { %v1162_v45 = vadd.f32 %v2042_v32, %v1161_v43 }
 0x251   : > { %v1279_v47 = vmax.f32 %v1162_v45, 0.0 }
 0x253   : > { %1343 = vst.msk [vmem:[%s2053_s28 + $0x128] sm:$0xff] %vm840_vm2, %v1279_v47  ;;  %1603 = vmatmul.msk.f32.gmra.mxu2 %vm840_vm2, %v818_v46 }
 0x256   : > { %v1164_v49 = vpop.f32.mrf.mxu2 }
 0x257   : > { %v1165_v51 = vadd.f32 %v2042_v32, %v1164_v49 }
 0x259   : > { %v1280_v53 = vmax.f32 %v1165_v51, 0.0 }
 0x25b   : > { %1344 = vst.msk [vmem:[%s2053_s28 + $0x130] sm:$0xff] %vm840_vm2, %v1280_v53  ;;  %1604 = vmatmul.msk.f32.gmra.mxu2 %vm840_vm2, %v819_v52 }
 0x25e   : > { %v1167_v55 = vpop.f32.mrf.mxu2 }
 0x25f   : > { %v1168_v57 = vadd.f32 %v2042_v32, %v1167_v55 }
 0x261   : > { %v1281_v59 = vmax.f32 %v1168_v57, 0.0 }
 0x263   : > { %1345 = vst.msk [vmem:[%s2053_s28 + $0x138] sm:$0xff] %vm840_vm2, %v1281_v59  ;;  %1605 = vmatmul.msk.f32.gmra.mxu2 %vm840_vm2, %v820_v58 }
 0x266   : > { %v1170_v61 = vpop.f32.mrf.mxu2 }
 0x267   : > { %v1171_v63 = vadd.f32 %v2042_v32, %v1170_v61 }
 0x269   : > { %v1282_v1 = vmax.f32 %v1171_v63, 0.0 }
 0x26b   : > { %1346 = vst.msk [vmem:[%s2053_s28 + $0x140] sm:$0xff] %vm840_vm2, %v1282_v1  ;;  %1606 = vmatmul.msk.f32.gmra.mxu2 %vm840_vm2, %v821_v0 }
 0x26e   : > { %v1173_v3 = vpop.f32.mrf.mxu2 }
 0x26f   : > { %v1174_v5 = vadd.f32 %v2042_v32, %v1173_v3 }
 0x271   : > { %v1283_v8 = vmax.f32 %v1174_v5, 0.0 }
 0x273   : > { %1347 = vst.msk [vmem:[%s2053_s28 + $0x148] sm:$0xff] %vm840_vm2, %v1283_v8  ;;  %1607 = vmatmul.msk.f32.gmra.mxu2 %vm840_vm2, %v822_v7 }
 0x276   : > { %v1176_v12 = vpop.f32.mrf.mxu2 }
 0x277   : > { %v1177_v13 = vadd.f32 %v2042_v32, %v1176_v12 }
 0x279   : > { %v1284_v15 = vmax.f32 %v1177_v13, 0.0 }
 0x27b   : > { %1348 = vst.msk [vmem:[%s2053_s28 + $0x150] sm:$0xff] %vm840_vm2, %v1284_v15  ;;  %1608 = vmatmul.msk.f32.gmra.mxu2 %vm840_vm2, %v823_v14 }
 0x27e   : > { %v1179_v16 = vpop.f32.mrf.mxu2 }
 0x27f   : > { %v1180_v17 = vadd.f32 %v2042_v32, %v1179_v16 }
 0x281   : > { %v1285_v19 = vmax.f32 %v1180_v17, 0.0 }
 0x283   : > { %1349 = vst.msk [vmem:[%s2053_s28 + $0x158] sm:$0xff] %vm840_vm2, %v1285_v19  ;;  %1609 = vmatmul.msk.f32.gmra.mxu2 %vm840_vm2, %v824_v18 }
 0x286   : > { %v1182_v21 = vpop.f32.mrf.mxu2 }
 0x287   : > { %v1183_v22 = vadd.f32 %v2042_v32, %v1182_v21 }
 0x289   : > { %v1286_v24 = vmax.f32 %v1183_v22, 0.0 }
 0x28b   : > { %1350 = vst.msk [vmem:[%s2053_s28 + $0x160] sm:$0xff] %vm840_vm2, %v1286_v24  ;;  %1610 = vmatmul.msk.f32.gmra.mxu2 %vm840_vm2, %v825_v23 }
 0x28e   : > { %v1185_v27 = vpop.f32.mrf.mxu2 }
 0x28f   : > { %v1186_v28 = vadd.f32 %v2042_v32, %v1185_v27 }
 0x291   : > { %v1287_v30 = vmax.f32 %v1186_v28, 0.0 }
 0x293   : > { %1351 = vst.msk [vmem:[%s2053_s28 + $0x168] sm:$0xff] %vm840_vm2, %v1287_v30  ;;  %1611 = vmatmul.msk.f32.gmra.mxu2 %vm840_vm2, %v826_v29 }
 0x296   : > { %v1188_v31 = vpop.f32.mrf.mxu2 }
 0x297   : > { %v1189_v33 = vadd.f32 %v2042_v32, %v1188_v31 }
 0x299   : > { %v1288_v34 = vmax.f32 %v1189_v33, 0.0 }
 0x29b   : > { %1352 = vst.msk [vmem:[%s2053_s28 + $0x170] sm:$0xff] %vm840_vm2, %v1288_v34 }
 0x29e   : > { %v1191_v35 = vpop.f32.mrf.mxu2 }
 0x29f   : > { %v1192_v36 = vadd.f32 %v2042_v32, %v1191_v35 }
 0x2a1   : > { %v1289_v37 = vmax.f32 %v1192_v36, 0.0 }
 0x2a3   : > { %1353 = vst.msk [vmem:[%s2053_s28 + $0x178] sm:$0xff] %vm840_vm2, %v1289_v37 }
 0x2a6   : > { %v1194_v38 = vpop.f32.mrf.mxu2 }
 0x2a7   : > { %v1195_v39 = vadd.f32 %v2042_v32, %v1194_v38 }
 0x2a9   : > { %v1290_v40 = vmax.f32 %v1195_v39, 0.0 }
 0x2ab   : > { %1354 = vst.msk [vmem:[%s2053_s28 + $0x180] sm:$0xff] %vm840_vm2, %v1290_v40 }
 0x2ae   : > { %v1197_v41 = vpop.f32.mrf.mxu2 }
 0x2af   : > { %v1198_v42 = vadd.f32 %v2042_v32, %v1197_v41 }
 0x2b1   : > { %v1291_v43 = vmax.f32 %v1198_v42, 0.0 }
 0x2b3   : > { %1355 = vst.msk [vmem:[%s2053_s28 + $0x188] sm:$0xff] %vm840_vm2, %v1291_v43 }
 0x2b6   : > { %v1200_v44 = vpop.f32.mrf.mxu2 }
 0x2b7   : > { %v1201_v45 = vadd.f32 %v2042_v32, %v1200_v44  ;;  %v1239_v5 = vpop.f32.mrf.mxu3 }
 0x2b8   : > { %v1240_v7 = vadd.f32 %v2042_v32, %v1239_v5 }
 0x2b9   : > { %v1292_v46 = vmax.f32 %v1201_v45, 0.0 }
 0x2ba   : > { %v1305_v9 = vmax.f32 %v1240_v7, 0.0 }
 0x2bb   : > { %1356 = vst.msk [vmem:[%s2053_s28 + $0x190] sm:$0xff] %vm840_vm2, %v1292_v46 }
 0x2bc   : > { %1369 = vst.msk [vmem:[%s2053_s28 + $0x1f8] sm:$0xff] %vm840_vm2, %v1305_v9 }
 0x2be   : > { %v1203_v47 = vpop.f32.mrf.mxu2 }
 0x2bf   : > { %v1204_v48 = vadd.f32 %v2042_v32, %v1203_v47 }
 0x2c1   : > { %v1293_v49 = vmax.f32 %v1204_v48, 0.0 }
 0x2c3   : > { %1357 = vst.msk [vmem:[%s2053_s28 + $0x198] sm:$0xff] %vm840_vm2, %v1293_v49 }
 0x2c6   : > { %v1206_v50 = vpop.f32.mrf.mxu2 }
 0x2c7   : > { %v1207_v51 = vadd.f32 %v2042_v32, %v1206_v50 }
 0x2c9   : > { %v1294_v52 = vmax.f32 %v1207_v51, 0.0 }
 0x2cb   : > { %1358 = vst.msk [vmem:[%s2053_s28 + $0x1a0] sm:$0xff] %vm840_vm2, %v1294_v52 }
 0x2ce   : > { %v1209_v53 = vpop.f32.mrf.mxu2 }
 0x2cf   : > { %v1210_v54 = vadd.f32 %v2042_v32, %v1209_v53 }
 0x2d1   : > { %v1295_v55 = vmax.f32 %v1210_v54, 0.0 }
 0x2d3   : > { %1359 = vst.msk [vmem:[%s2053_s28 + $0x1a8] sm:$0xff] %vm840_vm2, %v1295_v55 }
 0x2d6   : > { %v1212_v56 = vpop.f32.mrf.mxu2 }
 0x2d7   : > { %v1213_v57 = vadd.f32 %v2042_v32, %v1212_v56 }
 0x2d9   : > { %v1296_v58 = vmax.f32 %v1213_v57, 0.0 }
 0x2db   : > { %1360 = vst.msk [vmem:[%s2053_s28 + $0x1b0] sm:$0xff] %vm840_vm2, %v1296_v58 }
 0x2de   : > { %v1215_v59 = vpop.f32.mrf.mxu2 }
 0x2df   : > { %v1216_v60 = vadd.f32 %v2042_v32, %v1215_v59 }
 0x2e1   : > { %v1297_v61 = vmax.f32 %v1216_v60, 0.0 }
 0x2e3   : > { %1361 = vst.msk [vmem:[%s2053_s28 + $0x1b8] sm:$0xff] %vm840_vm2, %v1297_v61 }
 0x2e6   : > { %v1218_v62 = vpop.f32.mrf.mxu2 }
 0x2e7   : > { %v1219_v63 = vadd.f32 %v2042_v32, %v1218_v62 }
 0x2e9   : > { %v1298_v0 = vmax.f32 %v1219_v63, 0.0 }
 0x2eb   : > { %1362 = vst.msk [vmem:[%s2053_s28 + $0x1c0] sm:$0xff] %vm840_vm2, %v1298_v0 }
 0x2ee   : > { %v1221_v1 = vpop.f32.mrf.mxu2 }
 0x2ef   : > { %v1222_v2 = vadd.f32 %v2042_v32, %v1221_v1 }
 0x2f1   : > { %v1299_v3 = vmax.f32 %v1222_v2, 0.0 }
 0x2f3   : > { %1363 = vst.msk [vmem:[%s2053_s28 + $0x1c8] sm:$0xff] %vm840_vm2, %v1299_v3 }
 0x2f6   : > { %v1224_v4 = vpop.f32.mrf.mxu2 }
 0x2f7   : > { %v1225_v6 = vadd.f32 %v2042_v32, %v1224_v4 }
 0x2f9   : > { %v1300_v8 = vmax.f32 %v1225_v6, 0.0 }
 0x2fb   : > { %1364 = vst.msk [vmem:[%s2053_s28 + $0x1d0] sm:$0xff] %vm840_vm2, %v1300_v8 }
 0x2fe   : > { %v1227_v10 = vpop.f32.mrf.mxu2 }
 0x2ff   : > { %v1228_v11 = vadd.f32 %v2042_v32, %v1227_v10 }
 0x301   : > { %v1301_v12 = vmax.f32 %v1228_v11, 0.0 }
 0x303   : > { %1365 = vst.msk [vmem:[%s2053_s28 + $0x1d8] sm:$0xff] %vm840_vm2, %v1301_v12 }
 0x306   : > { %v1230_v13 = vpop.f32.mrf.mxu2 }
 0x307   : > { %v1231_v14 = vadd.f32 %v2042_v32, %v1230_v13 }
 0x309   : > { %v1302_v15 = vmax.f32 %v1231_v14, 0.0 }
 0x30b   : > { %1366 = vst.msk [vmem:[%s2053_s28 + $0x1e0] sm:$0xff] %vm840_vm2, %v1302_v15 }
 0x30e   : > { %v1233_v25 = vpop.f32.mrf.mxu2 }
 0x30f   : > { %v1234_v16 = vadd.f32 %v2042_v32, %v1233_v25 }
 0x311   : > { %v1303_v17 = vmax.f32 %v1234_v16, 0.0 }
 0x313   : > { %1367 = vst.msk [vmem:[%s2053_s28 + $0x1e8] sm:$0xff] %vm840_vm2, %v1303_v17 }
 0x316   : > { %v1236_v18 = vpop.f32.mrf.mxu2 }
 0x317   : > { %v1237_v19 = vadd.f32 %v2042_v32, %v1236_v18 }
 0x319   : > { %v1304_v20 = vmax.f32 %v1237_v19, 0.0 }
 0x31b   : > { %1368 = vst.msk [vmem:[%s2053_s28 + $0x1f0] sm:$0xff] %vm840_vm2, %v1304_v20 }
 0x31c PF: > { %s18_s18 = sadd.s32 1, %s1824_s18  }
 0x31d   : > { %p15_p7 = scmp.ge.s32.totalorder %s18_s18, 5  }
 0x31f   :  { %17 = sbr.rel (!%p15_p7) target bundleno = 3 (0x3), region = 87 }
 0x324   :  { %1392 = vsyncpa [#allocation3], 1 }
 0x325   :  { %1394 = vsyncpa [#allocation3 + $0x1], 1 }
 0x326   :  { %1395 = vsyncpa [#allocation5], 1 }
 0x327   :  { %1396 = vsyncpa [#allocation8], 1 }

// kernel: stage_forward.5
= control target key start
LH: loop header
LB: loop body
LE: loop exit
PB: predicated region body
PF: predicated region fallthrough
CT: control target
= control target key end

     0   :  { %s1725_s21 = smov 0   ;;  %s2567_s0 = inlined_call_operand.vmem [shape: f32[1024,256], index: 0, kind: input, shape index: {}]   ;;  %s2568_s1 = inlined_call_operand.vmem [shape: f32[256,64], index: 1, kind: input, shape index: {}]   ;;  %s2569_s2 = inlined_call_operand.vmem [shape: f32[1,64], index: 2, kind: input, shape index: {}]   ;;  %s2570_s3 = inlined_call_operand.vmem [shape: f32[64,6], index: 3, kind: input, shape index: {}]   ;;  %s2571_s4 = inlined_call_operand.vmem [shape: f32[1,6], index: 4, kind: input, shape index: {}]   ;;  %s2572_s5 = inlined_call_operand.vmem [shape: f32[1024,64], index: 5, kind: output, shape index: {0}]   ;;  %s2573_s6 = inlined_call_operand.vmem [shape: f32[1024,6], index: 6, kind: output, shape index: {1}]  }
   0x1 LB: > { %s1551_s22 = sadd.s32 4294967295, %s1688_s21   ;;  %p1555_p0 = scmp.ge.s32.totalorder %s1688_s21, 1  ;;  %s1688_s21 = sphi %s1725_s21, %s17_s21  }
   0x2   : > { %p217_p1 = scmp.lt.s32.totalorder %s1688_s21, 3 }
   0x4   : > { %p218_p2 = pnand %p1555_p0, %p217_p1 }
   0x5   : > { %s1556_s9 = sshll.u32 (!%p218_p2), %s1551_s22, 6 }
   0x6   : > { %221 = sbr.rel (%p218_p2) target bundleno = 702 (0x2be), region = 40  ;;  %p254_p3 = scmp.lt.s32.totalorder (!%p218_p2), %s1556_s9, 127 }
   0xb   : > { %v415_v0 = vld [vmem:[%s2568_s1 + $0x78] sm:$0xff]  ;;  %v414_v1 = vld [vmem:[%s2568_s1 + $0x70] sm:$0xff]  ;;  %v413_v4 = vld [vmem:[%s2568_s1 + $0x68] sm:$0xff]  ;;  %s2575_s9 = smov (!%p254_p3, %s1556_s9), 127  ;;  %vm918_vm0 = vcmask 523264   ;;  %vm1396_vm1 = vcmask 48128  }
   0xc   : > { %v1742_v2 = vld [vmem:[%s2568_s1 + $0xf8] sm:$0xff]  ;;  %436 = vmatpush.msra.mxu0 %v415_v0  ;;  %v1748_v3 = vld [vmem:[%s2568_s1 + $0xf0] sm:$0xff]  ;;  %v1756_v5 = vld [vmem:[%s2568_s1 + $0xe8] sm:$0xff]  ;;  %1630 = vmatpush.msra.mxu3 %v415_v0  ;;  %s1629_s7 = sshll.u32 %s2575_s9, 4  ;;  %s1560_s20 = sshll.u32 %s2575_s9, 3 }
   0xd   : > { %645 = vmatpush.msra.mxu1 %v1742_v2  ;;  %v412_v6 = vld [vmem:[%s2568_s1 + $0x60] sm:$0xff]  ;;  %v411_v8 = vld [vmem:[%s2568_s1 + $0x58] sm:$0xff]  ;;  %v410_v10 = vld [vmem:[%s2568_s1 + $0x50] sm:$0xff]  ;;  %s1867_s18 = scalar_lea.vmem %s2567_s0, %s1629_s7  ;;  %s1974_s25 = scalar_lea.vmem %s2572_s5, %s1560_s20 }
   0xe   : > { %437 = vmatpush.msra.mxu0 %v414_v1  ;;  %v1765_v7 = vld [vmem:[%s2568_s1 + $0xe0] sm:$0xff]  ;;  %1631 = vmatpush.msra.mxu3 %v414_v1  ;;  %v1774_v9 = vld [vmem:[%s2568_s1 + $0xd8] sm:$0xff]  ;;  %v1783_v11 = vld [vmem:[%s2568_s1 + $0xd0] sm:$0xff]  ;;  %s2137_s30 = scalar_lea.vmem %s2573_s6, %s1560_s20 }
   0xf   : > { %646 = vmatpush.msra.mxu1 %v1748_v3  ;;  %v409_v12 = vld [vmem:[%s2568_s1 + $0x48] sm:$0xff]  ;;  %v408_v14 = vld [vmem:[%s2568_s1 + $0x40] sm:$0xff]  ;;  %v407_v16 = vld [vmem:[%s2568_s1 + $0x38] sm:$0xff] }
  0x10   : > { %438 = vmatpush.msra.mxu0 %v413_v4  ;;  %1632 = vmatpush.msra.mxu3 %v413_v4  ;;  %v1792_v13 = vld [vmem:[%s2568_s1 + $0xc8] sm:$0xff]  ;;  %v1801_v15 = vld [vmem:[%s2568_s1 + $0xc0] sm:$0xff]  ;;  %v1812_v17 = vld [vmem:[%s2568_s1 + $0xb8] sm:$0xff] }
  0x11   : > { %647 = vmatpush.msra.mxu1 %v1756_v5  ;;  %v406_v18 = vld [vmem:[%s2568_s1 + $0x30] sm:$0xff]  ;;  %v405_v20 = vld [vmem:[%s2568_s1 + $0x28] sm:$0xff]  ;;  %v404_v22 = vld [vmem:[%s2568_s1 + $0x20] sm:$0xff] }
  0x12   : > { %439 = vmatpush.msra.mxu0 %v412_v6  ;;  %1633 = vmatpush.msra.mxu3 %v412_v6  ;;  %v1821_v19 = vld [vmem:[%s2568_s1 + $0xb0] sm:$0xff]  ;;  %v1830_v21 = vld [vmem:[%s2568_s1 + $0xa8] sm:$0xff]  ;;  %v1841_v23 = vld [vmem:[%s2568_s1 + $0xa0] sm:$0xff] }
  0x13   : > { %648 = vmatpush.msra.mxu1 %v1765_v7  ;;  %v403_v24 = vld [vmem:[%s2568_s1 + $0x18] sm:$0xff]  ;;  %v402_v26 = vld [vmem:[%s2568_s1 + $0x10] sm:$0xff]  ;;  %v401_v28 = vld [vmem:[%s2568_s1 + $0x8] sm:$0xff] }
  0x14   : > { %440 = vmatpush.msra.mxu0 %v411_v8  ;;  %1634 = vmatpush.msra.mxu3 %v411_v8  ;;  %v419_v25 = vld [vmem:[%s2568_s1 + $0x98] sm:$0xff]  ;;  %v418_v27 = vld [vmem:[%s2568_s1 + $0x90] sm:$0xff]  ;;  %v417_v29 = vld [vmem:[%s2568_s1 + $0x88] sm:$0xff] }
  0x15   : > { %649 = vmatpush.msra.mxu1 %v1774_v9  ;;  %v400_v30 = vld [vmem:[%s2568_s1] sm:$0xff]  ;;  %v273_v33 = vld [vmem:[%s1867_s18 + $0x8] sm:$0xff]  ;;  %v274_v35 = vld [vmem:[%s1867_s18 + $0x10] sm:$0xff] }
  0x16   : > { %441 = vmatpush.msra.mxu0 %v410_v10  ;;  %1635 = vmatpush.msra.mxu3 %v410_v10  ;;  %v416_v31 = vld [vmem:[%s2568_s1 + $0x80] sm:$0xff]  ;;  %v275_v36 = vld [vmem:[%s1867_s18 + $0x18] sm:$0xff]  ;;  %v370_v37 = vld [vmem:[%s1867_s18 + $0x310] sm:$0xff] }
  0x17   : > { %650 = vmatpush.msra.mxu1 %v1783_v11  ;;  %v272_v32 = vld [vmem:[%s1867_s18] sm:$0xff]  ;;  %v277_v39 = vld [vmem:[%s1867_s18 + $0x28] sm:$0xff]  ;;  %v278_v41 = vld [vmem:[%s1867_s18 + $0x30] sm:$0xff] }
  0x18   : > { %442 = vmatpush.msra.mxu0 %v409_v12  ;;  %1636 = vmatpush.msra.mxu3 %v409_v12  ;;  %v368_v34 = vld [vmem:[%s1867_s18 + $0x300] sm:$0xff]  ;;  %v279_v42 = vld [vmem:[%s1867_s18 + $0x38] sm:$0xff]  ;;  %v374_v43 = vld [vmem:[%s1867_s18 + $0x330] sm:$0xff] }
  0x19   : > { %651 = vmatpush.msra.mxu1 %v1792_v13  ;;  %v276_v38 = vld [vmem:[%s1867_s18 + $0x20] sm:$0xff]  ;;  %v281_v45 = vld [vmem:[%s1867_s18 + $0x48] sm:$0xff]  ;;  %v282_v47 = vld [vmem:[%s1867_s18 + $0x50] sm:$0xff] }
  0x1a   : > { %443 = vmatpush.msra.mxu0 %v408_v14  ;;  %1637 = vmatpush.msra.mxu3 %v408_v14  ;;  %v372_v40 = vld [vmem:[%s1867_s18 + $0x320] sm:$0xff]  ;;  %v283_v48 = vld [vmem:[%s1867_s18 + $0x58] sm:$0xff]  ;;  %v378_v49 = vld [vmem:[%s1867_s18 + $0x350] sm:$0xff] }
  0x1b   : > { %652 = vmatpush.msra.mxu1 %v1801_v15  ;;  %v280_v44 = vld [vmem:[%s1867_s18 + $0x40] sm:$0xff]  ;;  %v285_v51 = vld [vmem:[%s1867_s18 + $0x68] sm:$0xff]  ;;  %v286_v53 = vld [vmem:[%s1867_s18 + $0x70] sm:$0xff] }
  0x1c   : > { %444 = vmatpush.msra.mxu0 %v407_v16  ;;  %1638 = vmatpush.msra.mxu3 %v407_v16  ;;  %v376_v46 = vld [vmem:[%s1867_s18 + $0x340] sm:$0xff]  ;;  %v287_v54 = vld [vmem:[%s1867_s18 + $0x78] sm:$0xff]  ;;  %v382_v55 = vld [vmem:[%s1867_s18 + $0x370] sm:$0xff] }
  0x1d   : > { %653 = vmatpush.msra.mxu1 %v1812_v17  ;;  %v284_v50 = vld [vmem:[%s1867_s18 + $0x60] sm:$0xff]  ;;  %v289_v57 = vld [vmem:[%s1867_s18 + $0x88] sm:$0xff]  ;;  %v290_v59 = vld [vmem:[%s1867_s18 + $0x90] sm:$0xff] }
  0x1e   : > { %445 = vmatpush.msra.mxu0 %v406_v18  ;;  %1639 = vmatpush.msra.mxu3 %v406_v18  ;;  %v380_v52 = vld [vmem:[%s1867_s18 + $0x360] sm:$0xff]  ;;  %v291_v60 = vld [vmem:[%s1867_s18 + $0x98] sm:$0xff]  ;;  %v386_v61 = vld [vmem:[%s1867_s18 + $0x390] sm:$0xff] }
  0x1f   : > { %654 = vmatpush.msra.mxu1 %v1821_v19  ;;  %v288_v56 = vld [vmem:[%s1867_s18 + $0x80] sm:$0xff]  ;;  %v293_v63 = vld [vmem:[%s1867_s18 + $0xa8] sm:$0xff]  ;;  %v990_v1 = vld [vmem:[%s2570_s3 + $0x38] sm:$0xff] }
  0x20   : > { %446 = vmatpush.msra.mxu0 %v405_v20  ;;  %1640 = vmatpush.msra.mxu3 %v405_v20  ;;  %v384_v58 = vld [vmem:[%s1867_s18 + $0x380] sm:$0xff]  ;;  %v295_v4 = vld [vmem:[%s1867_s18 + $0xb8] sm:$0xff]  ;;  %v988_v6 = vld [vmem:[%s2570_s3 + $0x28] sm:$0xff] }
  0x21   : > { %655 = vmatpush.msra.mxu1 %v1830_v21  ;;  %v292_v62 = vld [vmem:[%s1867_s18 + $0xa0] sm:$0xff]  ;;  %1195 = vmatpush.msra.mxu2 %v990_v1  ;;  %v986_v8 = vld [vmem:[%s2570_s3 + $0x18] sm:$0xff]  ;;  %v297_v10 = vld [vmem:[%s1867_s18 + $0xc8] sm:$0xff] }
  0x22   : > { %447 = vmatpush.msra.mxu0 %v404_v22  ;;  %1641 = vmatpush.msra.mxu3 %v404_v22  ;;  %v388_v0 = vld [vmem:[%s1867_s18 + $0x3a0] sm:$0xff]  ;;  %v299_v16 = vld [vmem:[%s1867_s18 + $0xd8] sm:$0xff] }
  0x23   : > { %656 = vmatpush.msra.mxu1 %v1841_v23  ;;  %v392_v12 = vld [vmem:[%s1867_s18 + $0x3c0] sm:$0xff]  ;;  %v303_v22 = vld [vmem:[%s1867_s18 + $0xf8] sm:$0xff] }
  0x24   : > { %448 = vmatpush.msra.mxu0 %v403_v24  ;;  %1642 = vmatpush.msra.mxu3 %v403_v24  ;;  %v983_v14 = vld [vmem:[%s2570_s3] sm:$0xff] }
  0x25   : > { %657 = vmatpush.msra.mxu1 %v419_v25  ;;  %v300_v18 = vld [vmem:[%s1867_s18 + $0xe0] sm:$0xff] }
  0x26   : > { %449 = vmatpush.msra.mxu0 %v402_v26  ;;  %1643 = vmatpush.msra.mxu3 %v402_v26  ;;  %v396_v20 = vld [vmem:[%s1867_s18 + $0x3e0] sm:$0xff] }
  0x27   : > { %658 = vmatpush.msra.mxu1 %v418_v27  ;;  %v1962_v24 = vld [vmem:[%s2569_s2] ss:$0 sm:$0xff] }
  0x28   : > { %450 = vmatpush.msra.mxu0 %v401_v28  ;;  %1644 = vmatpush.msra.mxu3 %v401_v28  ;;  %v305_v28 = vld [vmem:[%s1867_s18 + $0x108] sm:$0xff] }
  0x29   : > { %659 = vmatpush.msra.mxu1 %v417_v29 }
  0x2a   : > { %451 = vmatpush.msra.mxu0 %v400_v30  ;;  %1645 = vmatpush.msra.mxu3 %v400_v30  ;;  %v369_v30 = vld [vmem:[%s1867_s18 + $0x308] sm:$0xff] }
  0x2b   : > { %660 = vmatpush.msra.mxu1 %v416_v31  ;;  %452 = vmatmul.f32.vlgmr.msra.gmra.mxu0 %v272_v32 }
  0x2c   : > { %661 = vmatmul.f32.vlgmr.msra.gmra.mxu1 %v273_v33  ;;  %596 = vmatmul.f32.vlgmr.msra.gmra.mxu3 %v368_v34 }
  0x2d   : > { %1646 = vmatpush.msrb.mxu3 %v1742_v2  ;;  %v989_v2 = vld [vmem:[%s2570_s3 + $0x30] sm:$0xff] }
  0x2e   : > { %1196 = vmatpush.msra.mxu2 %v989_v2 }
  0x2f   : > { %1647 = vmatpush.msrb.mxu3 %v1748_v3  ;;  %v294_v3 = vld [vmem:[%s1867_s18 + $0xb0] sm:$0xff] }
  0x30   : > { %1197 = vmatpush.msra.mxu2 %v988_v6 }
  0x31   : > { %1648 = vmatpush.msrb.mxu3 %v1756_v5  ;;  %v390_v5 = vld [vmem:[%s1867_s18 + $0x3b0] sm:$0xff] }
  0x33   : > { %455 = vmatmul.f32.gmra.mxu0 %v274_v35  ;;  %1649 = vmatpush.msrb.mxu3 %v1765_v7  ;;  %v987_v7 = vld [vmem:[%s2570_s3 + $0x20] sm:$0xff]  ;;  %v306_v35 = vld [vmem:[%s1867_s18 + $0x110] sm:$0xff] }
  0x34   : > { %664 = vmatmul.f32.gmra.mxu1 %v275_v36  ;;  %599 = vmatmul.f32.gmra.mxu3 %v370_v37  ;;  %v307_v36 = vld [vmem:[%s1867_s18 + $0x118] sm:$0xff] }
  0x35   : > { %1650 = vmatpush.msrb.mxu3 %v1774_v9  ;;  %1198 = vmatpush.msra.mxu2 %v987_v7  ;;  %v296_v9 = vld [vmem:[%s1867_s18 + $0xc0] sm:$0xff] }
  0x37   : > { %1651 = vmatpush.msrb.mxu3 %v1783_v11  ;;  %1199 = vmatpush.msra.mxu2 %v986_v8  ;;  %v985_v11 = vld [vmem:[%s2570_s3 + $0x10] sm:$0xff] }
  0x39   : > { %1652 = vmatpush.msrb.mxu3 %v1792_v13  ;;  %1200 = vmatpush.msra.mxu2 %v985_v11  ;;  %v984_v13 = vld [vmem:[%s2570_s3 + $0x8] sm:$0xff] }
  0x3b   : > { %458 = vmatmul.f32.gmra.mxu0 %v276_v38  ;;  %1653 = vmatpush.msrb.mxu3 %v1801_v15  ;;  %v298_v15 = vld [vmem:[%s1867_s18 + $0xd0] sm:$0xff] }
  0x3c   : > { %667 = vmatmul.f32.gmra.mxu1 %v277_v39  ;;  %602 = vmatmul.f32.gmra.mxu3 %v372_v40  ;;  %v371_v39 = vld [vmem:[%s1867_s18 + $0x318] sm:$0xff] }
  0x3d   : > { %1654 = vmatpush.msrb.mxu3 %v1812_v17  ;;  %1201 = vmatpush.msra.mxu2 %v984_v13  ;;  %v394_v17 = vld [vmem:[%s1867_s18 + $0x3d0] sm:$0xff] }
  0x3f   : > { %1655 = vmatpush.msrb.mxu3 %v1821_v19  ;;  %1202 = vmatpush.msra.mxu2 %v983_v14  ;;  %v301_v19 = vld [vmem:[%s1867_s18 + $0xe8] sm:$0xff] }
  0x41   : > { %1656 = vmatpush.msrb.mxu3 %v1830_v21  ;;  %v302_v21 = vld [vmem:[%s1867_s18 + $0xf0] sm:$0xff] }
  0x43   : > { %461 = vmatmul.f32.gmra.mxu0 %v278_v41  ;;  %1657 = vmatpush.msrb.mxu3 %v1841_v23  ;;  %v398_v23 = vld [vmem:[%s1867_s18 + $0x3f0] sm:$0xff] }
  0x44   : > { %670 = vmatmul.f32.gmra.mxu1 %v279_v42  ;;  %605 = vmatmul.f32.gmra.mxu3 %v374_v43 }
  0x45   : > { %1658 = vmatpush.msrb.mxu3 %v419_v25 }
  0x47   : > { %1659 = vmatpush.msrb.mxu3 %v418_v27  ;;  %v304_v27 = vld [vmem:[%s1867_s18 + $0x100] sm:$0xff] }
  0x49   : > { %1660 = vmatpush.msrb.mxu3 %v417_v29 }
  0x4b   : > { %464 = vmatmul.f32.gmra.mxu0 %v280_v44  ;;  %1661 = vmatpush.msrb.mxu3 %v416_v31  ;;  %v308_v44 = vld [vmem:[%s1867_s18 + $0x120] sm:$0xff] }
  0x4c   : > { %673 = vmatmul.f32.gmra.mxu1 %v281_v45  ;;  %608 = vmatmul.f32.gmra.mxu3 %v376_v46  ;;  %v309_v45 = vld [vmem:[%s1867_s18 + $0x128] sm:$0xff] }
  0x4d   : > { %1662 = vmatpush.msra.mxu3 %v990_v1 }
  0x4f   : > { %1663 = vmatpush.msra.mxu3 %v989_v2  ;;  %v377_v2 = vld [vmem:[%s1867_s18 + $0x348] sm:$0xff] }
  0x51   : > { %1664 = vmatpush.msra.mxu3 %v988_v6 }
  0x53   : > { %467 = vmatmul.f32.gmra.mxu0 %v282_v47  ;;  %1665 = vmatpush.msra.mxu3 %v987_v7  ;;  %v314_v7 = vld [vmem:[%s1867_s18 + $0x150] sm:$0xff] }
  0x54   : > { %676 = vmatmul.f32.gmra.mxu1 %v283_v48  ;;  %611 = vmatmul.f32.gmra.mxu3 %v378_v49  ;;  %v373_v48 = vld [vmem:[%s1867_s18 + $0x328] sm:$0xff] }
  0x55   : > { %1666 = vmatpush.msra.mxu3 %v986_v8  ;;  %v315_v8 = vld [vmem:[%s1867_s18 + $0x158] sm:$0xff] }
  0x57   : > { %1667 = vmatpush.msra.mxu3 %v985_v11  ;;  %v379_v11 = vld [vmem:[%s1867_s18 + $0x358] sm:$0xff] }
  0x59   : > { %1668 = vmatpush.msra.mxu3 %v984_v13 }
  0x5b   : > { %470 = vmatmul.f32.gmra.mxu0 %v284_v50  ;;  %1669 = vmatpush.msra.mxu3 %v983_v14 }
  0x5c   : > { %679 = vmatmul.f32.gmra.mxu1 %v285_v51  ;;  %614 = vmatmul.f32.gmra.mxu3 %v380_v52 }
  0x63   : > { %473 = vmatmul.f32.gmra.mxu0 %v286_v53  ;;  %v310_v53 = vld [vmem:[%s1867_s18 + $0x130] sm:$0xff] }
  0x64   : > { %682 = vmatmul.f32.gmra.mxu1 %v287_v54  ;;  %617 = vmatmul.f32.gmra.mxu3 %v382_v55  ;;  %v311_v54 = vld [vmem:[%s1867_s18 + $0x138] sm:$0xff] }
  0x6b   : > { %476 = vmatmul.f32.gmra.mxu0 %v288_v56 }
  0x6c   : > { %685 = vmatmul.f32.gmra.mxu1 %v289_v57  ;;  %620 = vmatmul.f32.gmra.mxu3 %v384_v58  ;;  %v375_v57 = vld [vmem:[%s1867_s18 + $0x338] sm:$0xff] }
  0x73   : > { %479 = vmatmul.f32.gmra.mxu0 %v290_v59 }
  0x74   : > { %688 = vmatmul.f32.gmra.mxu1 %v291_v60  ;;  %623 = vmatmul.f32.gmra.mxu3 %v386_v61 }
  0x7b   : > { %482 = vmatmul.f32.gmra.mxu0 %v292_v62  ;;  %v312_v62 = vld [vmem:[%s1867_s18 + $0x140] sm:$0xff] }
  0x7c   : > { %691 = vmatmul.f32.gmra.mxu1 %v293_v63  ;;  %626 = vmatmul.f32.gmra.mxu3 %v388_v0  ;;  %v313_v63 = vld [vmem:[%s1867_s18 + $0x148] sm:$0xff] }
  0x83   : > { %485 = vmatmul.f32.gmra.mxu0 %v294_v3 }
  0x84   : > { %694 = vmatmul.f32.gmra.mxu1 %v295_v4  ;;  %629 = vmatmul.f32.gmra.mxu3 %v390_v5 }
  0x8b   : > { %488 = vmatmul.f32.gmra.mxu0 %v296_v9 }
  0x8c   : > { %697 = vmatmul.f32.gmra.mxu1 %v297_v10  ;;  %632 = vmatmul.f32.gmra.mxu3 %v392_v12 }
  0x93   : > { %491 = vmatmul.f32.gmra.mxu0 %v298_v15 }
  0x94   : > { %700 = vmatmul.f32.gmra.mxu1 %v299_v16  ;;  %635 = vmatmul.f32.gmra.mxu3 %v394_v17  ;;  %v316_v16 = vld [vmem:[%s1867_s18 + $0x160] sm:$0xff]  ;;  %v317_v17 = vld [vmem:[%s1867_s18 + $0x168] sm:$0xff] }
  0x9b   : > { %494 = vmatmul.f32.gmra.mxu0 %v300_v18 }
  0x9c   : > { %703 = vmatmul.f32.gmra.mxu1 %v301_v19  ;;  %638 = vmatmul.f32.gmra.mxu3 %v396_v20  ;;  %v381_v20 = vld [vmem:[%s1867_s18 + $0x368] sm:$0xff] }
  0xa3   : > { %497 = vmatmul.f32.gmra.mxu0 %v302_v21 }
  0xa4   : > { %706 = vmatmul.f32.gmra.mxu1 %v303_v22  ;;  %641 = vmatmul.f32.gmra.mxu3 %v398_v23 }
  0xa8   : > { %v453_v25 = vpop.f32.mrf.mxu0 }
  0xa9   : > { %v662_v26 = vpop.f32.mrf.mxu1  ;;  %v454_v29 = vadd.f32 %v1962_v24, %v453_v25 }
  0xab   : > { %v663_v31 = vadd.f32 %v662_v26, %v454_v29  ;;  %500 = vmatmul.f32.gmra.mxu0 %v304_v27  ;;  %v318_v26 = vld [vmem:[%s1867_s18 + $0x170] sm:$0xff]  ;;  %v319_v27 = vld [vmem:[%s1867_s18 + $0x178] sm:$0xff] }
  0xac   : > { %709 = vmatmul.f32.gmra.mxu1 %v305_v28  ;;  %805 = vmatmul.f32.vlgmr.msrb.gmra.mxu3 %v369_v30  ;;  %v383_v30 = vld [vmem:[%s1867_s18 + $0x378] sm:$0xff] }
  0xad   : > { %v854_v32 = vmax.f32 %v663_v31, 0.0 }
  0xaf   : > { %919 = vst.msk [vmem:[%s1974_s25] sm:$0xff] %vm918_vm0, %v854_v32  ;;  %1563 = vmatmul.msk.f32.vlgmr.msra.gmra.mxu2 %vm918_vm0, %v854_v32  ;;  %v1982_v38 = vpop.f32.mrf.mxu3 }
  0xb0   : > { %v456_v33 = vpop.f32.mrf.mxu0 }
  0xb1   : > { %v665_v34 = vpop.f32.mrf.mxu1  ;;  %v457_v37 = vadd.f32 %v1962_v24, %v456_v33 }
  0xb3   : > { %v666_v40 = vadd.f32 %v665_v34, %v457_v37  ;;  %503 = vmatmul.f32.gmra.mxu0 %v306_v35  ;;  %v320_v35 = vld [vmem:[%s1867_s18 + $0x180] sm:$0xff] }
  0xb4   : > { %712 = vmatmul.f32.gmra.mxu1 %v307_v36  ;;  %808 = vmatmul.f32.gmra.mxu3 %v371_v39  ;;  %v321_v36 = vld [vmem:[%s1867_s18 + $0x188] sm:$0xff] }
  0xb5   : > { %v855_v41 = vmax.f32 %v666_v40, 0.0  ;;  %v385_v40 = vld [vmem:[%s1867_s18 + $0x388] sm:$0xff] }
  0xb7   : > { %920 = vst.msk [vmem:[%s1974_s25 + $0x8] sm:$0xff] %vm918_vm0, %v855_v41  ;;  %1564 = vmatmul.msk.f32.gmra.mxu2 %vm918_vm0, %v855_v41  ;;  %v1991_v47 = vpop.f32.mrf.mxu3 }
  0xb8   : > { %v459_v42 = vpop.f32.mrf.mxu0 }
  0xb9   : > { %v668_v43 = vpop.f32.mrf.mxu1  ;;  %v460_v46 = vadd.f32 %v1962_v24, %v459_v42 }
  0xbb   : > { %v669_v49 = vadd.f32 %v668_v43, %v460_v46  ;;  %506 = vmatmul.f32.gmra.mxu0 %v308_v44  ;;  %v323_v46 = vld [vmem:[%s1867_s18 + $0x198] sm:$0xff] }
  0xbc   : > { %715 = vmatmul.f32.gmra.mxu1 %v309_v45  ;;  %811 = vmatmul.f32.gmra.mxu3 %v373_v48  ;;  %v322_v45 = vld [vmem:[%s1867_s18 + $0x190] sm:$0xff] }
  0xbd   : > { %v856_v50 = vmax.f32 %v669_v49, 0.0 }
  0xbf   : > { %921 = vst.msk [vmem:[%s1974_s25 + $0x10] sm:$0xff] %vm918_vm0, %v856_v50  ;;  %1565 = vmatmul.msk.f32.gmra.mxu2 %vm918_vm0, %v856_v50  ;;  %v2000_v56 = vpop.f32.mrf.mxu3  ;;  %v387_v50 = vld [vmem:[%s1867_s18 + $0x398] sm:$0xff] }
  0xc0   : > { %v462_v51 = vpop.f32.mrf.mxu0 }
  0xc1   : > { %v671_v52 = vpop.f32.mrf.mxu1  ;;  %v463_v55 = vadd.f32 %v1962_v24, %v462_v51 }
  0xc3   : > { %v672_v58 = vadd.f32 %v671_v52, %v463_v55  ;;  %509 = vmatmul.f32.gmra.mxu0 %v310_v53  ;;  %v324_v55 = vld [vmem:[%s1867_s18 + $0x1a0] sm:$0xff] }
  0xc4   : > { %718 = vmatmul.f32.gmra.mxu1 %v311_v54  ;;  %814 = vmatmul.f32.gmra.mxu3 %v375_v57  ;;  %v325_v57 = vld [vmem:[%s1867_s18 + $0x1a8] sm:$0xff] }
  0xc5   : > { %v857_v59 = vmax.f32 %v672_v58, 0.0 }
  0xc7   : > { %922 = vst.msk [vmem:[%s1974_s25 + $0x18] sm:$0xff] %vm918_vm0, %v857_v59  ;;  %1566 = vmatmul.msk.f32.gmra.mxu2 %vm918_vm0, %v857_v59  ;;  %v2009_v1 = vpop.f32.mrf.mxu3 }
  0xc8   : > { %v465_v60 = vpop.f32.mrf.mxu0 }
  0xc9   : > { %v674_v61 = vpop.f32.mrf.mxu1  ;;  %v466_v0 = vadd.f32 %v1962_v24, %v465_v60  ;;  %v389_v60 = vld [vmem:[%s1867_s18 + $0x3a8] sm:$0xff] }
  0xcb   : > { %v675_v3 = vadd.f32 %v674_v61, %v466_v0  ;;  %512 = vmatmul.f32.gmra.mxu0 %v312_v62 }
  0xcc   : > { %721 = vmatmul.f32.gmra.mxu1 %v313_v63  ;;  %817 = vmatmul.f32.gmra.mxu3 %v377_v2  ;;  %v326_v2 = vld [vmem:[%s1867_s18 + $0x1b0] sm:$0xff] }
  0xcd   : > { %v858_v4 = vmax.f32 %v675_v3, 0.0  ;;  %v327_v3 = vld [vmem:[%s1867_s18 + $0x1b8] sm:$0xff] }
  0xcf   : > { %923 = vst.msk [vmem:[%s1974_s25 + $0x20] sm:$0xff] %vm918_vm0, %v858_v4  ;;  %1567 = vmatmul.msk.f32.gmra.mxu2 %vm918_vm0, %v858_v4  ;;  %v2018_v10 = vpop.f32.mrf.mxu3 }
  0xd0   : > { %v468_v5 = vpop.f32.mrf.mxu0 }
  0xd1   : > { %v677_v6 = vpop.f32.mrf.mxu1  ;;  %v469_v9 = vadd.f32 %v1962_v24, %v468_v5 }
  0xd3   : > { %v678_v12 = vadd.f32 %v677_v6, %v469_v9  ;;  %515 = vmatmul.f32.gmra.mxu0 %v314_v7  ;;  %v391_v6 = vld [vmem:[%s1867_s18 + $0x3b8] sm:$0xff] }
  0xd4   : > { %724 = vmatmul.f32.gmra.mxu1 %v315_v8  ;;  %820 = vmatmul.f32.gmra.mxu3 %v379_v11 }
  0xd5   : > { %v859_v13 = vmax.f32 %v678_v12, 0.0  ;;  %v328_v12 = vld [vmem:[%s1867_s18 + $0x1c0] sm:$0xff] }
  0xd7   : > { %924 = vst.msk [vmem:[%s1974_s25 + $0x28] sm:$0xff] %vm918_vm0, %v859_v13  ;;  %1568 = vmatmul.msk.f32.gmra.mxu2 %vm918_vm0, %v859_v13  ;;  %v2027_v19 = vpop.f32.mrf.mxu3  ;;  %v329_v13 = vld [vmem:[%s1867_s18 + $0x1c8] sm:$0xff] }
  0xd8   : > { %v471_v14 = vpop.f32.mrf.mxu0 }
  0xd9   : > { %v680_v15 = vpop.f32.mrf.mxu1  ;;  %v472_v18 = vadd.f32 %v1962_v24, %v471_v14 }
  0xdb   : > { %v681_v21 = vadd.f32 %v680_v15, %v472_v18  ;;  %518 = vmatmul.f32.gmra.mxu0 %v316_v16  ;;  %v393_v16 = vld [vmem:[%s1867_s18 + $0x3c8] sm:$0xff] }
  0xdc   : > { %727 = vmatmul.f32.gmra.mxu1 %v317_v17  ;;  %823 = vmatmul.f32.gmra.mxu3 %v381_v20 }
  0xdd   : > { %v860_v22 = vmax.f32 %v681_v21, 0.0 }
  0xdf   : > { %925 = vst.msk [vmem:[%s1974_s25 + $0x30] sm:$0xff] %vm918_vm0, %v860_v22  ;;  %1569 = vmatmul.msk.f32.gmra.mxu2 %vm918_vm0, %v860_v22  ;;  %v2036_v29 = vpop.f32.mrf.mxu3  ;;  %v330_v22 = vld [vmem:[%s1867_s18 + $0x1d0] sm:$0xff] }
  0xe0   : > { %v474_v23 = vpop.f32.mrf.mxu0 }
  0xe1   : > { %v683_v25 = vpop.f32.mrf.mxu1  ;;  %v475_v28 = vadd.f32 %v1962_v24, %v474_v23  ;;  %v331_v23 = vld [vmem:[%s1867_s18 + $0x1d8] sm:$0xff] }
  0xe3   : > { %v684_v31 = vadd.f32 %v683_v25, %v475_v28  ;;  %521 = vmatmul.f32.gmra.mxu0 %v318_v26 }
  0xe4   : > { %730 = vmatmul.f32.gmra.mxu1 %v319_v27  ;;  %826 = vmatmul.f32.gmra.mxu3 %v383_v30  ;;  %v395_v27 = vld [vmem:[%s1867_s18 + $0x3d8] sm:$0xff] }
  0xe5   : > { %v861_v32 = vmax.f32 %v684_v31, 0.0 }
  0xe7   : > { %926 = vst.msk [vmem:[%s1974_s25 + $0x38] sm:$0xff] %vm918_vm0, %v861_v32  ;;  %1570 = vmatmul.msk.f32.gmra.mxu2 %vm918_vm0, %v861_v32  ;;  %v2045_v39 = vpop.f32.mrf.mxu3 }
  0xe8   : > { %v477_v33 = vpop.f32.mrf.mxu0 }
  0xe9   : > { %v686_v34 = vpop.f32.mrf.mxu1  ;;  %v478_v37 = vadd.f32 %v1962_v24, %v477_v33  ;;  %v332_v33 = vld [vmem:[%s1867_s18 + $0x1e0] sm:$0xff] }
  0xeb   : > { %v687_v41 = vadd.f32 %v686_v34, %v478_v37  ;;  %524 = vmatmul.f32.gmra.mxu0 %v320_v35  ;;  %v333_v34 = vld [vmem:[%s1867_s18 + $0x1e8] sm:$0xff] }
  0xec   : > { %733 = vmatmul.f32.gmra.mxu1 %v321_v36  ;;  %829 = vmatmul.f32.gmra.mxu3 %v385_v40  ;;  %v397_v37 = vld [vmem:[%s1867_s18 + $0x3e8] sm:$0xff] }
  0xed   : > { %v862_v42 = vmax.f32 %v687_v41, 0.0 }
  0xef   : > { %927 = vst.msk [vmem:[%s1974_s25 + $0x40] sm:$0xff] %vm918_vm0, %v862_v42  ;;  %1571 = vmatmul.msk.f32.gmra.mxu2 %vm918_vm0, %v862_v42  ;;  %v2054_v49 = vpop.f32.mrf.mxu3 }
  0xf0   : > { %v480_v43 = vpop.f32.mrf.mxu0 }
  0xf1   : > { %v689_v44 = vpop.f32.mrf.mxu1  ;;  %v481_v48 = vadd.f32 %v1962_v24, %v480_v43 }
  0xf3   : > { %v690_v51 = vadd.f32 %v689_v44, %v481_v48  ;;  %527 = vmatmul.f32.gmra.mxu0 %v322_v45  ;;  %v334_v44 = vld [vmem:[%s1867_s18 + $0x1f0] sm:$0xff]  ;;  %v335_v45 = vld [vmem:[%s1867_s18 + $0x1f8] sm:$0xff] }
  0xf4   : > { %736 = vmatmul.f32.gmra.mxu1 %v323_v46  ;;  %832 = vmatmul.f32.gmra.mxu3 %v387_v50  ;;  %v399_v50 = vld [vmem:[%s1867_s18 + $0x3f8] sm:$0xff] }
  0xf5   : > { %v863_v52 = vmax.f32 %v690_v51, 0.0 }
  0xf7   : > { %928 = vst.msk [vmem:[%s1974_s25 + $0x48] sm:$0xff] %vm918_vm0, %v863_v52  ;;  %1572 = vmatmul.msk.f32.gmra.mxu2 %vm918_vm0, %v863_v52  ;;  %v2063_v59 = vpop.f32.mrf.mxu3 }
  0xf8   : > { %v483_v53 = vpop.f32.mrf.mxu0 }
  0xf9   : > { %v692_v54 = vpop.f32.mrf.mxu1  ;;  %v484_v58 = vadd.f32 %v1962_v24, %v483_v53 }
  0xfb   : > { %v693_v61 = vadd.f32 %v692_v54, %v484_v58  ;;  %530 = vmatmul.f32.gmra.mxu0 %v324_v55  ;;  %v336_v55 = vld [vmem:[%s1867_s18 + $0x200] sm:$0xff] }
  0xfc   : > { %739 = vmatmul.f32.gmra.mxu1 %v325_v57  ;;  %835 = vmatmul.f32.gmra.mxu3 %v389_v60  ;;  %v337_v57 = vld [vmem:[%s1867_s18 + $0x208] sm:$0xff] }
  0xfd   : > { %v864_v62 = vmax.f32 %v693_v61, 0.0 }
  0xff   : > { %929 = vst.msk [vmem:[%s1974_s25 + $0x50] sm:$0xff] %vm918_vm0, %v864_v62  ;;  %1573 = vmatmul.msk.f32.gmra.mxu2 %vm918_vm0, %v864_v62  ;;  %v2072_v5 = vpop.f32.mrf.mxu3 }
 0x100   : > { %v486_v63 = vpop.f32.mrf.mxu0 }
 0x101   : > { %v695_v0 = vpop.f32.mrf.mxu1  ;;  %v487_v4 = vadd.f32 %v1962_v24, %v486_v63  ;;  %v598_v63 = vadd.f32 %v1962_v24, %v1982_v38 }
 0x103   : > { %v696_v7 = vadd.f32 %v695_v0, %v487_v4  ;;  %533 = vmatmul.f32.gmra.mxu0 %v326_v2  ;;  %v2127_v0 = vld [vmem:[%s2571_s4] ss:$0 sm:$0xff]  ;;  %v338_v4 = vld [vmem:[%s1867_s18 + $0x210] sm:$0xff] }
 0x104   : > { %742 = vmatmul.f32.gmra.mxu1 %v327_v3  ;;  %838 = vmatmul.f32.gmra.mxu3 %v391_v6  ;;  %v339_v6 = vld [vmem:[%s1867_s18 + $0x218] sm:$0xff] }
 0x105   : > { %v865_v8 = vmax.f32 %v696_v7, 0.0 }
 0x107   : > { %930 = vst.msk [vmem:[%s1974_s25 + $0x58] sm:$0xff] %vm918_vm0, %v865_v8  ;;  %1574 = vmatmul.msk.f32.gmra.mxu2 %vm918_vm0, %v865_v8  ;;  %v2081_v15 = vpop.f32.mrf.mxu3 }
 0x108   : > { %v489_v9 = vpop.f32.mrf.mxu0 }
 0x109   : > { %v698_v11 = vpop.f32.mrf.mxu1  ;;  %v490_v14 = vadd.f32 %v1962_v24, %v489_v9 }
 0x10b   : > { %v699_v17 = vadd.f32 %v698_v11, %v490_v14  ;;  %536 = vmatmul.f32.gmra.mxu0 %v328_v12 }
 0x10c   : > { %745 = vmatmul.f32.gmra.mxu1 %v329_v13  ;;  %841 = vmatmul.f32.gmra.mxu3 %v393_v16  ;;  %v601_v16 = vadd.f32 %v1962_v24, %v1991_v47 }
 0x10d   : > { %v866_v18 = vmax.f32 %v699_v17, 0.0 }
 0x10f   : > { %931 = vst.msk [vmem:[%s1974_s25 + $0x60] sm:$0xff] %vm918_vm0, %v866_v18  ;;  %1575 = vmatmul.msk.f32.gmra.mxu2 %vm918_vm0, %v866_v18  ;;  %v2090_v26 = vpop.f32.mrf.mxu3 }
 0x110   : > { %v492_v20 = vpop.f32.mrf.mxu0 }
 0x111   : > { %v701_v21 = vpop.f32.mrf.mxu1  ;;  %v493_v25 = vadd.f32 %v1962_v24, %v492_v20  ;;  %v340_v20 = vld [vmem:[%s1867_s18 + $0x220] sm:$0xff] }
 0x113   : > { %v702_v28 = vadd.f32 %v701_v21, %v493_v25  ;;  %539 = vmatmul.f32.gmra.mxu0 %v330_v22  ;;  %v341_v21 = vld [vmem:[%s1867_s18 + $0x228] sm:$0xff] }
 0x114   : > { %748 = vmatmul.f32.gmra.mxu1 %v331_v23  ;;  %844 = vmatmul.f32.gmra.mxu3 %v395_v27 }
 0x115   : > { %v867_v30 = vmax.f32 %v702_v28, 0.0 }
 0x117   : > { %932 = vst.msk [vmem:[%s1974_s25 + $0x68] sm:$0xff] %vm918_vm0, %v867_v30  ;;  %1576 = vmatmul.msk.f32.gmra.mxu2 %vm918_vm0, %v867_v30  ;;  %v2099_v36 = vpop.f32.mrf.mxu3 }
 0x118   : > { %v495_v31 = vpop.f32.mrf.mxu0 }
 0x119   : > { %v704_v32 = vpop.f32.mrf.mxu1  ;;  %v496_v35 = vadd.f32 %v1962_v24, %v495_v31 }
 0x11b   : > { %v705_v40 = vadd.f32 %v704_v32, %v496_v35  ;;  %542 = vmatmul.f32.gmra.mxu0 %v332_v33  ;;  %v604_v32 = vadd.f32 %v1962_v24, %v2000_v56  ;;  %v342_v35 = vld [vmem:[%s1867_s18 + $0x230] sm:$0xff] }
 0x11c   : > { %751 = vmatmul.f32.gmra.mxu1 %v333_v34  ;;  %847 = vmatmul.f32.gmra.mxu3 %v397_v37  ;;  %v343_v37 = vld [vmem:[%s1867_s18 + $0x238] sm:$0xff] }
 0x11d   : > { %v868_v41 = vmax.f32 %v705_v40, 0.0 }
 0x11f   : > { %933 = vst.msk [vmem:[%s1974_s25 + $0x70] sm:$0xff] %vm918_vm0, %v868_v41  ;;  %1577 = vmatmul.msk.f32.gmra.mxu2 %vm918_vm0, %v868_v41  ;;  %v2108_v48 = vpop.f32.mrf.mxu3 }
 0x120   : > { %v498_v42 = vpop.f32.mrf.mxu0 }
 0x121   : > { %v707_v43 = vpop.f32.mrf.mxu1  ;;  %v499_v46 = vadd.f32 %v1962_v24, %v498_v42 }
 0x123   : > { %v708_v51 = vadd.f32 %v707_v43, %v499_v46  ;;  %545 = vmatmul.f32.gmra.mxu0 %v334_v44 }
 0x124   : > { %754 = vmatmul.f32.gmra.mxu1 %v335_v45  ;;  %850 = vmatmul.f32.gmra.mxu3 %v399_v50  ;;  %v607_v50 = vadd.f32 %v1962_v24, %v2009_v1 }
 0x125   : > { %v869_v52 = vmax.f32 %v708_v51, 0.0 }
 0x127   : > { %934 = vst.msk [vmem:[%s1974_s25 + $0x78] sm:$0xff] %vm918_vm0, %v869_v52  ;;  %1578 = vmatmul.msk.f32.gmra.mxu2 %vm918_vm0, %v869_v52  ;;  %v2117_v60 = vpop.f32.mrf.mxu3 }
 0x128   : > { %v501_v53 = vpop.f32.mrf.mxu0 }
 0x129   : > { %v710_v54 = vpop.f32.mrf.mxu1  ;;  %v502_v58 = vadd.f32 %v1962_v24, %v501_v53  ;;  %v344_v53 = vld [vmem:[%s1867_s18 + $0x240] sm:$0xff] }
 0x12b   : > { %v711_v61 = vadd.f32 %v710_v54, %v502_v58  ;;  %548 = vmatmul.f32.gmra.mxu0 %v336_v55  ;;  %v345_v54 = vld [vmem:[%s1867_s18 + $0x248] sm:$0xff] }
 0x12c   : > { %757 = vmatmul.f32.gmra.mxu1 %v337_v57 }
 0x12d   : > { %v870_v62 = vmax.f32 %v711_v61, 0.0 }
 0x12f   : > { %935 = vst.msk [vmem:[%s1974_s25 + $0x80] sm:$0xff] %vm918_vm0, %v870_v62  ;;  %1579 = vmatmul.msk.f32.gmra.mxu2 %vm918_vm0, %v870_v62  ;;  %v806_v8 = vpop.f32.mrf.mxu3 }
 0x130   : > { %v504_v2 = vpop.f32.mrf.mxu0  ;;  %v2139_v9 = vadd.f32 %v806_v8, %v598_v63  ;;  %v347_v8 = vld [vmem:[%s1867_s18 + $0x258] sm:$0xff] }
 0x131   : > { %v713_v3 = vpop.f32.mrf.mxu1  ;;  %v505_v7 = vadd.f32 %v1962_v24, %v504_v2 }
 0x132   : > { %v1204_v38 = vpop.f32.mrf.mxu2  ;;  %v902_v13 = vmax.f32 %v2139_v9, 0.0 }
 0x133   : > { %v714_v11 = vadd.f32 %v713_v3, %v505_v7  ;;  %v1205_v12 = vadd.f32 %v2127_v0, %v1204_v38  ;;  %551 = vmatmul.f32.gmra.mxu0 %v338_v4  ;;  %v610_v3 = vadd.f32 %v1962_v24, %v2018_v10  ;;  %v346_v7 = vld [vmem:[%s1867_s18 + $0x250] sm:$0xff] }
 0x134   : > { %760 = vmatmul.f32.gmra.mxu1 %v339_v6  ;;  %967 = vst.msk [vmem:[%s1974_s25 + $0x180] sm:$0xff] %vm918_vm0, %v902_v13 }
 0x135   : > { %v871_v14 = vmax.f32 %v714_v11, 0.0  ;;  %1397 = vst.msk [vmem:[%s2137_s30] sm:$0xff] %vm1396_vm1, %v1205_v12 }
 0x137   : > { %936 = vst.msk [vmem:[%s1974_s25 + $0x88] sm:$0xff] %vm918_vm0, %v871_v14  ;;  %1580 = vmatmul.msk.f32.gmra.mxu2 %vm918_vm0, %v871_v14  ;;  %v809_v23 = vpop.f32.mrf.mxu3 }
 0x138   : > { %v507_v17 = vpop.f32.mrf.mxu0  ;;  %v2157_v25 = vadd.f32 %v809_v23, %v601_v16  ;;  %v348_v23 = vld [vmem:[%s1867_s18 + $0x260] sm:$0xff] }
 0x139   : > { %v716_v18 = vpop.f32.mrf.mxu1  ;;  %v508_v22 = vadd.f32 %v1962_v24, %v507_v17 }
 0x13a   : > { %v1207_v47 = vpop.f32.mrf.mxu2  ;;  %v903_v30 = vmax.f32 %v2157_v25, 0.0 }
 0x13b   : > { %v717_v27 = vadd.f32 %v716_v18, %v508_v22  ;;  %v1208_v28 = vadd.f32 %v2127_v0, %v1207_v47  ;;  %554 = vmatmul.f32.gmra.mxu0 %v340_v20  ;;  %v613_v20 = vadd.f32 %v1962_v24, %v2027_v19  ;;  %v349_v47 = vld [vmem:[%s1867_s18 + $0x268] sm:$0xff] }
 0x13c   : > { %763 = vmatmul.f32.gmra.mxu1 %v341_v21  ;;  %968 = vst.msk [vmem:[%s1974_s25 + $0x188] sm:$0xff] %vm918_vm0, %v903_v30 }
 0x13d   : > { %v872_v31 = vmax.f32 %v717_v27, 0.0  ;;  %1398 = vst.msk [vmem:[%s2137_s30 + $0x8] sm:$0xff] %vm1396_vm1, %v1208_v28 }
 0x13f   : > { %937 = vst.msk [vmem:[%s1974_s25 + $0x90] sm:$0xff] %vm918_vm0, %v872_v31  ;;  %1581 = vmatmul.msk.f32.gmra.mxu2 %vm918_vm0, %v872_v31  ;;  %v812_v41 = vpop.f32.mrf.mxu3 }
 0x140   : > { %v510_v33 = vpop.f32.mrf.mxu0  ;;  %v813_v56 = vadd.f32 %v812_v41, %v604_v32 }
 0x141   : > { %v719_v34 = vpop.f32.mrf.mxu1  ;;  %v511_v40 = vadd.f32 %v1962_v24, %v510_v33 }
 0x142   : > { %v1210_v42 = vpop.f32.mrf.mxu2  ;;  %v904_v45 = vmax.f32 %v813_v56, 0.0  ;;  %v351_v56 = vld [vmem:[%s1867_s18 + $0x278] sm:$0xff] }
 0x143   : > { %v720_v43 = vadd.f32 %v719_v34, %v511_v40  ;;  %v1211_v44 = vadd.f32 %v2127_v0, %v1210_v42  ;;  %557 = vmatmul.f32.gmra.mxu0 %v342_v35  ;;  %v350_v42 = vld [vmem:[%s1867_s18 + $0x270] sm:$0xff] }
 0x144   : > { %766 = vmatmul.f32.gmra.mxu1 %v343_v37  ;;  %969 = vst.msk [vmem:[%s1974_s25 + $0x190] sm:$0xff] %vm918_vm0, %v904_v45  ;;  %1613 = vmatmul.msk.f32.vlgmr.msra.gmra.mxu3 %vm918_vm0, %v904_v45  ;;  %v616_v37 = vadd.f32 %v1962_v24, %v2036_v29 }
 0x145   : > { %v873_v46 = vmax.f32 %v720_v43, 0.0  ;;  %1399 = vst.msk [vmem:[%s2137_s30 + $0x10] sm:$0xff] %vm1396_vm1, %v1211_v44 }
 0x147   : > { %938 = vst.msk [vmem:[%s1974_s25 + $0x98] sm:$0xff] %vm918_vm0, %v873_v46  ;;  %1582 = vmatmul.msk.f32.gmra.mxu2 %vm918_vm0, %v873_v46  ;;  %v815_v57 = vpop.f32.mrf.mxu3 }
 0x148   : > { %v513_v51 = vpop.f32.mrf.mxu0  ;;  %v816_v1 = vadd.f32 %v815_v57, %v607_v50  ;;  %v352_v57 = vld [vmem:[%s1867_s18 + $0x280] sm:$0xff] }
 0x149   : > { %v722_v52 = vpop.f32.mrf.mxu1  ;;  %v514_v55 = vadd.f32 %v1962_v24, %v513_v51 }
 0x14a   : > { %v1213_v58 = vpop.f32.mrf.mxu2  ;;  %v905_v63 = vmax.f32 %v816_v1, 0.0 }
 0x14b   : > { %v723_v61 = vadd.f32 %v722_v52, %v514_v55  ;;  %v1214_v62 = vadd.f32 %v2127_v0, %v1213_v58  ;;  %560 = vmatmul.f32.gmra.mxu0 %v344_v53  ;;  %v619_v53 = vadd.f32 %v1962_v24, %v2045_v39  ;;  %v353_v58 = vld [vmem:[%s1867_s18 + $0x288] sm:$0xff] }
 0x14c   : > { %769 = vmatmul.f32.gmra.mxu1 %v345_v54  ;;  %970 = vst.msk [vmem:[%s1974_s25 + $0x198] sm:$0xff] %vm918_vm0, %v905_v63  ;;  %1614 = vmatmul.msk.f32.gmra.mxu3 %vm918_vm0, %v905_v63 }
 0x14d   : > { %v874_v2 = vmax.f32 %v723_v61, 0.0  ;;  %1400 = vst.msk [vmem:[%s2137_s30 + $0x18] sm:$0xff] %vm1396_vm1, %v1214_v62 }
 0x14f   : > { %939 = vst.msk [vmem:[%s1974_s25 + $0xa0] sm:$0xff] %vm918_vm0, %v874_v2  ;;  %1583 = vmatmul.msk.f32.gmra.mxu2 %vm918_vm0, %v874_v2  ;;  %v818_v11 = vpop.f32.mrf.mxu3 }
 0x150   : > { %v516_v4 = vpop.f32.mrf.mxu0  ;;  %v819_v10 = vadd.f32 %v818_v11, %v610_v3  ;;  %v355_v11 = vld [vmem:[%s1867_s18 + $0x298] sm:$0xff] }
 0x151   : > { %v725_v6 = vpop.f32.mrf.mxu1  ;;  %v517_v38 = vadd.f32 %v1962_v24, %v516_v4 }
 0x152   : > { %v1216_v12 = vpop.f32.mrf.mxu2  ;;  %v906_v17 = vmax.f32 %v819_v10, 0.0 }
 0x153   : > { %v726_v14 = vadd.f32 %v725_v6, %v517_v38  ;;  %v1217_v16 = vadd.f32 %v2127_v0, %v1216_v12  ;;  %563 = vmatmul.f32.gmra.mxu0 %v346_v7  ;;  %v622_v6 = vadd.f32 %v1962_v24, %v2054_v49  ;;  %v354_v38 = vld [vmem:[%s1867_s18 + $0x290] sm:$0xff] }
 0x154   : > { %772 = vmatmul.f32.gmra.mxu1 %v347_v8  ;;  %971 = vst.msk [vmem:[%s1974_s25 + $0x1a0] sm:$0xff] %vm918_vm0, %v906_v17  ;;  %1615 = vmatmul.msk.f32.gmra.mxu3 %vm918_vm0, %v906_v17 }
 0x155   : > { %v875_v18 = vmax.f32 %v726_v14, 0.0  ;;  %1401 = vst.msk [vmem:[%s2137_s30 + $0x20] sm:$0xff] %vm1396_vm1, %v1217_v16 }
 0x157   : > { %940 = vst.msk [vmem:[%s1974_s25 + $0xa8] sm:$0xff] %vm918_vm0, %v875_v18  ;;  %1584 = vmatmul.msk.f32.gmra.mxu2 %vm918_vm0, %v875_v18  ;;  %v821_v28 = vpop.f32.mrf.mxu3 }
 0x158   : > { %v519_v21 = vpop.f32.mrf.mxu0  ;;  %v822_v19 = vadd.f32 %v821_v28, %v613_v20 }
 0x159   : > { %v728_v22 = vpop.f32.mrf.mxu1  ;;  %v520_v27 = vadd.f32 %v1962_v24, %v519_v21  ;;  %v625_v21 = vadd.f32 %v1962_v24, %v2063_v59 }
 0x15a   : > { %v1219_v31 = vpop.f32.mrf.mxu2  ;;  %v907_v34 = vmax.f32 %v822_v19, 0.0 }
 0x15b   : > { %v729_v32 = vadd.f32 %v728_v22, %v520_v27  ;;  %v1220_v33 = vadd.f32 %v2127_v0, %v1219_v31  ;;  %566 = vmatmul.f32.gmra.mxu0 %v348_v23  ;;  %v357_v27 = vld [vmem:[%s1867_s18 + $0x2a8] sm:$0xff] }
 0x15c   : > { %775 = vmatmul.f32.gmra.mxu1 %v349_v47  ;;  %972 = vst.msk [vmem:[%s1974_s25 + $0x1a8] sm:$0xff] %vm918_vm0, %v907_v34  ;;  %1616 = vmatmul.msk.f32.gmra.mxu3 %vm918_vm0, %v907_v34  ;;  %v356_v47 = vld [vmem:[%s1867_s18 + $0x2a0] sm:$0xff] }
 0x15d   : > { %v876_v35 = vmax.f32 %v729_v32, 0.0  ;;  %1402 = vst.msk [vmem:[%s2137_s30 + $0x28] sm:$0xff] %vm1396_vm1, %v1220_v33 }
 0x15f   : > { %941 = vst.msk [vmem:[%s1974_s25 + $0xb0] sm:$0xff] %vm918_vm0, %v876_v35  ;;  %1585 = vmatmul.msk.f32.gmra.mxu2 %vm918_vm0, %v876_v35  ;;  %v824_v44 = vpop.f32.mrf.mxu3 }
 0x160   : > { %v522_v40 = vpop.f32.mrf.mxu0  ;;  %v825_v29 = vadd.f32 %v824_v44, %v616_v37  ;;  %v628_v37 = vadd.f32 %v1962_v24, %v2072_v5 }
 0x161   : > { %v731_v41 = vpop.f32.mrf.mxu1  ;;  %v523_v43 = vadd.f32 %v1962_v24, %v522_v40 }
 0x162   : > { %v1222_v45 = vpop.f32.mrf.mxu2  ;;  %v908_v51 = vmax.f32 %v825_v29, 0.0 }
 0x163   : > { %v732_v46 = vadd.f32 %v731_v41, %v523_v43  ;;  %v1223_v50 = vadd.f32 %v2127_v0, %v1222_v45  ;;  %569 = vmatmul.f32.gmra.mxu0 %v350_v42  ;;  %v358_v42 = vld [vmem:[%s1867_s18 + $0x2b0] sm:$0xff] }
 0x164   : > { %778 = vmatmul.f32.gmra.mxu1 %v351_v56  ;;  %973 = vst.msk [vmem:[%s1974_s25 + $0x1b0] sm:$0xff] %vm918_vm0, %v908_v51  ;;  %1617 = vmatmul.msk.f32.gmra.mxu3 %vm918_vm0, %v908_v51  ;;  %v359_v56 = vld [vmem:[%s1867_s18 + $0x2b8] sm:$0xff] }
 0x165   : > { %v877_v52 = vmax.f32 %v732_v46, 0.0  ;;  %1403 = vst.msk [vmem:[%s2137_s30 + $0x30] sm:$0xff] %vm1396_vm1, %v1223_v50 }
 0x167   : > { %942 = vst.msk [vmem:[%s1974_s25 + $0xb8] sm:$0xff] %vm918_vm0, %v877_v52  ;;  %1586 = vmatmul.msk.f32.gmra.mxu2 %vm918_vm0, %v877_v52  ;;  %v827_v61 = vpop.f32.mrf.mxu3  ;;  %v631_v52 = vadd.f32 %v1962_v24, %v2081_v15 }
 0x168   : > { %v525_v54 = vpop.f32.mrf.mxu0  ;;  %v828_v39 = vadd.f32 %v827_v61, %v619_v53 }
 0x169   : > { %v734_v55 = vpop.f32.mrf.mxu1  ;;  %v526_v1 = vadd.f32 %v1962_v24, %v525_v54 }
 0x16a   : > { %v1225_v62 = vpop.f32.mrf.mxu2  ;;  %v909_v3 = vmax.f32 %v828_v39, 0.0 }
 0x16b   : > { %v735_v63 = vadd.f32 %v734_v55, %v526_v1  ;;  %v1226_v2 = vadd.f32 %v2127_v0, %v1225_v62  ;;  %572 = vmatmul.f32.gmra.mxu0 %v352_v57  ;;  %v360_v55 = vld [vmem:[%s1867_s18 + $0x2c0] sm:$0xff]  ;;  %v361_v57 = vld [vmem:[%s1867_s18 + $0x2c8] sm:$0xff] }
 0x16c   : > { %781 = vmatmul.f32.gmra.mxu1 %v353_v58  ;;  %974 = vst.msk [vmem:[%s1974_s25 + $0x1b8] sm:$0xff] %vm918_vm0, %v909_v3  ;;  %1618 = vmatmul.msk.f32.gmra.mxu3 %vm918_vm0, %v909_v3  ;;  %v634_v3 = vadd.f32 %v1962_v24, %v2090_v26 }
 0x16d   : > { %v878_v4 = vmax.f32 %v735_v63, 0.0  ;;  %1404 = vst.msk [vmem:[%s2137_s30 + $0x38] sm:$0xff] %vm1396_vm1, %v1226_v2 }
 0x16f   : > { %943 = vst.msk [vmem:[%s1974_s25 + $0xc0] sm:$0xff] %vm918_vm0, %v878_v4  ;;  %1587 = vmatmul.msk.f32.gmra.mxu2 %vm918_vm0, %v878_v4  ;;  %v830_v10 = vpop.f32.mrf.mxu3 }
 0x170   : > { %v528_v7 = vpop.f32.mrf.mxu0  ;;  %v831_v49 = vadd.f32 %v830_v10, %v622_v6 }
 0x171   : > { %v737_v8 = vpop.f32.mrf.mxu1  ;;  %v529_v12 = vadd.f32 %v1962_v24, %v528_v7  ;;  %v362_v7 = vld [vmem:[%s1867_s18 + $0x2d0] sm:$0xff] }
 0x172   : > { %v1228_v14 = vpop.f32.mrf.mxu2  ;;  %v910_v18 = vmax.f32 %v831_v49, 0.0 }
 0x173   : > { %v738_v16 = vadd.f32 %v737_v8, %v529_v12  ;;  %v1229_v17 = vadd.f32 %v2127_v0, %v1228_v14  ;;  %575 = vmatmul.f32.gmra.mxu0 %v354_v38  ;;  %v363_v8 = vld [vmem:[%s1867_s18 + $0x2d8] sm:$0xff] }
 0x174   : > { %784 = vmatmul.f32.gmra.mxu1 %v355_v11  ;;  %975 = vst.msk [vmem:[%s1974_s25 + $0x1c0] sm:$0xff] %vm918_vm0, %v910_v18  ;;  %1619 = vmatmul.msk.f32.gmra.mxu3 %vm918_vm0, %v910_v18 }
 0x175   : > { %v879_v20 = vmax.f32 %v738_v16, 0.0  ;;  %1405 = vst.msk [vmem:[%s2137_s30 + $0x40] sm:$0xff] %vm1396_vm1, %v1229_v17  ;;  %v637_v17 = vadd.f32 %v1962_v24, %v2099_v36 }
 0x177   : > { %944 = vst.msk [vmem:[%s1974_s25 + $0xc8] sm:$0xff] %vm918_vm0, %v879_v20  ;;  %1588 = vmatmul.msk.f32.gmra.mxu2 %vm918_vm0, %v879_v20  ;;  %v833_v31 = vpop.f32.mrf.mxu3 }
 0x178   : > { %v531_v22 = vpop.f32.mrf.mxu0  ;;  %v834_v59 = vadd.f32 %v833_v31, %v625_v21  ;;  %v364_v21 = vld [vmem:[%s1867_s18 + $0x2e0] sm:$0xff] }
 0x179   : > { %v740_v23 = vpop.f32.mrf.mxu1  ;;  %v532_v28 = vadd.f32 %v1962_v24, %v531_v22  ;;  %v365_v22 = vld [vmem:[%s1867_s18 + $0x2e8] sm:$0xff] }
 0x17a   : > { %v1231_v19 = vpop.f32.mrf.mxu2  ;;  %v911_v34 = vmax.f32 %v834_v59, 0.0 }
 0x17b   : > { %v741_v32 = vadd.f32 %v740_v23, %v532_v28  ;;  %v1232_v33 = vadd.f32 %v2127_v0, %v1231_v19  ;;  %578 = vmatmul.f32.gmra.mxu0 %v356_v47 }
 0x17c   : > { %787 = vmatmul.f32.gmra.mxu1 %v357_v27  ;;  %976 = vst.msk [vmem:[%s1974_s25 + $0x1c8] sm:$0xff] %vm918_vm0, %v911_v34  ;;  %1620 = vmatmul.msk.f32.gmra.mxu3 %vm918_vm0, %v911_v34 }
 0x17d   : > { %v880_v35 = vmax.f32 %v741_v32, 0.0  ;;  %1406 = vst.msk [vmem:[%s2137_s30 + $0x48] sm:$0xff] %vm1396_vm1, %v1232_v33  ;;  %v2335_v32 = vld [vmem:[%s2569_s2] ss:$0 sm:$0xff] }
 0x17f   : > { %945 = vst.msk [vmem:[%s1974_s25 + $0xd0] sm:$0xff] %vm918_vm0, %v880_v35  ;;  %1589 = vmatmul.msk.f32.gmra.mxu2 %vm918_vm0, %v880_v35  ;;  %v836_v44 = vpop.f32.mrf.mxu3  ;;  %v366_v35 = vld [vmem:[%s1867_s18 + $0x2f0] sm:$0xff] }
 0x180   : > { %v534_v40 = vpop.f32.mrf.mxu0  ;;  %v837_v5 = vadd.f32 %v836_v44, %v628_v37  ;;  %v367_v37 = vld [vmem:[%s1867_s18 + $0x2f8] sm:$0xff] }
 0x181   : > { %v743_v41 = vpop.f32.mrf.mxu1  ;;  %v535_v43 = vadd.f32 %v1962_v24, %v534_v40 }
 0x182   : > { %v1234_v45 = vpop.f32.mrf.mxu2  ;;  %v912_v50 = vmax.f32 %v837_v5, 0.0  ;;  %v643_v5 = vadd.f32 %v2335_v32, %v2117_v60 }
 0x183   : > { %v744_v29 = vadd.f32 %v743_v41, %v535_v43  ;;  %v1235_v46 = vadd.f32 %v2127_v0, %v1234_v45  ;;  %581 = vmatmul.f32.gmra.mxu0 %v358_v42 }
 0x184   : > { %790 = vmatmul.f32.gmra.mxu1 %v359_v56  ;;  %977 = vst.msk [vmem:[%s1974_s25 + $0x1d0] sm:$0xff] %vm918_vm0, %v912_v50  ;;  %1621 = vmatmul.msk.f32.gmra.mxu3 %vm918_vm0, %v912_v50 }
 0x185   : > { %v881_v51 = vmax.f32 %v744_v29, 0.0  ;;  %1407 = vst.msk [vmem:[%s2137_s30 + $0x50] sm:$0xff] %vm1396_vm1, %v1235_v46 }
 0x187   : > { %946 = vst.msk [vmem:[%s1974_s25 + $0xd8] sm:$0xff] %vm918_vm0, %v881_v51  ;;  %1590 = vmatmul.msk.f32.gmra.mxu2 %vm918_vm0, %v881_v51  ;;  %v839_v1 = vpop.f32.mrf.mxu3 }
 0x188   : > { %v537_v53 = vpop.f32.mrf.mxu0  ;;  %v840_v15 = vadd.f32 %v839_v1, %v631_v52 }
 0x189   : > { %v746_v54 = vpop.f32.mrf.mxu1  ;;  %v538_v58 = vadd.f32 %v1962_v24, %v537_v53 }
 0x18a   : > { %v1237_v61 = vpop.f32.mrf.mxu2  ;;  %v913_v63 = vmax.f32 %v840_v15, 0.0 }
 0x18b   : > { %v747_v62 = vadd.f32 %v746_v54, %v538_v58  ;;  %v1238_v39 = vadd.f32 %v2127_v0, %v1237_v61  ;;  %584 = vmatmul.f32.gmra.mxu0 %v360_v55 }
 0x18c   : > { %793 = vmatmul.f32.gmra.mxu1 %v361_v57  ;;  %978 = vst.msk [vmem:[%s1974_s25 + $0x1d8] sm:$0xff] %vm918_vm0, %v913_v63  ;;  %1622 = vmatmul.msk.f32.gmra.mxu3 %vm918_vm0, %v913_v63 }
 0x18d   : > { %v882_v2 = vmax.f32 %v747_v62, 0.0  ;;  %1408 = vst.msk [vmem:[%s2137_s30 + $0x58] sm:$0xff] %vm1396_vm1, %v1238_v39 }
 0x18f   : > { %947 = vst.msk [vmem:[%s1974_s25 + $0xe0] sm:$0xff] %vm918_vm0, %v882_v2  ;;  %1591 = vmatmul.msk.f32.gmra.mxu2 %vm918_vm0, %v882_v2  ;;  %v842_v11 = vpop.f32.mrf.mxu3 }
 0x190   : > { %v540_v4 = vpop.f32.mrf.mxu0  ;;  %v843_v26 = vadd.f32 %v842_v11, %v634_v3 }
 0x191   : > { %v749_v6 = vpop.f32.mrf.mxu1  ;;  %v541_v38 = vadd.f32 %v1962_v24, %v540_v4 }
 0x192   : > { %v1240_v12 = vpop.f32.mrf.mxu2  ;;  %v914_v49 = vmax.f32 %v843_v26, 0.0 }
 0x193   : > { %v750_v10 = vadd.f32 %v749_v6, %v541_v38  ;;  %v1241_v14 = vadd.f32 %v2127_v0, %v1240_v12  ;;  %587 = vmatmul.f32.gmra.mxu0 %v362_v7 }
 0x194   : > { %796 = vmatmul.f32.gmra.mxu1 %v363_v8  ;;  %979 = vst.msk [vmem:[%s1974_s25 + $0x1e0] sm:$0xff] %vm918_vm0, %v914_v49  ;;  %1623 = vmatmul.msk.f32.gmra.mxu3 %vm918_vm0, %v914_v49 }
 0x195   : > { %v883_v16 = vmax.f32 %v750_v10, 0.0  ;;  %1409 = vst.msk [vmem:[%s2137_s30 + $0x60] sm:$0xff] %vm1396_vm1, %v1241_v14 }
 0x197   : > { %948 = vst.msk [vmem:[%s1974_s25 + $0xe8] sm:$0xff] %vm918_vm0, %v883_v16  ;;  %1592 = vmatmul.msk.f32.gmra.mxu2 %vm918_vm0, %v883_v16  ;;  %v845_v47 = vpop.f32.mrf.mxu3 }
 0x198   : > { %v543_v18 = vpop.f32.mrf.mxu0  ;;  %v846_v36 = vadd.f32 %v845_v47, %v637_v17 }
 0x199   : > { %v752_v20 = vpop.f32.mrf.mxu1  ;;  %v544_v23 = vadd.f32 %v1962_v24, %v543_v18  ;;  %v640_v24 = vadd.f32 %v2335_v32, %v2108_v48 }
 0x19a   : > { %v1243_v27 = vpop.f32.mrf.mxu2  ;;  %v915_v19 = vmax.f32 %v846_v36, 0.0 }
 0x19b   : > { %v753_v28 = vadd.f32 %v752_v20, %v544_v23  ;;  %v1244_v31 = vadd.f32 %v2127_v0, %v1243_v27  ;;  %590 = vmatmul.f32.gmra.mxu0 %v364_v21 }
 0x19c   : > { %799 = vmatmul.f32.gmra.mxu1 %v365_v22  ;;  %980 = vst.msk [vmem:[%s1974_s25 + $0x1e8] sm:$0xff] %vm918_vm0, %v915_v19  ;;  %1624 = vmatmul.msk.f32.gmra.mxu3 %vm918_vm0, %v915_v19 }
 0x19d   : > { %v884_v59 = vmax.f32 %v753_v28, 0.0  ;;  %1410 = vst.msk [vmem:[%s2137_s30 + $0x68] sm:$0xff] %vm1396_vm1, %v1244_v31 }
 0x19f   : > { %949 = vst.msk [vmem:[%s1974_s25 + $0xf0] sm:$0xff] %vm918_vm0, %v884_v59  ;;  %1593 = vmatmul.msk.f32.gmra.mxu2 %vm918_vm0, %v884_v59  ;;  %v848_v41 = vpop.f32.mrf.mxu3 }
 0x1a0   : > { %v546_v33 = vpop.f32.mrf.mxu0  ;;  %v849_v48 = vadd.f32 %v848_v41, %v640_v24 }
 0x1a1   : > { %v755_v34 = vpop.f32.mrf.mxu1  ;;  %v547_v40 = vadd.f32 %v2335_v32, %v546_v33 }
 0x1a2   : > { %v1246_v42 = vpop.f32.mrf.mxu2  ;;  %v916_v44 = vmax.f32 %v849_v48, 0.0 }
 0x1a3   : > { %v756_v56 = vadd.f32 %v755_v34, %v547_v40  ;;  %v1247_v43 = vadd.f32 %v2127_v0, %v1246_v42  ;;  %593 = vmatmul.f32.gmra.mxu0 %v366_v35 }
 0x1a4   : > { %802 = vmatmul.f32.gmra.mxu1 %v367_v37  ;;  %981 = vst.msk [vmem:[%s1974_s25 + $0x1f0] sm:$0xff] %vm918_vm0, %v916_v44  ;;  %1625 = vmatmul.msk.f32.gmra.mxu3 %vm918_vm0, %v916_v44 }
 0x1a5   : > { %v885_v45 = vmax.f32 %v756_v56, 0.0  ;;  %1411 = vst.msk [vmem:[%s2137_s30 + $0x70] sm:$0xff] %vm1396_vm1, %v1247_v43 }
 0x1a7   : > { %950 = vst.msk [vmem:[%s1974_s25 + $0xf8] sm:$0xff] %vm918_vm0, %v885_v45  ;;  %1594 = vmatmul.msk.f32.gmra.mxu2 %vm918_vm0, %v885_v45  ;;  %v851_v51 = vpop.f32.mrf.mxu3 }
 0x1a8   : > { %v549_v29 = vpop.f32.mrf.mxu0  ;;  %v852_v53 = vadd.f32 %v851_v51, %v643_v5 }
 0x1a9   : > { %v758_v46 = vpop.f32.mrf.mxu1  ;;  %v550_v50 = vadd.f32 %v2335_v32, %v549_v29 }
 0x1aa   : > { %v1249_v52 = vpop.f32.mrf.mxu2  ;;  %v917_v55 = vmax.f32 %v852_v53, 0.0 }
 0x1ab   : > { %v759_v54 = vadd.f32 %v758_v46, %v550_v50  ;;  %v1250_v60 = vadd.f32 %v2127_v0, %v1249_v52 }
 0x1ac   : > { %982 = vst.msk [vmem:[%s1974_s25 + $0x1f8] sm:$0xff] %vm918_vm0, %v917_v55  ;;  %1626 = vmatmul.msk.f32.gmra.mxu3 %vm918_vm0, %v917_v55 }
 0x1ad   : > { %v886_v57 = vmax.f32 %v759_v54, 0.0  ;;  %1412 = vst.msk [vmem:[%s2137_s30 + $0x78] sm:$0xff] %vm1396_vm1, %v1250_v60 }
 0x1af   : > { %951 = vst.msk [vmem:[%s1974_s25 + $0x100] sm:$0xff] %vm918_vm0, %v886_v57  ;;  %1595 = vmatmul.msk.f32.gmra.mxu2 %vm918_vm0, %v886_v57 }
 0x1b0   : > { %v552_v58 = vpop.f32.mrf.mxu0 }
 0x1b1   : > { %v761_v1 = vpop.f32.mrf.mxu1  ;;  %v553_v61 = vadd.f32 %v2335_v32, %v552_v58 }
 0x1b2   : > { %v1252_v15 = vpop.f32.mrf.mxu2 }
 0x1b3   : > { %v762_v62 = vadd.f32 %v761_v1, %v553_v61  ;;  %v1253_v39 = vadd.f32 %v2127_v0, %v1252_v15 }
 0x1b5   : > { %v887_v63 = vmax.f32 %v762_v62, 0.0  ;;  %1413 = vst.msk [vmem:[%s2137_s30 + $0x80] sm:$0xff] %vm1396_vm1, %v1253_v39 }
 0x1b7   : > { %952 = vst.msk [vmem:[%s1974_s25 + $0x108] sm:$0xff] %vm918_vm0, %v887_v63  ;;  %1596 = vmatmul.msk.f32.gmra.mxu2 %vm918_vm0, %v887_v63 }
 0x1b8   : > { %v555_v2 = vpop.f32.mrf.mxu0 }
 0x1b9   : > { %v764_v3 = vpop.f32.mrf.mxu1  ;;  %v556_v4 = vadd.f32 %v2335_v32, %v555_v2 }
 0x1ba   : > { %v1255_v6 = vpop.f32.mrf.mxu2 }
 0x1bb   : > { %v765_v7 = vadd.f32 %v764_v3, %v556_v4  ;;  %v1256_v8 = vadd.f32 %v2127_v0, %v1255_v6 }
 0x1bd   : > { %v888_v38 = vmax.f32 %v765_v7, 0.0  ;;  %1414 = vst.msk [vmem:[%s2137_s30 + $0x88] sm:$0xff] %vm1396_vm1, %v1256_v8 }
 0x1bf   : > { %953 = vst.msk [vmem:[%s1974_s25 + $0x110] sm:$0xff] %vm918_vm0, %v888_v38  ;;  %1597 = vmatmul.msk.f32.gmra.mxu2 %vm918_vm0, %v888_v38 }
 0x1c0   : > { %v558_v11 = vpop.f32.mrf.mxu0 }
 0x1c1   : > { %v767_v12 = vpop.f32.mrf.mxu1  ;;  %v559_v26 = vadd.f32 %v2335_v32, %v558_v11 }
 0x1c2   : > { %v1258_v10 = vpop.f32.mrf.mxu2 }
 0x1c3   : > { %v768_v14 = vadd.f32 %v767_v12, %v559_v26  ;;  %v1259_v49 = vadd.f32 %v2127_v0, %v1258_v10 }
 0x1c5   : > { %v889_v16 = vmax.f32 %v768_v14, 0.0  ;;  %1415 = vst.msk [vmem:[%s2137_s30 + $0x90] sm:$0xff] %vm1396_vm1, %v1259_v49 }
 0x1c7   : > { %954 = vst.msk [vmem:[%s1974_s25 + $0x118] sm:$0xff] %vm918_vm0, %v889_v16  ;;  %1598 = vmatmul.msk.f32.gmra.mxu2 %vm918_vm0, %v889_v16  ;;  %v1354_v21 = vpop.f32.mrf.mxu3 }
 0x1c8   : > { %v561_v17 = vpop.f32.mrf.mxu0  ;;  %v1355_v23 = vadd.f32 %v2127_v0, %v1354_v21 }
 0x1c9   : > { %v770_v18 = vpop.f32.mrf.mxu1  ;;  %v562_v20 = vadd.f32 %v2335_v32, %v561_v17 }
 0x1ca   : > { %v1261_v22 = vpop.f32.mrf.mxu2  ;;  %1447 = vst.msk [vmem:[%s2137_s30 + $0x190] sm:$0xff] %vm1396_vm1, %v1355_v23 }
 0x1cb   : > { %v771_v47 = vadd.f32 %v770_v18, %v562_v20  ;;  %v1262_v27 = vadd.f32 %v2127_v0, %v1261_v22 }
 0x1cd   : > { %v890_v36 = vmax.f32 %v771_v47, 0.0  ;;  %1416 = vst.msk [vmem:[%s2137_s30 + $0x98] sm:$0xff] %vm1396_vm1, %v1262_v27 }
 0x1cf   : > { %955 = vst.msk [vmem:[%s1974_s25 + $0x120] sm:$0xff] %vm918_vm0, %v890_v36  ;;  %1599 = vmatmul.msk.f32.gmra.mxu2 %vm918_vm0, %v890_v36  ;;  %v1357_v59 = vpop.f32.mrf.mxu3 }
 0x1d0   : > { %v564_v28 = vpop.f32.mrf.mxu0  ;;  %v1358_v33 = vadd.f32 %v2127_v0, %v1357_v59 }
 0x1d1   : > { %v773_v31 = vpop.f32.mrf.mxu1  ;;  %v565_v19 = vadd.f32 %v2335_v32, %v564_v28 }
 0x1d2   : > { %v1264_v24 = vpop.f32.mrf.mxu2  ;;  %1448 = vst.msk [vmem:[%s2137_s30 + $0x198] sm:$0xff] %vm1396_vm1, %v1358_v33 }
 0x1d3   : > { %v774_v34 = vadd.f32 %v773_v31, %v565_v19  ;;  %v1265_v35 = vadd.f32 %v2127_v0, %v1264_v24 }
 0x1d5   : > { %v891_v37 = vmax.f32 %v774_v34, 0.0  ;;  %1417 = vst.msk [vmem:[%s2137_s30 + $0xa0] sm:$0xff] %vm1396_vm1, %v1265_v35 }
 0x1d7   : > { %956 = vst.msk [vmem:[%s1974_s25 + $0x128] sm:$0xff] %vm918_vm0, %v891_v37  ;;  %1600 = vmatmul.msk.f32.gmra.mxu2 %vm918_vm0, %v891_v37  ;;  %v1360_v48 = vpop.f32.mrf.mxu3 }
 0x1d8   : > { %v567_v40 = vpop.f32.mrf.mxu0  ;;  %v1361_v43 = vadd.f32 %v2127_v0, %v1360_v48 }
 0x1d9   : > { %v776_v41 = vpop.f32.mrf.mxu1  ;;  %v568_v42 = vadd.f32 %v2335_v32, %v567_v40 }
 0x1da   : > { %v1267_v56 = vpop.f32.mrf.mxu2  ;;  %1449 = vst.msk [vmem:[%s2137_s30 + $0x1a0] sm:$0xff] %vm1396_vm1, %v1361_v43 }
 0x1db   : > { %v777_v44 = vadd.f32 %v776_v41, %v568_v42  ;;  %v1268_v45 = vadd.f32 %v2127_v0, %v1267_v56 }
 0x1dd   : > { %v892_v5 = vmax.f32 %v777_v44, 0.0  ;;  %1418 = vst.msk [vmem:[%s2137_s30 + $0xa8] sm:$0xff] %vm1396_vm1, %v1268_v45 }
 0x1df   : > { %957 = vst.msk [vmem:[%s1974_s25 + $0x130] sm:$0xff] %vm918_vm0, %v892_v5  ;;  %1601 = vmatmul.msk.f32.gmra.mxu2 %vm918_vm0, %v892_v5  ;;  %v1363_v51 = vpop.f32.mrf.mxu3 }
 0x1e0   : > { %v570_v29 = vpop.f32.mrf.mxu0  ;;  %v1364_v53 = vadd.f32 %v2127_v0, %v1363_v51 }
 0x1e1   : > { %v779_v46 = vpop.f32.mrf.mxu1  ;;  %v571_v50 = vadd.f32 %v2335_v32, %v570_v29 }
 0x1e2   : > { %v1270_v52 = vpop.f32.mrf.mxu2  ;;  %1450 = vst.msk [vmem:[%s2137_s30 + $0x1a8] sm:$0xff] %vm1396_vm1, %v1364_v53 }
 0x1e3   : > { %v780_v54 = vadd.f32 %v779_v46, %v571_v50  ;;  %v1271_v60 = vadd.f32 %v2127_v0, %v1270_v52 }
 0x1e5   : > { %v893_v55 = vmax.f32 %v780_v54, 0.0  ;;  %1419 = vst.msk [vmem:[%s2137_s30 + $0xb0] sm:$0xff] %vm1396_vm1, %v1271_v60 }
 0x1e7   : > { %958 = vst.msk [vmem:[%s1974_s25 + $0x138] sm:$0xff] %vm918_vm0, %v893_v55  ;;  %1602 = vmatmul.msk.f32.gmra.mxu2 %vm918_vm0, %v893_v55  ;;  %v1366_v61 = vpop.f32.mrf.mxu3 }
 0x1e8   : > { %v573_v57 = vpop.f32.mrf.mxu0  ;;  %v1367_v62 = vadd.f32 %v2127_v0, %v1366_v61 }
 0x1e9   : > { %v782_v58 = vpop.f32.mrf.mxu1  ;;  %v574_v1 = vadd.f32 %v2335_v32, %v573_v57 }
 0x1ea   : > { %v1273_v15 = vpop.f32.mrf.mxu2  ;;  %1451 = vst.msk [vmem:[%s2137_s30 + $0x1b0] sm:$0xff] %vm1396_vm1, %v1367_v62 }
 0x1eb   : > { %v783_v39 = vadd.f32 %v782_v58, %v574_v1  ;;  %v1274_v63 = vadd.f32 %v2127_v0, %v1273_v15 }
 0x1ed   : > { %v894_v2 = vmax.f32 %v783_v39, 0.0  ;;  %1420 = vst.msk [vmem:[%s2137_s30 + $0xb8] sm:$0xff] %vm1396_vm1, %v1274_v63 }
 0x1ef   : > { %959 = vst.msk [vmem:[%s1974_s25 + $0x140] sm:$0xff] %vm918_vm0, %v894_v2  ;;  %1603 = vmatmul.msk.f32.gmra.mxu2 %vm918_vm0, %v894_v2  ;;  %v1369_v7 = vpop.f32.mrf.mxu3 }
 0x1f0   : > { %v576_v3 = vpop.f32.mrf.mxu0  ;;  %v1370_v38 = vadd.f32 %v2127_v0, %v1369_v7 }
 0x1f1   : > { %v785_v4 = vpop.f32.mrf.mxu1  ;;  %v577_v6 = vadd.f32 %v2335_v32, %v576_v3 }
 0x1f2   : > { %v1276_v8 = vpop.f32.mrf.mxu2  ;;  %1452 = vst.msk [vmem:[%s2137_s30 + $0x1b8] sm:$0xff] %vm1396_vm1, %v1370_v38 }
 0x1f3   : > { %v786_v11 = vadd.f32 %v785_v4, %v577_v6  ;;  %v1277_v12 = vadd.f32 %v2127_v0, %v1276_v8 }
 0x1f5   : > { %v895_v26 = vmax.f32 %v786_v11, 0.0  ;;  %1421 = vst.msk [vmem:[%s2137_s30 + $0xc0] sm:$0xff] %vm1396_vm1, %v1277_v12 }
 0x1f7   : > { %960 = vst.msk [vmem:[%s1974_s25 + $0x148] sm:$0xff] %vm918_vm0, %v895_v26  ;;  %1604 = vmatmul.msk.f32.gmra.mxu2 %vm918_vm0, %v895_v26  ;;  %v1372_v16 = vpop.f32.mrf.mxu3 }
 0x1f8   : > { %v579_v10 = vpop.f32.mrf.mxu0  ;;  %v1373_v18 = vadd.f32 %v2127_v0, %v1372_v16 }
 0x1f9   : > { %v788_v14 = vpop.f32.mrf.mxu1  ;;  %v580_v49 = vadd.f32 %v2335_v32, %v579_v10 }
 0x1fa   : > { %v1279_v17 = vpop.f32.mrf.mxu2  ;;  %1453 = vst.msk [vmem:[%s2137_s30 + $0x1c0] sm:$0xff] %vm1396_vm1, %v1373_v18 }
 0x1fb   : > { %v789_v20 = vadd.f32 %v788_v14, %v580_v49  ;;  %v1280_v21 = vadd.f32 %v2127_v0, %v1279_v17  ;;  %v1681_v49 = vld [vmem:[%s2571_s4] ss:$0 sm:$0xff] }
 0x1fd   : > { %v896_v22 = vmax.f32 %v789_v20, 0.0  ;;  %1422 = vst.msk [vmem:[%s2137_s30 + $0xc8] sm:$0xff] %vm1396_vm1, %v1280_v21 }
 0x1ff   : > { %961 = vst.msk [vmem:[%s1974_s25 + $0x150] sm:$0xff] %vm918_vm0, %v896_v22  ;;  %1605 = vmatmul.msk.f32.gmra.mxu2 %vm918_vm0, %v896_v22  ;;  %v1375_v36 = vpop.f32.mrf.mxu3 }
 0x200   : > { %v582_v23 = vpop.f32.mrf.mxu0  ;;  %v1376_v31 = vadd.f32 %v2127_v0, %v1375_v36 }
 0x201   : > { %v791_v47 = vpop.f32.mrf.mxu1  ;;  %v583_v27 = vadd.f32 %v2335_v32, %v582_v23 }
 0x202   : > { %v1282_v28 = vpop.f32.mrf.mxu2  ;;  %1454 = vst.msk [vmem:[%s2137_s30 + $0x1c8] sm:$0xff] %vm1396_vm1, %v1376_v31 }
 0x203   : > { %v792_v19 = vadd.f32 %v791_v47, %v583_v27  ;;  %v1283_v59 = vadd.f32 %v2127_v0, %v1282_v28 }
 0x205   : > { %v897_v24 = vmax.f32 %v792_v19, 0.0  ;;  %1423 = vst.msk [vmem:[%s2137_s30 + $0xd0] sm:$0xff] %vm1396_vm1, %v1283_v59 }
 0x207   : > { %962 = vst.msk [vmem:[%s1974_s25 + $0x158] sm:$0xff] %vm918_vm0, %v897_v24  ;;  %1606 = vmatmul.msk.f32.gmra.mxu2 %vm918_vm0, %v897_v24  ;;  %v1378_v37 = vpop.f32.mrf.mxu3 }
 0x208   : > { %v585_v33 = vpop.f32.mrf.mxu0  ;;  %v1379_v41 = vadd.f32 %v2127_v0, %v1378_v37 }
 0x209   : > { %v794_v34 = vpop.f32.mrf.mxu1  ;;  %v586_v35 = vadd.f32 %v2335_v32, %v585_v33 }
 0x20a   : > { %v1285_v40 = vpop.f32.mrf.mxu2  ;;  %1455 = vst.msk [vmem:[%s2137_s30 + $0x1d0] sm:$0xff] %vm1396_vm1, %v1379_v41 }
 0x20b   : > { %v795_v42 = vadd.f32 %v794_v34, %v586_v35  ;;  %v1286_v48 = vadd.f32 %v2127_v0, %v1285_v40 }
 0x20d   : > { %v898_v56 = vmax.f32 %v795_v42, 0.0  ;;  %1424 = vst.msk [vmem:[%s2137_s30 + $0xd8] sm:$0xff] %vm1396_vm1, %v1286_v48 }
 0x20f   : > { %963 = vst.msk [vmem:[%s1974_s25 + $0x160] sm:$0xff] %vm918_vm0, %v898_v56  ;;  %1607 = vmatmul.msk.f32.gmra.mxu2 %vm918_vm0, %v898_v56  ;;  %v1381_v5 = vpop.f32.mrf.mxu3 }
 0x210   : > { %v588_v43 = vpop.f32.mrf.mxu0  ;;  %v1382_v46 = vadd.f32 %v2127_v0, %v1381_v5 }
 0x211   : > { %v797_v44 = vpop.f32.mrf.mxu1  ;;  %v589_v45 = vadd.f32 %v2335_v32, %v588_v43 }
 0x212   : > { %v1288_v29 = vpop.f32.mrf.mxu2  ;;  %1456 = vst.msk [vmem:[%s2137_s30 + $0x1d8] sm:$0xff] %vm1396_vm1, %v1382_v46 }
 0x213   : > { %v798_v50 = vadd.f32 %v797_v44, %v589_v45  ;;  %v1289_v51 = vadd.f32 %v2127_v0, %v1288_v29 }
 0x215   : > { %v899_v52 = vmax.f32 %v798_v50, 0.0  ;;  %1425 = vst.msk [vmem:[%s2137_s30 + $0xe0] sm:$0xff] %vm1396_vm1, %v1289_v51 }
 0x217   : > { %964 = vst.msk [vmem:[%s1974_s25 + $0x168] sm:$0xff] %vm918_vm0, %v899_v52  ;;  %1608 = vmatmul.msk.f32.gmra.mxu2 %vm918_vm0, %v899_v52  ;;  %v1384_v55 = vpop.f32.mrf.mxu3 }
 0x218   : > { %v591_v53 = vpop.f32.mrf.mxu0  ;;  %v1385_v58 = vadd.f32 %v2127_v0, %v1384_v55 }
 0x219   : > { %v800_v54 = vpop.f32.mrf.mxu1  ;;  %v592_v60 = vadd.f32 %v2335_v32, %v591_v53 }
 0x21a   : > { %v1291_v57 = vpop.f32.mrf.mxu2  ;;  %1457 = vst.msk [vmem:[%s2137_s30 + $0x1e0] sm:$0xff] %vm1396_vm1, %v1385_v58 }
 0x21b   : > { %v801_v1 = vadd.f32 %v800_v54, %v592_v60  ;;  %v1292_v61 = vadd.f32 %v2127_v0, %v1291_v57 }
 0x21d   : > { %v900_v15 = vmax.f32 %v801_v1, 0.0  ;;  %1426 = vst.msk [vmem:[%s2137_s30 + $0xe8] sm:$0xff] %vm1396_vm1, %v1292_v61 }
 0x21f   : > { %965 = vst.msk [vmem:[%s1974_s25 + $0x170] sm:$0xff] %vm918_vm0, %v900_v15  ;;  %1609 = vmatmul.msk.f32.gmra.mxu2 %vm918_vm0, %v900_v15  ;;  %v1387_v2 = vpop.f32.mrf.mxu3 }
 0x220   : > { %v594_v62 = vpop.f32.mrf.mxu0  ;;  %v1388_v4 = vadd.f32 %v2127_v0, %v1387_v2 }
 0x221   : > { %v803_v39 = vpop.f32.mrf.mxu1  ;;  %v595_v63 = vadd.f32 %v2335_v32, %v594_v62 }
 0x222   : > { %v1294_v3 = vpop.f32.mrf.mxu2  ;;  %1458 = vst.msk [vmem:[%s2137_s30 + $0x1e8] sm:$0xff] %vm1396_vm1, %v1388_v4 }
 0x223   : > { %v804_v6 = vadd.f32 %v803_v39, %v595_v63  ;;  %v1295_v7 = vadd.f32 %v2127_v0, %v1294_v3 }
 0x225   : > { %v901_v8 = vmax.f32 %v804_v6, 0.0  ;;  %1427 = vst.msk [vmem:[%s2137_s30 + $0xf0] sm:$0xff] %vm1396_vm1, %v1295_v7 }
 0x227   : > { %966 = vst.msk [vmem:[%s1974_s25 + $0x178] sm:$0xff] %vm918_vm0, %v901_v8  ;;  %1610 = vmatmul.msk.f32.gmra.mxu2 %vm918_vm0, %v901_v8  ;;  %v1390_v32 = vpop.f32.mrf.mxu3 }
 0x228   : > { %v1391_v11 = vadd.f32 %v2127_v0, %v1390_v32 }
 0x22a   : > { %v1297_v38 = vpop.f32.mrf.mxu2  ;;  %1459 = vst.msk [vmem:[%s2137_s30 + $0x1f0] sm:$0xff] %vm1396_vm1, %v1391_v11 }
 0x22b   : > { %v1298_v12 = vadd.f32 %v2127_v0, %v1297_v38 }
 0x22d   : > { %1428 = vst.msk [vmem:[%s2137_s30 + $0xf8] sm:$0xff] %vm1396_vm1, %v1298_v12 }
 0x22f   : > { %1611 = vmatmul.msk.f32.gmra.mxu2 %vm918_vm0, %v902_v13  ;;  %v1393_v26 = vpop.f32.mrf.mxu3 }
 0x230   : > { %v1394_v14 = vadd.f32 %v2127_v0, %v1393_v26 }
 0x232   : > { %v1300_v10 = vpop.f32.mrf.mxu2  ;;  %1460 = vst.msk [vmem:[%s2137_s30 + $0x1f8] sm:$0xff] %vm1396_vm1, %v1394_v14 }
 0x233   : > { %v1301_v16 = vadd.f32 %v1681_v49, %v1300_v10 }
 0x235   : > { %1429 = vst.msk [vmem:[%s2137_s30 + $0x100] sm:$0xff] %vm1396_vm1, %v1301_v16 }
 0x237   : > { %1612 = vmatmul.msk.f32.gmra.mxu2 %vm918_vm0, %v903_v30 }
 0x23a   : > { %v1303_v9 = vpop.f32.mrf.mxu2 }
 0x23b   : > { %v1304_v13 = vadd.f32 %v1681_v49, %v1303_v9 }
 0x23d   : > { %1430 = vst.msk [vmem:[%s2137_s30 + $0x108] sm:$0xff] %vm1396_vm1, %v1304_v13 }
 0x242   : > { %v1306_v0 = vpop.f32.mrf.mxu2 }
 0x243   : > { %v1307_v17 = vadd.f32 %v1681_v49, %v1306_v0 }
 0x245   : > { %1431 = vst.msk [vmem:[%s2137_s30 + $0x110] sm:$0xff] %vm1396_vm1, %v1307_v17 }
 0x24a   : > { %v1309_v18 = vpop.f32.mrf.mxu2 }
 0x24b   : > { %v1310_v20 = vadd.f32 %v1681_v49, %v1309_v18 }
 0x24d   : > { %1432 = vst.msk [vmem:[%s2137_s30 + $0x118] sm:$0xff] %vm1396_vm1, %v1310_v20 }
 0x252   : > { %v1312_v21 = vpop.f32.mrf.mxu2 }
 0x253   : > { %v1313_v25 = vadd.f32 %v1681_v49, %v1312_v21 }
 0x255   : > { %1433 = vst.msk [vmem:[%s2137_s30 + $0x120] sm:$0xff] %vm1396_vm1, %v1313_v25 }
 0x25a   : > { %v1315_v30 = vpop.f32.mrf.mxu2 }
 0x25b   : > { %v1316_v22 = vadd.f32 %v1681_v49, %v1315_v30 }
 0x25d   : > { %1434 = vst.msk [vmem:[%s2137_s30 + $0x128] sm:$0xff] %vm1396_vm1, %v1316_v22 }
 0x262   : > { %v1318_v23 = vpop.f32.mrf.mxu2 }
 0x263   : > { %v1319_v47 = vadd.f32 %v1681_v49, %v1318_v23 }
 0x265   : > { %1435 = vst.msk [vmem:[%s2137_s30 + $0x130] sm:$0xff] %vm1396_vm1, %v1319_v47 }
 0x26a   : > { %v1321_v27 = vpop.f32.mrf.mxu2 }
 0x26b   : > { %v1322_v36 = vadd.f32 %v1681_v49, %v1321_v27 }
 0x26d   : > { %1436 = vst.msk [vmem:[%s2137_s30 + $0x138] sm:$0xff] %vm1396_vm1, %v1322_v36 }
 0x272   : > { %v1324_v28 = vpop.f32.mrf.mxu2 }
 0x273   : > { %v1325_v31 = vadd.f32 %v1681_v49, %v1324_v28 }
 0x275   : > { %1437 = vst.msk [vmem:[%s2137_s30 + $0x140] sm:$0xff] %vm1396_vm1, %v1325_v31 }
 0x27a   : > { %v1327_v19 = vpop.f32.mrf.mxu2 }
 0x27b   : > { %v1328_v59 = vadd.f32 %v1681_v49, %v1327_v19 }
 0x27d   : > { %1438 = vst.msk [vmem:[%s2137_s30 + $0x148] sm:$0xff] %vm1396_vm1, %v1328_v59 }
 0x282   : > { %v1330_v24 = vpop.f32.mrf.mxu2 }
 0x283   : > { %v1331_v33 = vadd.f32 %v1681_v49, %v1330_v24 }
 0x285   : > { %1439 = vst.msk [vmem:[%s2137_s30 + $0x150] sm:$0xff] %vm1396_vm1, %v1331_v33 }
 0x28a   : > { %v1333_v34 = vpop.f32.mrf.mxu2 }
 0x28b   : > { %v1334_v35 = vadd.f32 %v1681_v49, %v1333_v34 }
 0x28d   : > { %1440 = vst.msk [vmem:[%s2137_s30 + $0x158] sm:$0xff] %vm1396_vm1, %v1334_v35 }
 0x292   : > { %v1336_v37 = vpop.f32.mrf.mxu2 }
 0x293   : > { %v1337_v40 = vadd.f32 %v1681_v49, %v1336_v37 }
 0x295   : > { %1441 = vst.msk [vmem:[%s2137_s30 + $0x160] sm:$0xff] %vm1396_vm1, %v1337_v40 }
 0x29a   : > { %v1339_v41 = vpop.f32.mrf.mxu2 }
 0x29b   : > { %v1340_v42 = vadd.f32 %v1681_v49, %v1339_v41 }
 0x29d   : > { %1442 = vst.msk [vmem:[%s2137_s30 + $0x168] sm:$0xff] %vm1396_vm1, %v1340_v42 }
 0x2a2   : > { %v1342_v48 = vpop.f32.mrf.mxu2 }
 0x2a3   : > { %v1343_v56 = vadd.f32 %v1681_v49, %v1342_v48 }
 0x2a5   : > { %1443 = vst.msk [vmem:[%s2137_s30 + $0x170] sm:$0xff] %vm1396_vm1, %v1343_v56 }
 0x2aa   : > { %v1345_v43 = vpop.f32.mrf.mxu2 }
 0x2ab   : > { %v1346_v44 = vadd.f32 %v1681_v49, %v1345_v43 }
 0x2ad   : > { %1444 = vst.msk [vmem:[%s2137_s30 + $0x178] sm:$0xff] %vm1396_vm1, %v1346_v44 }
 0x2b2   : > { %v1348_v45 = vpop.f32.mrf.mxu2 }
 0x2b3   : > { %v1349_v5 = vadd.f32 %v1681_v49, %v1348_v45 }
 0x2b5   : > { %1445 = vst.msk [vmem:[%s2137_s30 + $0x180] sm:$0xff] %vm1396_vm1, %v1349_v5 }
 0x2ba   : > { %v1351_v29 = vpop.f32.mrf.mxu2 }
 0x2bb   : > { %v1352_v46 = vadd.f32 %v1681_v49, %v1351_v29 }
 0x2bd   : > { %1446 = vst.msk [vmem:[%s2137_s30 + $0x188] sm:$0xff] %vm1396_vm1, %v1352_v46 }
 0x2be PF: > { %s17_s21 = sadd.s32 1, %s1688_s21  }
 0x2bf   : > { %p14_p4 = scmp.ge.s32.totalorder %s17_s21, 4  }
 0x2c1   :  { %16 = sbr.rel (!%p14_p4) target bundleno = 1 (0x1), region = 82 }

// kernel: stage_forward.7
= control target key start
LH: loop header
LB: loop body
LE: loop exit
PB: predicated region body
PF: predicated region fallthrough
CT: control target
= control target key end

     0   :  { %s1138_s18 = smov 0   ;;  %s1556_s0 = inlined_call_operand.vmem [shape: f32[512,160], index: 0, kind: input, shape index: {}]   ;;  %s1557_s1 = inlined_call_operand.vmem [shape: f32[160,64], index: 1, kind: input, shape index: {}]   ;;  %s1558_s2 = inlined_call_operand.vmem [shape: f32[1,64], index: 2, kind: input, shape index: {}]   ;;  %s1559_s3 = inlined_call_operand.vmem [shape: f32[64,3], index: 3, kind: input, shape index: {}]   ;;  %s1560_s4 = inlined_call_operand.vmem [shape: f32[1,3], index: 4, kind: input, shape index: {}]   ;;  %s1561_s5 = inlined_call_operand.vmem [shape: f32[512,3], index: 5, kind: output, shape index: {}]  }
   0x1 LB: > { %s985_s19 = sadd.s32 4294967295, %s1106_s18   ;;  %p989_p0 = scmp.ge.s32.totalorder %s1106_s18, 1  ;;  %s1106_s18 = sphi %s1138_s18, %s15_s18  }
   0x2   : > { %p189_p1 = scmp.lt.s32.totalorder %s1106_s18, 3 }
   0x4   : > { %p190_p2 = pnand %p989_p0, %p189_p1 }
   0x5   : > { %s990_s26 = sshll.u32 (!%p190_p2), %s985_s19, 5 }
   0x6   : > { %193 = sbr.rel (%p190_p2) target bundleno = 533 (0x215), region = 40  ;;  %p219_p3 = scmp.lt.s32.totalorder (!%p190_p2), %s990_s26, 63 }
   0xb   : > { %v310_v0 = vld [vmem:[%s1557_s1 + $0x78] sm:$0xff]  ;;  %v309_v2 = vld [vmem:[%s1557_s1 + $0x70] sm:$0xff]  ;;  %v308_v4 = vld [vmem:[%s1557_s1 + $0x68] sm:$0xff]  ;;  %s1563_s26 = smov (!%p219_p3, %s990_s26), 63  ;;  %vm319_vm0 = vcmask 261120   ;;  %vm686_vm1 = vcmask 523264  }
   0xc   : > { %v1152_v1 = vld [vmem:[%s1557_s1 + $0x98] sm:$0xff]  ;;  %416 = vmatpush.msra.mxu0 %v310_v0  ;;  %v1161_v3 = vld [vmem:[%s1557_s1 + $0x90] sm:$0xff]  ;;  %v1169_v5 = vld [vmem:[%s1557_s1 + $0x88] sm:$0xff]  ;;  %1062 = vmatpush.msra.mxu3 %v310_v0  ;;  %s1061_s12 = sshll.u32 %s1563_s26, 4  ;;  %vm896_vm2 = vcmask 23552  }
   0xd   : > { %541 = vmatpush.msra.mxu1 %v1152_v1  ;;  %v307_v6 = vld [vmem:[%s1557_s1 + $0x60] sm:$0xff]  ;;  %s1187_s15 = scalar_lea.vmem %s1556_s0, %s1061_s12  ;;  %v306_v8 = vld [vmem:[%s1557_s1 + $0x58] sm:$0xff]  ;;  %v305_v10 = vld [vmem:[%s1557_s1 + $0x50] sm:$0xff] }
   0xe   : > { %417 = vmatpush.msra.mxu0 %v309_v2  ;;  %v1180_v7 = vld [vmem:[%s1557_s1 + $0x80] sm:$0xff]  ;;  %1063 = vmatpush.msra.mxu3 %v309_v2  ;;  %v232_v9 = vld [vmem:[%s1187_s15 + $0x8] sm:$0xff]  ;;  %v234_v13 = vld [vmem:[%s1187_s15 + $0x18] sm:$0xff] }
   0xf   : > { %542 = vmatpush.msra.mxu1 %v1161_v3  ;;  %v304_v11 = vld [vmem:[%s1557_s1 + $0x48] sm:$0xff]  ;;  %v303_v12 = vld [vmem:[%s1557_s1 + $0x40] sm:$0xff]  ;;  %v302_v14 = vld [vmem:[%s1557_s1 + $0x38] sm:$0xff] }
  0x10   : > { %418 = vmatpush.msra.mxu0 %v308_v4  ;;  %1064 = vmatpush.msra.mxu3 %v308_v4  ;;  %v301_v15 = vld [vmem:[%s1557_s1 + $0x30] sm:$0xff]  ;;  %v300_v16 = vld [vmem:[%s1557_s1 + $0x28] sm:$0xff]  ;;  %v299_v17 = vld [vmem:[%s1557_s1 + $0x20] sm:$0xff] }
  0x11   : > { %543 = vmatpush.msra.mxu1 %v1169_v5  ;;  %v236_v18 = vld [vmem:[%s1187_s15 + $0x28] sm:$0xff]  ;;  %v298_v19 = vld [vmem:[%s1557_s1 + $0x18] sm:$0xff]  ;;  %v297_v20 = vld [vmem:[%s1557_s1 + $0x10] sm:$0xff] }
  0x12   : > { %419 = vmatpush.msra.mxu0 %v307_v6  ;;  %1065 = vmatpush.msra.mxu3 %v307_v6  ;;  %v296_v21 = vld [vmem:[%s1557_s1 + $0x8] sm:$0xff]  ;;  %v295_v22 = vld [vmem:[%s1557_s1] sm:$0xff]  ;;  %v238_v24 = vld [vmem:[%s1187_s15 + $0x38] sm:$0xff] }
  0x13   : > { %544 = vmatpush.msra.mxu1 %v1180_v7  ;;  %v231_v23 = vld [vmem:[%s1187_s15] sm:$0xff]  ;;  %v233_v25 = vld [vmem:[%s1187_s15 + $0x10] sm:$0xff]  ;;  %v240_v26 = vld [vmem:[%s1187_s15 + $0x48] sm:$0xff] }
  0x14   : > { %995 = vmatmul.msk.f32.vlgmr.msra.gmra.mxu1 %vm319_vm0, %v232_v9  ;;  %420 = vmatpush.msra.mxu0 %v306_v8  ;;  %v235_v27 = vld [vmem:[%s1187_s15 + $0x20] sm:$0xff]  ;;  %v242_v28 = vld [vmem:[%s1187_s15 + $0x58] sm:$0xff]  ;;  %v237_v29 = vld [vmem:[%s1187_s15 + $0x30] sm:$0xff] }
  0x15   : > { %1066 = vmatpush.msra.mxu3 %v306_v8  ;;  %v244_v30 = vld [vmem:[%s1187_s15 + $0x68] sm:$0xff]  ;;  %v277_v31 = vld [vmem:[%s1187_s15 + $0x170] sm:$0xff]  ;;  %v239_v32 = vld [vmem:[%s1187_s15 + $0x40] sm:$0xff] }
  0x16   : > { %421 = vmatpush.msra.mxu0 %v305_v10  ;;  %v246_v33 = vld [vmem:[%s1187_s15 + $0x78] sm:$0xff]  ;;  %v279_v34 = vld [vmem:[%s1187_s15 + $0x180] sm:$0xff]  ;;  %v241_v35 = vld [vmem:[%s1187_s15 + $0x50] sm:$0xff] }
  0x17   : > { %1067 = vmatpush.msra.mxu3 %v305_v10  ;;  %v248_v36 = vld [vmem:[%s1187_s15 + $0x88] sm:$0xff]  ;;  %v281_v37 = vld [vmem:[%s1187_s15 + $0x190] sm:$0xff]  ;;  %v243_v38 = vld [vmem:[%s1187_s15 + $0x60] sm:$0xff] }
  0x18   : > { %422 = vmatpush.msra.mxu0 %v304_v11  ;;  %v250_v39 = vld [vmem:[%s1187_s15 + $0x98] sm:$0xff]  ;;  %v283_v40 = vld [vmem:[%s1187_s15 + $0x1a0] sm:$0xff]  ;;  %v245_v41 = vld [vmem:[%s1187_s15 + $0x70] sm:$0xff] }
  0x19   : > { %1068 = vmatpush.msra.mxu3 %v304_v11  ;;  %v252_v42 = vld [vmem:[%s1187_s15 + $0xa8] sm:$0xff]  ;;  %v285_v43 = vld [vmem:[%s1187_s15 + $0x1b0] sm:$0xff]  ;;  %v247_v44 = vld [vmem:[%s1187_s15 + $0x80] sm:$0xff] }
  0x1a   : > { %423 = vmatpush.msra.mxu0 %v303_v12  ;;  %v254_v45 = vld [vmem:[%s1187_s15 + $0xb8] sm:$0xff]  ;;  %v287_v46 = vld [vmem:[%s1187_s15 + $0x1c0] sm:$0xff]  ;;  %v249_v47 = vld [vmem:[%s1187_s15 + $0x90] sm:$0xff] }
  0x1b   : > { %1069 = vmatpush.msra.mxu3 %v303_v12  ;;  %v256_v48 = vld [vmem:[%s1187_s15 + $0xc8] sm:$0xff]  ;;  %v289_v49 = vld [vmem:[%s1187_s15 + $0x1d0] sm:$0xff]  ;;  %v251_v50 = vld [vmem:[%s1187_s15 + $0xa0] sm:$0xff] }
  0x1c   : > { %996 = vmatmul.msk.f32.gmra.mxu1 %vm319_vm0, %v234_v13  ;;  %424 = vmatpush.msra.mxu0 %v302_v14  ;;  %v258_v51 = vld [vmem:[%s1187_s15 + $0xd8] sm:$0xff]  ;;  %v291_v52 = vld [vmem:[%s1187_s15 + $0x1e0] sm:$0xff]  ;;  %v253_v54 = vld [vmem:[%s1187_s15 + $0xb0] sm:$0xff] }
  0x1d   : > { %1070 = vmatpush.msra.mxu3 %v302_v14  ;;  %v681_v53 = vld [vmem:[%s1559_s3 + $0x38] sm:$0xff]  ;;  %v260_v55 = vld [vmem:[%s1187_s15 + $0xe8] sm:$0xff]  ;;  %v680_v56 = vld [vmem:[%s1559_s3 + $0x30] sm:$0xff] }
  0x1e   : > { %425 = vmatpush.msra.mxu0 %v301_v15  ;;  %791 = vmatpush.msra.mxu2 %v681_v53  ;;  %v679_v57 = vld [vmem:[%s1559_s3 + $0x28] sm:$0xff]  ;;  %v678_v58 = vld [vmem:[%s1559_s3 + $0x20] sm:$0xff]  ;;  %v293_v59 = vld [vmem:[%s1187_s15 + $0x1f0] sm:$0xff] }
  0x1f   : > { %1071 = vmatpush.msra.mxu3 %v301_v15  ;;  %v677_v60 = vld [vmem:[%s1559_s3 + $0x18] sm:$0xff]  ;;  %v255_v61 = vld [vmem:[%s1187_s15 + $0xc0] sm:$0xff]  ;;  %v676_v63 = vld [vmem:[%s1559_s3 + $0x10] sm:$0xff] }
  0x20   : > { %426 = vmatpush.msra.mxu0 %v300_v16  ;;  %792 = vmatpush.msra.mxu2 %v680_v56  ;;  %v262_v62 = vld [vmem:[%s1187_s15 + $0xf8] sm:$0xff]  ;;  %v675_v0 = vld [vmem:[%s1559_s3 + $0x8] sm:$0xff]  ;;  %v257_v4 = vld [vmem:[%s1187_s15 + $0xd0] sm:$0xff] }
  0x21   : > { %1072 = vmatpush.msra.mxu3 %v300_v16  ;;  %v284_v2 = vld [vmem:[%s1187_s15 + $0x1a8] sm:$0xff]  ;;  %v286_v6 = vld [vmem:[%s1187_s15 + $0x1b8] sm:$0xff]  ;;  %v259_v8 = vld [vmem:[%s1187_s15 + $0xe0] sm:$0xff] }
  0x22   : > { %427 = vmatpush.msra.mxu0 %v299_v17  ;;  %793 = vmatpush.msra.mxu2 %v679_v57  ;;  %v266_v9 = vld [vmem:[%s1187_s15 + $0x118] sm:$0xff]  ;;  %v288_v10 = vld [vmem:[%s1187_s15 + $0x1c8] sm:$0xff]  ;;  %v261_v12 = vld [vmem:[%s1187_s15 + $0xf0] sm:$0xff] }
  0x23   : > { %1073 = vmatpush.msra.mxu3 %v299_v17  ;;  %v268_v13 = vld [vmem:[%s1187_s15 + $0x128] sm:$0xff]  ;;  %v1326_v14 = vld [vmem:[%s1558_s2] ss:$0 sm:$0xff]  ;;  %v290_v15 = vld [vmem:[%s1187_s15 + $0x1d8] sm:$0xff] }
  0x24   : > { %997 = vmatmul.msk.f32.gmra.mxu1 %vm319_vm0, %v236_v18  ;;  %428 = vmatpush.msra.mxu0 %v298_v19  ;;  %v263_v18 = vld [vmem:[%s1187_s15 + $0x100] sm:$0xff] }
  0x25   : > { %1074 = vmatpush.msra.mxu3 %v298_v19  ;;  %794 = vmatpush.msra.mxu2 %v678_v58  ;;  %v270_v19 = vld [vmem:[%s1187_s15 + $0x138] sm:$0xff] }
  0x26   : > { %429 = vmatpush.msra.mxu0 %v297_v20 }
  0x27   : > { %1075 = vmatpush.msra.mxu3 %v297_v20  ;;  %795 = vmatpush.msra.mxu2 %v677_v60 }
  0x28   : > { %430 = vmatpush.msra.mxu0 %v296_v21 }
  0x29   : > { %1076 = vmatpush.msra.mxu3 %v296_v21  ;;  %796 = vmatpush.msra.mxu2 %v676_v63 }
  0x2a   : > { %431 = vmatpush.msra.mxu0 %v295_v22 }
  0x2b   : > { %432 = vmatmul.f32.vlgmr.msra.gmra.mxu0 %v231_v23  ;;  %1077 = vmatpush.msra.mxu3 %v295_v22  ;;  %v292_v23 = vld [vmem:[%s1187_s15 + $0x1e8] sm:$0xff] }
  0x2c   : > { %998 = vmatmul.msk.f32.gmra.mxu1 %vm319_vm0, %v238_v24  ;;  %501 = vmatmul.f32.vlgmr.msra.gmra.mxu3 %v277_v31  ;;  %v294_v31 = vld [vmem:[%s1187_s15 + $0x1f8] sm:$0xff] }
  0x2d   : > { %1078 = vmatpush.msrb.mxu3 %v1152_v1  ;;  %797 = vmatpush.msra.mxu2 %v675_v0  ;;  %v674_v1 = vld [vmem:[%s1559_s3] sm:$0xff] }
  0x2f   : > { %1079 = vmatpush.msrb.mxu3 %v1161_v3  ;;  %798 = vmatpush.msra.mxu2 %v674_v1 }
  0x31   : > { %1080 = vmatpush.msrb.mxu3 %v1169_v5  ;;  %v264_v5 = vld [vmem:[%s1187_s15 + $0x108] sm:$0xff] }
  0x33   : > { %435 = vmatmul.f32.gmra.mxu0 %v233_v25  ;;  %1081 = vmatpush.msrb.mxu3 %v1180_v7 }
  0x34   : > { %999 = vmatmul.msk.f32.gmra.mxu1 %vm319_vm0, %v240_v26  ;;  %504 = vmatmul.f32.gmra.mxu3 %v279_v34  ;;  %v265_v26 = vld [vmem:[%s1187_s15 + $0x110] sm:$0xff]  ;;  %v267_v34 = vld [vmem:[%s1187_s15 + $0x120] sm:$0xff] }
  0x35   : > { %1082 = vmatpush.msra.mxu3 %v681_v53 }
  0x37   : > { %1083 = vmatpush.msra.mxu3 %v680_v56  ;;  %v280_v56 = vld [vmem:[%s1187_s15 + $0x188] sm:$0xff] }
  0x39   : > { %1084 = vmatpush.msra.mxu3 %v679_v57 }
  0x3b   : > { %438 = vmatmul.f32.gmra.mxu0 %v235_v27  ;;  %1085 = vmatpush.msra.mxu3 %v678_v58  ;;  %v272_v27 = vld [vmem:[%s1187_s15 + $0x148] sm:$0xff] }
  0x3c   : > { %1000 = vmatmul.msk.f32.gmra.mxu1 %vm319_vm0, %v242_v28  ;;  %507 = vmatmul.f32.gmra.mxu3 %v281_v37 }
  0x3d   : > { %1086 = vmatpush.msra.mxu3 %v677_v60 }
  0x3f   : > { %1087 = vmatpush.msra.mxu3 %v676_v63  ;;  %v282_v63 = vld [vmem:[%s1187_s15 + $0x198] sm:$0xff] }
  0x41   : > { %1088 = vmatpush.msra.mxu3 %v675_v0 }
  0x43   : > { %441 = vmatmul.f32.gmra.mxu0 %v237_v29  ;;  %1089 = vmatpush.msra.mxu3 %v674_v1 }
  0x44   : > { %1001 = vmatmul.msk.f32.gmra.mxu1 %vm319_vm0, %v244_v30  ;;  %510 = vmatmul.f32.gmra.mxu3 %v283_v40 }
  0x4b   : > { %444 = vmatmul.f32.gmra.mxu0 %v239_v32 }
  0x4c   : > { %1002 = vmatmul.msk.f32.gmra.mxu1 %vm319_vm0, %v246_v33  ;;  %513 = vmatmul.f32.gmra.mxu3 %v285_v43 }
  0x53   : > { %447 = vmatmul.f32.gmra.mxu0 %v241_v35  ;;  %v274_v35 = vld [vmem:[%s1187_s15 + $0x158] sm:$0xff] }
  0x54   : > { %1003 = vmatmul.msk.f32.gmra.mxu1 %vm319_vm0, %v248_v36  ;;  %516 = vmatmul.f32.gmra.mxu3 %v287_v46 }
  0x5b   : > { %450 = vmatmul.f32.gmra.mxu0 %v243_v38 }
  0x5c   : > { %1004 = vmatmul.msk.f32.gmra.mxu1 %vm319_vm0, %v250_v39  ;;  %519 = vmatmul.f32.gmra.mxu3 %v289_v49  ;;  %v278_v49 = vld [vmem:[%s1187_s15 + $0x178] sm:$0xff] }
  0x63   : > { %453 = vmatmul.f32.gmra.mxu0 %v245_v41  ;;  %v269_v41 = vld [vmem:[%s1187_s15 + $0x130] sm:$0xff] }
  0x64   : > { %1005 = vmatmul.msk.f32.gmra.mxu1 %vm319_vm0, %v252_v42  ;;  %522 = vmatmul.f32.gmra.mxu3 %v291_v52  ;;  %v276_v42 = vld [vmem:[%s1187_s15 + $0x168] sm:$0xff] }
  0x6b   : > { %456 = vmatmul.f32.gmra.mxu0 %v247_v44 }
  0x6c   : > { %1006 = vmatmul.msk.f32.gmra.mxu1 %vm319_vm0, %v254_v45  ;;  %525 = vmatmul.f32.gmra.mxu3 %v293_v59 }
  0x73   : > { %459 = vmatmul.f32.gmra.mxu0 %v249_v47 }
  0x74   : > { %1007 = vmatmul.msk.f32.gmra.mxu1 %vm319_vm0, %v256_v48  ;;  %1021 = vmatmul.msk.f32.vlgmr.msrb.gmra.mxu3 %vm319_vm0, %v284_v2  ;;  %v271_v48 = vld [vmem:[%s1187_s15 + $0x140] sm:$0xff] }
  0x7b   : > { %462 = vmatmul.f32.gmra.mxu0 %v251_v50 }
  0x7c   : > { %1008 = vmatmul.msk.f32.gmra.mxu1 %vm319_vm0, %v258_v51  ;;  %1022 = vmatmul.msk.f32.gmra.mxu3 %vm319_vm0, %v286_v6 }
  0x83   : > { %465 = vmatmul.f32.gmra.mxu0 %v253_v54 }
  0x84   : > { %1009 = vmatmul.msk.f32.gmra.mxu1 %vm319_vm0, %v260_v55  ;;  %1023 = vmatmul.msk.f32.gmra.mxu3 %vm319_vm0, %v288_v10  ;;  %v273_v55 = vld [vmem:[%s1187_s15 + $0x150] sm:$0xff] }
  0x8b   : > { %468 = vmatmul.f32.gmra.mxu0 %v255_v61 }
  0x8c   : > { %1010 = vmatmul.msk.f32.gmra.mxu1 %vm319_vm0, %v262_v62  ;;  %1024 = vmatmul.msk.f32.gmra.mxu3 %vm319_vm0, %v290_v15  ;;  %v275_v62 = vld [vmem:[%s1187_s15 + $0x160] sm:$0xff]  ;;  %s994_s15 = sshll.u32 %s1563_s26, 3 }
  0x8d   : > { %s1411_s19 = scalar_lea.vmem %s1561_s5, %s994_s15 }
  0x91   : > { %v546_v3 = vpop.f32.mrf.mxu1 }
  0x93   : > { %471 = vmatmul.f32.gmra.mxu0 %v257_v4 }
  0x94   : > { %1011 = vmatmul.msk.f32.gmra.mxu1 %vm319_vm0, %v264_v5  ;;  %1025 = vmatmul.msk.f32.gmra.mxu3 %vm319_vm0, %v292_v23 }
  0x99   : > { %v549_v7 = vpop.f32.mrf.mxu1 }
  0x9b   : > { %474 = vmatmul.f32.gmra.mxu0 %v259_v8 }
  0x9c   : > { %1012 = vmatmul.msk.f32.gmra.mxu1 %vm319_vm0, %v266_v9  ;;  %1026 = vmatmul.msk.f32.gmra.mxu3 %vm319_vm0, %v294_v31 }
  0xa1   : > { %v552_v11 = vpop.f32.mrf.mxu1 }
  0xa3   : > { %477 = vmatmul.f32.gmra.mxu0 %v261_v12 }
  0xa4   : > { %1013 = vmatmul.msk.f32.gmra.mxu1 %vm319_vm0, %v268_v13 }
  0xa8   : > { %v433_v16 = vpop.f32.mrf.mxu0 }
  0xa9   : > { %v555_v17 = vpop.f32.mrf.mxu1  ;;  %v434_v20 = vadd.f32 %v1326_v14, %v433_v16 }
  0xab   : > { %v547_v21 = vadd.f32 %v546_v3, %v434_v20  ;;  %480 = vmatmul.f32.gmra.mxu0 %v263_v18 }
  0xac   : > { %1014 = vmatmul.msk.f32.gmra.mxu1 %vm319_vm0, %v270_v19 }
  0xad   : > { %v642_v22 = vmax.f32 %v547_v21, 0.0 }
  0xaf   : > { %1027 = vmatmul.msk.f32.vlgmr.msra.gmra.mxu2 %vm686_vm1, %v642_v22  ;;  %v1374_v19 = vpop.f32.mrf.mxu3 }
  0xb0   : > { %v436_v24 = vpop.f32.mrf.mxu0 }
  0xb1   : > { %v558_v25 = vpop.f32.mrf.mxu1  ;;  %v437_v28 = vadd.f32 %v1326_v14, %v436_v24 }
  0xb3   : > { %v550_v29 = vadd.f32 %v549_v7, %v437_v28  ;;  %483 = vmatmul.f32.gmra.mxu0 %v265_v26 }
  0xb4   : > { %1015 = vmatmul.msk.f32.gmra.mxu1 %vm319_vm0, %v272_v27 }
  0xb5   : > { %v643_v30 = vmax.f32 %v550_v29, 0.0 }
  0xb7   : > { %1028 = vmatmul.msk.f32.gmra.mxu2 %vm686_vm1, %v643_v30  ;;  %v1379_v27 = vpop.f32.mrf.mxu3 }
  0xb8   : > { %v439_v32 = vpop.f32.mrf.mxu0 }
  0xb9   : > { %v561_v33 = vpop.f32.mrf.mxu1  ;;  %v440_v36 = vadd.f32 %v1326_v14, %v439_v32 }
  0xbb   : > { %v553_v37 = vadd.f32 %v552_v11, %v440_v36  ;;  %486 = vmatmul.f32.gmra.mxu0 %v267_v34 }
  0xbc   : > { %1016 = vmatmul.msk.f32.gmra.mxu1 %vm319_vm0, %v274_v35 }
  0xbd   : > { %v644_v38 = vmax.f32 %v553_v37, 0.0 }
  0xbf   : > { %1029 = vmatmul.msk.f32.gmra.mxu2 %vm686_vm1, %v644_v38  ;;  %v1384_v34 = vpop.f32.mrf.mxu3 }
  0xc0   : > { %v442_v39 = vpop.f32.mrf.mxu0 }
  0xc1   : > { %v564_v40 = vpop.f32.mrf.mxu1  ;;  %v443_v43 = vadd.f32 %v1326_v14, %v442_v39 }
  0xc3   : > { %v556_v44 = vadd.f32 %v555_v17, %v443_v43  ;;  %489 = vmatmul.f32.gmra.mxu0 %v269_v41 }
  0xc4   : > { %1017 = vmatmul.msk.f32.gmra.mxu1 %vm319_vm0, %v276_v42 }
  0xc5   : > { %v645_v45 = vmax.f32 %v556_v44, 0.0 }
  0xc7   : > { %1030 = vmatmul.msk.f32.gmra.mxu2 %vm686_vm1, %v645_v45  ;;  %v1388_v41 = vpop.f32.mrf.mxu3 }
  0xc8   : > { %v445_v46 = vpop.f32.mrf.mxu0 }
  0xc9   : > { %v567_v47 = vpop.f32.mrf.mxu1  ;;  %v446_v50 = vadd.f32 %v1326_v14, %v445_v46 }
  0xcb   : > { %v559_v51 = vadd.f32 %v558_v25, %v446_v50  ;;  %492 = vmatmul.f32.gmra.mxu0 %v271_v48 }
  0xcc   : > { %1018 = vmatmul.msk.f32.gmra.mxu1 %vm319_vm0, %v278_v49 }
  0xcd   : > { %v646_v52 = vmax.f32 %v559_v51, 0.0 }
  0xcf   : > { %1031 = vmatmul.msk.f32.gmra.mxu2 %vm686_vm1, %v646_v52  ;;  %v1392_v48 = vpop.f32.mrf.mxu3 }
  0xd0   : > { %v448_v53 = vpop.f32.mrf.mxu0 }
  0xd1   : > { %v570_v54 = vpop.f32.mrf.mxu1  ;;  %v449_v57 = vadd.f32 %v1326_v14, %v448_v53 }
  0xd3   : > { %v562_v58 = vadd.f32 %v561_v33, %v449_v57  ;;  %495 = vmatmul.f32.gmra.mxu0 %v273_v55 }
  0xd4   : > { %1019 = vmatmul.msk.f32.gmra.mxu1 %vm319_vm0, %v280_v56 }
  0xd5   : > { %v647_v59 = vmax.f32 %v562_v58, 0.0 }
  0xd7   : > { %1032 = vmatmul.msk.f32.gmra.mxu2 %vm686_vm1, %v647_v59  ;;  %v1397_v56 = vpop.f32.mrf.mxu3 }
  0xd8   : > { %v451_v60 = vpop.f32.mrf.mxu0 }
  0xd9   : > { %v573_v61 = vpop.f32.mrf.mxu1  ;;  %v452_v0 = vadd.f32 %v1326_v14, %v451_v60  ;;  %v1405_v60 = vld [vmem:[%s1560_s4] ss:$0 sm:$0xff] }
  0xdb   : > { %v565_v1 = vadd.f32 %v564_v40, %v452_v0  ;;  %498 = vmatmul.f32.gmra.mxu0 %v275_v62 }
  0xdc   : > { %1020 = vmatmul.msk.f32.gmra.mxu1 %vm319_vm0, %v282_v63 }
  0xdd   : > { %v648_v2 = vmax.f32 %v565_v1, 0.0 }
  0xdf   : > { %1033 = vmatmul.msk.f32.gmra.mxu2 %vm686_vm1, %v648_v2  ;;  %v1413_v1 = vpop.f32.mrf.mxu3 }
  0xe0   : > { %v454_v3 = vpop.f32.mrf.mxu0 }
  0xe1   : > { %v576_v4 = vpop.f32.mrf.mxu1  ;;  %v455_v5 = vadd.f32 %v1326_v14, %v454_v3 }
  0xe3   : > { %v568_v6 = vadd.f32 %v567_v47, %v455_v5 }
  0xe5   : > { %v649_v7 = vmax.f32 %v568_v6, 0.0 }
  0xe7   : > { %1034 = vmatmul.msk.f32.gmra.mxu2 %vm686_vm1, %v649_v7 }
  0xe8   : > { %v457_v8 = vpop.f32.mrf.mxu0 }
  0xe9   : > { %v579_v9 = vpop.f32.mrf.mxu1  ;;  %v458_v10 = vadd.f32 %v1326_v14, %v457_v8 }
  0xeb   : > { %v571_v11 = vadd.f32 %v570_v54, %v458_v10 }
  0xed   : > { %v650_v12 = vmax.f32 %v571_v11, 0.0  ;;  %v1421_v11 = vpop.f32.mrf.mxu3 }
  0xef   : > { %1035 = vmatmul.msk.f32.gmra.mxu2 %vm686_vm1, %v650_v12 }
  0xf0   : > { %v460_v13 = vpop.f32.mrf.mxu0 }
  0xf1   : > { %v582_v15 = vpop.f32.mrf.mxu1  ;;  %v461_v16 = vadd.f32 %v1326_v14, %v460_v13 }
  0xf3   : > { %v574_v17 = vadd.f32 %v573_v61, %v461_v16 }
  0xf5   : > { %v651_v18 = vmax.f32 %v574_v17, 0.0 }
  0xf7   : > { %1036 = vmatmul.msk.f32.gmra.mxu2 %vm686_vm1, %v651_v18 }
  0xf8   : > { %v463_v20 = vpop.f32.mrf.mxu0 }
  0xf9   : > { %v585_v21 = vpop.f32.mrf.mxu1  ;;  %v464_v22 = vadd.f32 %v1326_v14, %v463_v20 }
  0xfb   : > { %v577_v23 = vadd.f32 %v576_v4, %v464_v22  ;;  %v1430_v22 = vpop.f32.mrf.mxu3 }
  0xfd   : > { %v652_v24 = vmax.f32 %v577_v23, 0.0 }
  0xff   : > { %1037 = vmatmul.msk.f32.gmra.mxu2 %vm686_vm1, %v652_v24 }
 0x100   : > { %v466_v25 = vpop.f32.mrf.mxu0 }
 0x101   : > { %v588_v26 = vpop.f32.mrf.mxu1  ;;  %v467_v28 = vadd.f32 %v1326_v14, %v466_v25 }
 0x103   : > { %v580_v29 = vadd.f32 %v579_v9, %v467_v28 }
 0x105   : > { %v653_v30 = vmax.f32 %v580_v29, 0.0 }
 0x107   : > { %1038 = vmatmul.msk.f32.gmra.mxu2 %vm686_vm1, %v653_v30 }
 0x108   : > { %v469_v31 = vpop.f32.mrf.mxu0 }
 0x109   : > { %v591_v32 = vpop.f32.mrf.mxu1  ;;  %v470_v33 = vadd.f32 %v1326_v14, %v469_v31 }
 0x10b   : > { %v583_v35 = vadd.f32 %v582_v15, %v470_v33 }
 0x10d   : > { %v654_v36 = vmax.f32 %v583_v35, 0.0  ;;  %v624_v35 = vpop.f32.mrf.mxu3 }
 0x10f   : > { %1039 = vmatmul.msk.f32.gmra.mxu2 %vm686_vm1, %v654_v36 }
 0x110   : > { %v472_v37 = vpop.f32.mrf.mxu0 }
 0x111   : > { %v594_v38 = vpop.f32.mrf.mxu1  ;;  %v473_v39 = vadd.f32 %v1326_v14, %v472_v37 }
 0x113   : > { %v586_v40 = vadd.f32 %v585_v21, %v473_v39 }
 0x115   : > { %v655_v42 = vmax.f32 %v586_v40, 0.0  ;;  %v509_v40 = vadd.f32 %v1326_v14, %v1384_v34  ;;  %v503_v34 = vadd.f32 %v1326_v14, %v1374_v19  ;;  %v506_v19 = vadd.f32 %v1326_v14, %v1379_v27 }
 0x117   : > { %1040 = vmatmul.msk.f32.gmra.mxu2 %vm686_vm1, %v655_v42 }
 0x118   : > { %v475_v43 = vpop.f32.mrf.mxu0 }
 0x119   : > { %v597_v44 = vpop.f32.mrf.mxu1  ;;  %v476_v45 = vadd.f32 %v1326_v14, %v475_v43 }
 0x11b   : > { %v589_v46 = vadd.f32 %v588_v26, %v476_v45 }
 0x11d   : > { %v656_v47 = vmax.f32 %v589_v46, 0.0 }
 0x11f   : > { %1041 = vmatmul.msk.f32.gmra.mxu2 %vm686_vm1, %v656_v47  ;;  %v512_v47 = vadd.f32 %v1326_v14, %v1388_v41  ;;  %v515_v41 = vadd.f32 %v1326_v14, %v1392_v48  ;;  %v518_v48 = vadd.f32 %v1326_v14, %v1397_v56 }
 0x120   : > { %v478_v49 = vpop.f32.mrf.mxu0 }
 0x121   : > { %v600_v50 = vpop.f32.mrf.mxu1  ;;  %v479_v51 = vadd.f32 %v1326_v14, %v478_v49 }
 0x123   : > { %v592_v52 = vadd.f32 %v591_v32, %v479_v51 }
 0x125   : > { %v657_v53 = vmax.f32 %v592_v52, 0.0  ;;  %v627_v52 = vpop.f32.mrf.mxu3 }
 0x127   : > { %1042 = vmatmul.msk.f32.gmra.mxu2 %vm686_vm1, %v657_v53 }
 0x128   : > { %v481_v54 = vpop.f32.mrf.mxu0 }
 0x129   : > { %v603_v55 = vpop.f32.mrf.mxu1  ;;  %v482_v57 = vadd.f32 %v1326_v14, %v481_v54  ;;  %v625_v54 = vadd.f32 %v624_v35, %v512_v47 }
 0x12b   : > { %v595_v58 = vadd.f32 %v594_v38, %v482_v57 }
 0x12d   : > { %v658_v59 = vmax.f32 %v595_v58, 0.0  ;;  %v668_v58 = vmax.f32 %v625_v54, 0.0 }
 0x12f   : > { %1043 = vmatmul.msk.f32.gmra.mxu2 %vm686_vm1, %v658_v59 }
 0x130   : > { %v484_v61 = vpop.f32.mrf.mxu0 }
 0x131   : > { %v606_v62 = vpop.f32.mrf.mxu1  ;;  %v485_v63 = vadd.f32 %v1326_v14, %v484_v61 }
 0x132   : > { %v800_v0 = vpop.f32.mrf.mxu2 }
 0x133   : > { %v598_v2 = vadd.f32 %v597_v44, %v485_v63  ;;  %v801_v3 = vadd.f32 %v1405_v60, %v800_v0  ;;  %v628_v63 = vadd.f32 %v627_v52, %v515_v41 }
 0x135   : > { %v659_v4 = vmax.f32 %v598_v2, 0.0  ;;  %897 = vst.msk [vmem:[%s1411_s19] sm:$0xff] %vm896_vm2, %v801_v3  ;;  %v669_v3 = vmax.f32 %v628_v63, 0.0 }
 0x137   : > { %1044 = vmatmul.msk.f32.gmra.mxu2 %vm686_vm1, %v659_v4 }
 0x138   : > { %v487_v5 = vpop.f32.mrf.mxu0 }
 0x139   : > { %v609_v6 = vpop.f32.mrf.mxu1  ;;  %v488_v7 = vadd.f32 %v1326_v14, %v487_v5 }
 0x13a   : > { %v803_v8 = vpop.f32.mrf.mxu2 }
 0x13b   : > { %v601_v9 = vadd.f32 %v600_v50, %v488_v7  ;;  %v804_v10 = vadd.f32 %v1405_v60, %v803_v8  ;;  %v521_v8 = vadd.f32 %v1326_v14, %v1413_v1 }
 0x13d   : > { %v660_v12 = vmax.f32 %v601_v9, 0.0  ;;  %898 = vst.msk [vmem:[%s1411_s19 + $0x8] sm:$0xff] %vm896_vm2, %v804_v10 }
 0x13f   : > { %1045 = vmatmul.msk.f32.gmra.mxu2 %vm686_vm1, %v660_v12 }
 0x140   : > { %v490_v13 = vpop.f32.mrf.mxu0 }
 0x141   : > { %v612_v15 = vpop.f32.mrf.mxu1  ;;  %v491_v16 = vadd.f32 %v1326_v14, %v490_v13 }
 0x142   : > { %v806_v17 = vpop.f32.mrf.mxu2 }
 0x143   : > { %v604_v18 = vadd.f32 %v603_v55, %v491_v16  ;;  %v807_v20 = vadd.f32 %v1405_v60, %v806_v17 }
 0x145   : > { %v661_v21 = vmax.f32 %v604_v18, 0.0  ;;  %899 = vst.msk [vmem:[%s1411_s19 + $0x10] sm:$0xff] %vm896_vm2, %v807_v20  ;;  %v527_v20 = vadd.f32 %v1326_v14, %v1430_v22 }
 0x147   : > { %1046 = vmatmul.msk.f32.gmra.mxu2 %vm686_vm1, %v661_v21 }
 0x148   : > { %v493_v23 = vpop.f32.mrf.mxu0 }
 0x149   : > { %v615_v24 = vpop.f32.mrf.mxu1  ;;  %v494_v25 = vadd.f32 %v1326_v14, %v493_v23 }
 0x14a   : > { %v809_v26 = vpop.f32.mrf.mxu2  ;;  %v616_v55 = vadd.f32 %v615_v24, %v503_v34 }
 0x14b   : > { %v607_v28 = vadd.f32 %v606_v62, %v494_v25  ;;  %v810_v29 = vadd.f32 %v1405_v60, %v809_v26  ;;  %v630_v62 = vpop.f32.mrf.mxu3 }
 0x14c   : > { %v665_v61 = vmax.f32 %v616_v55, 0.0 }
 0x14d   : > { %v662_v30 = vmax.f32 %v607_v28, 0.0  ;;  %900 = vst.msk [vmem:[%s1411_s19 + $0x18] sm:$0xff] %vm896_vm2, %v810_v29 }
 0x14f   : > { %1047 = vmatmul.msk.f32.gmra.mxu2 %vm686_vm1, %v662_v30 }
 0x150   : > { %v496_v31 = vpop.f32.mrf.mxu0 }
 0x151   : > { %v618_v32 = vpop.f32.mrf.mxu1  ;;  %v497_v33 = vadd.f32 %v1326_v14, %v496_v31 }
 0x152   : > { %v812_v36 = vpop.f32.mrf.mxu2  ;;  %v619_v0 = vadd.f32 %v618_v32, %v506_v19 }
 0x153   : > { %v610_v37 = vadd.f32 %v609_v6, %v497_v33  ;;  %v813_v38 = vadd.f32 %v1405_v60, %v812_v36  ;;  %v631_v6 = vadd.f32 %v630_v62, %v518_v48  ;;  %v633_v27 = vpop.f32.mrf.mxu3 }
 0x154   : > { %v666_v5 = vmax.f32 %v619_v0, 0.0  ;;  %v634_v10 = vadd.f32 %v633_v27, %v521_v8 }
 0x155   : > { %v663_v39 = vmax.f32 %v610_v37, 0.0  ;;  %901 = vst.msk [vmem:[%s1411_s19 + $0x20] sm:$0xff] %vm896_vm2, %v813_v38  ;;  %v670_v9 = vmax.f32 %v631_v6, 0.0 }
 0x156   : > { %v671_v16 = vmax.f32 %v634_v10, 0.0 }
 0x157   : > { %1048 = vmatmul.msk.f32.gmra.mxu2 %vm686_vm1, %v663_v39 }
 0x158   : > { %v499_v42 = vpop.f32.mrf.mxu0 }
 0x159   : > { %v621_v43 = vpop.f32.mrf.mxu1  ;;  %v500_v44 = vadd.f32 %v1326_v14, %v499_v42 }
 0x15a   : > { %v622_v45 = vadd.f32 %v621_v43, %v509_v40  ;;  %v815_v46 = vpop.f32.mrf.mxu2 }
 0x15b   : > { %v613_v49 = vadd.f32 %v612_v15, %v500_v44  ;;  %v816_v51 = vadd.f32 %v1405_v60, %v815_v46  ;;  %v636_v12 = vpop.f32.mrf.mxu3  ;;  %v524_v15 = vadd.f32 %v1326_v14, %v1421_v11 }
 0x15c   : > { %v667_v50 = vmax.f32 %v622_v45, 0.0 }
 0x15d   : > { %v664_v53 = vmax.f32 %v613_v49, 0.0  ;;  %902 = vst.msk [vmem:[%s1411_s19 + $0x28] sm:$0xff] %vm896_vm2, %v816_v51  ;;  %v637_v1 = vadd.f32 %v636_v12, %v524_v15 }
 0x15e   : > { %1052 = vmatmul.msk.f32.vlgmr.msra.gmra.mxu3 %vm686_vm1, %v667_v50 }
 0x15f   : > { %1049 = vmatmul.msk.f32.gmra.mxu2 %vm686_vm1, %v664_v53  ;;  %v672_v21 = vmax.f32 %v637_v1, 0.0 }
 0x162   : > { %v818_v57 = vpop.f32.mrf.mxu2 }
 0x163   : > { %v819_v59 = vadd.f32 %v1405_v60, %v818_v57  ;;  %v639_v24 = vpop.f32.mrf.mxu3 }
 0x164   : > { %v640_v11 = vadd.f32 %v639_v24, %v527_v20 }
 0x165   : > { %903 = vst.msk [vmem:[%s1411_s19 + $0x30] sm:$0xff] %vm896_vm2, %v819_v59 }
 0x166   : > { %1053 = vmatmul.msk.f32.gmra.mxu3 %vm686_vm1, %v668_v58  ;;  %v673_v26 = vmax.f32 %v640_v11, 0.0 }
 0x167   : > { %1050 = vmatmul.msk.f32.gmra.mxu2 %vm686_vm1, %v665_v61 }
 0x16a   : > { %v821_v2 = vpop.f32.mrf.mxu2 }
 0x16b   : > { %v822_v4 = vadd.f32 %v1405_v60, %v821_v2 }
 0x16d   : > { %904 = vst.msk [vmem:[%s1411_s19 + $0x38] sm:$0xff] %vm896_vm2, %v822_v4 }
 0x16e   : > { %1054 = vmatmul.msk.f32.gmra.mxu3 %vm686_vm1, %v669_v3 }
 0x16f   : > { %1051 = vmatmul.msk.f32.gmra.mxu2 %vm686_vm1, %v666_v5 }
 0x172   : > { %v824_v7 = vpop.f32.mrf.mxu2 }
 0x173   : > { %v825_v56 = vadd.f32 %v1405_v60, %v824_v7 }
 0x175   : > { %905 = vst.msk [vmem:[%s1411_s19 + $0x40] sm:$0xff] %vm896_vm2, %v825_v56 }
 0x176   : > { %1055 = vmatmul.msk.f32.gmra.mxu3 %vm686_vm1, %v670_v9 }
 0x17a   : > { %v827_v13 = vpop.f32.mrf.mxu2 }
 0x17b   : > { %v828_v17 = vadd.f32 %v1405_v60, %v827_v13 }
 0x17d   : > { %906 = vst.msk [vmem:[%s1411_s19 + $0x48] sm:$0xff] %vm896_vm2, %v828_v17 }
 0x17e   : > { %1056 = vmatmul.msk.f32.gmra.mxu3 %vm686_vm1, %v671_v16 }
 0x182   : > { %v830_v18 = vpop.f32.mrf.mxu2 }
 0x183   : > { %v831_v23 = vadd.f32 %v1405_v60, %v830_v18 }
 0x185   : > { %907 = vst.msk [vmem:[%s1411_s19 + $0x50] sm:$0xff] %vm896_vm2, %v831_v23 }
 0x186   : > { %1057 = vmatmul.msk.f32.gmra.mxu3 %vm686_vm1, %v672_v21 }
 0x18a   : > { %v833_v25 = vpop.f32.mrf.mxu2 }
 0x18b   : > { %v834_v28 = vadd.f32 %v1405_v60, %v833_v25 }
 0x18d   : > { %908 = vst.msk [vmem:[%s1411_s19 + $0x58] sm:$0xff] %vm896_vm2, %v834_v28 }
 0x18e   : > { %1058 = vmatmul.msk.f32.gmra.mxu3 %vm686_vm1, %v673_v26 }
 0x192   : > { %v836_v14 = vpop.f32.mrf.mxu2 }
 0x193   : > { %v837_v22 = vadd.f32 %v1405_v60, %v836_v14 }
 0x195   : > { %909 = vst.msk [vmem:[%s1411_s19 + $0x60] sm:$0xff] %vm896_vm2, %v837_v22 }
 0x19a   : > { %v839_v29 = vpop.f32.mrf.mxu2 }
 0x19b   : > { %v840_v30 = vadd.f32 %v1405_v60, %v839_v29 }
 0x19d   : > { %910 = vst.msk [vmem:[%s1411_s19 + $0x68] sm:$0xff] %vm896_vm2, %v840_v30 }
 0x1a2   : > { %v842_v31 = vpop.f32.mrf.mxu2 }
 0x1a3   : > { %v843_v32 = vadd.f32 %v1405_v60, %v842_v31 }
 0x1a5   : > { %911 = vst.msk [vmem:[%s1411_s19 + $0x70] sm:$0xff] %vm896_vm2, %v843_v32 }
 0x1aa   : > { %v845_v33 = vpop.f32.mrf.mxu2 }
 0x1ab   : > { %v846_v35 = vadd.f32 %v1405_v60, %v845_v33 }
 0x1ad   : > { %912 = vst.msk [vmem:[%s1411_s19 + $0x78] sm:$0xff] %vm896_vm2, %v846_v35 }
 0x1b2   : > { %v848_v36 = vpop.f32.mrf.mxu2 }
 0x1b3   : > { %v849_v37 = vadd.f32 %v1405_v60, %v848_v36 }
 0x1b5   : > { %913 = vst.msk [vmem:[%s1411_s19 + $0x80] sm:$0xff] %vm896_vm2, %v849_v37 }
 0x1ba   : > { %v851_v38 = vpop.f32.mrf.mxu2 }
 0x1bb   : > { %v852_v39 = vadd.f32 %v1405_v60, %v851_v38 }
 0x1bd   : > { %914 = vst.msk [vmem:[%s1411_s19 + $0x88] sm:$0xff] %vm896_vm2, %v852_v39 }
 0x1c2   : > { %v854_v40 = vpop.f32.mrf.mxu2 }
 0x1c3   : > { %v855_v42 = vadd.f32 %v1405_v60, %v854_v40 }
 0x1c5   : > { %915 = vst.msk [vmem:[%s1411_s19 + $0x90] sm:$0xff] %vm896_vm2, %v855_v42 }
 0x1ca   : > { %v857_v43 = vpop.f32.mrf.mxu2 }
 0x1cb   : > { %v858_v44 = vadd.f32 %v1405_v60, %v857_v43 }
 0x1cd   : > { %916 = vst.msk [vmem:[%s1411_s19 + $0x98] sm:$0xff] %vm896_vm2, %v858_v44 }
 0x1d2   : > { %v860_v45 = vpop.f32.mrf.mxu2 }
 0x1d3   : > { %v861_v46 = vadd.f32 %v1405_v60, %v860_v45 }
 0x1d5   : > { %917 = vst.msk [vmem:[%s1411_s19 + $0xa0] sm:$0xff] %vm896_vm2, %v861_v46 }
 0x1da   : > { %v863_v47 = vpop.f32.mrf.mxu2 }
 0x1db   : > { %v864_v49 = vadd.f32 %v1405_v60, %v863_v47 }
 0x1dd   : > { %918 = vst.msk [vmem:[%s1411_s19 + $0xa8] sm:$0xff] %vm896_vm2, %v864_v49 }
 0x1e1   : > { %v875_v50 = vpop.f32.mrf.mxu3 }
 0x1e2   : > { %v876_v51 = vadd.f32 %v1405_v60, %v875_v50  ;;  %v866_v52 = vpop.f32.mrf.mxu2 }
 0x1e3   : > { %v867_v53 = vadd.f32 %v1405_v60, %v866_v52 }
 0x1e4   : > { %922 = vst.msk [vmem:[%s1411_s19 + $0xc8] sm:$0xff] %vm896_vm2, %v876_v51 }
 0x1e5   : > { %919 = vst.msk [vmem:[%s1411_s19 + $0xb0] sm:$0xff] %vm896_vm2, %v867_v53 }
 0x1e9   : > { %v878_v34 = vpop.f32.mrf.mxu3 }
 0x1ea   : > { %v879_v54 = vadd.f32 %v1405_v60, %v878_v34  ;;  %v869_v55 = vpop.f32.mrf.mxu2 }
 0x1eb   : > { %v870_v57 = vadd.f32 %v1405_v60, %v869_v55 }
 0x1ec   : > { %923 = vst.msk [vmem:[%s1411_s19 + $0xd0] sm:$0xff] %vm896_vm2, %v879_v54 }
 0x1ed   : > { %920 = vst.msk [vmem:[%s1411_s19 + $0xb8] sm:$0xff] %vm896_vm2, %v870_v57 }
 0x1f1   : > { %v881_v41 = vpop.f32.mrf.mxu3 }
 0x1f2   : > { %v882_v58 = vadd.f32 %v1405_v60, %v881_v41  ;;  %v872_v59 = vpop.f32.mrf.mxu2 }
 0x1f3   : > { %v873_v61 = vadd.f32 %v1405_v60, %v872_v59 }
 0x1f4   : > { %924 = vst.msk [vmem:[%s1411_s19 + $0xd8] sm:$0xff] %vm896_vm2, %v882_v58 }
 0x1f5   : > { %921 = vst.msk [vmem:[%s1411_s19 + $0xc0] sm:$0xff] %vm896_vm2, %v873_v61 }
 0x1f9   : > { %v884_v62 = vpop.f32.mrf.mxu3 }
 0x1fa   : > { %v885_v19 = vadd.f32 %v1405_v60, %v884_v62 }
 0x1fc   : > { %925 = vst.msk [vmem:[%s1411_s19 + $0xe0] sm:$0xff] %vm896_vm2, %v885_v19 }
 0x201   : > { %v887_v63 = vpop.f32.mrf.mxu3 }
 0x202   : > { %v888_v0 = vadd.f32 %v1405_v60, %v887_v63 }
 0x204   : > { %926 = vst.msk [vmem:[%s1411_s19 + $0xe8] sm:$0xff] %vm896_vm2, %v888_v0 }
 0x209   : > { %v890_v2 = vpop.f32.mrf.mxu3 }
 0x20a   : > { %v891_v48 = vadd.f32 %v1405_v60, %v890_v2 }
 0x20c   : > { %927 = vst.msk [vmem:[%s1411_s19 + $0xf0] sm:$0xff] %vm896_vm2, %v891_v48 }
 0x211   : > { %v893_v3 = vpop.f32.mrf.mxu3 }
 0x212   : > { %v894_v4 = vadd.f32 %v1405_v60, %v893_v3 }
 0x214   : > { %928 = vst.msk [vmem:[%s1411_s19 + $0xf8] sm:$0xff] %vm896_vm2, %v894_v4 }
 0x215 PF: > { %s15_s18 = sadd.s32 1, %s1106_s18  }
 0x216   : > { %p12_p4 = scmp.ge.s32.totalorder %s15_s18, 4  }
 0x218   :  { %14 = sbr.rel (!%p12_p4) target bundleno = 1 (0x1), region = 70 }

</bundles_post_ra>
